<compile_context>
chip_gen: v6e
topology: v6e:2x2x1
jax: 0.10.0
libtpu: 0.0.40
codegen_flags: <defaults>
</compile_context>

<pallas_src>
import numpy as np
import jax
import jax.numpy as jnp
from jax.experimental import pallas as pl
from jax.experimental.pallas import tpu as pltpu

EPS = 1e-5          # nn.BatchNorm2d default eps
NEG_SLOPE = 0.01    # F.leaky_relu default negative_slope


def _pad_to(v, m):
    return -(-v // m) * m


# ---------------------------------------------------------------------------
# One-time weight re-layout + packing (host-side numpy; called once)
# ---------------------------------------------------------------------------
def prepare_params(params, h, w, num_actions):
    """Re-layout PyTorch-style params into ONE packed f32 buffer + static meta.

    Activation layout used throughout the kernel: 2-D (rows, cols) with
    rows = (channel, h) padded to a multiple of 8, cols = (w, n), n fastest.
    Each VALID conv becomes a single matmul  y = M_stacked @ RHS_stacked
    where RHS_stacked vertically stacks the kw shifted column groups.
    """
    f32 = np.float32
    placements = []          # (col_offset, 2-D array) pasted at row 0
    layer_meta = []
    col = 0

    h_in, w_in, cin = h, w, 1
    r_in_pad = _pad_to(cin * h_in, 8)           # input rows padded to 16
    a0_rows = r_in_pad

    for (wk, bk, gk, bbk) in [("w1", "b1", "g1", "beta1"),
                              ("w2", "b2", "g2", "beta2"),
                              ("w3", "b3", "g3", "beta3")]:
        wgt = np.asarray(params[wk], f32)
        cout, cin_w, kh, kw = wgt.shape
        assert cin_w == cin
        ho, wo = h_in - kh + 1, w_in - kw + 1
        r_out = cout * ho
        r_out_pad = _pad_to(r_out, 8)

        # Stacked conv matrix: m[co*ho+r, j*r_in_pad + ci*h_in + r + i]
        #                        = wgt[co, ci, i, j]
        m = np.zeros((r_out_pad, kw * r_in_pad), f32)
        for j in range(kw):
            base = j * r_in_pad
            for i in range(kh):
                for r in range(ho):
                    m[r:r_out:ho,
                      base + r + i: base + cin * h_in: h_in] = wgt[:, :, i, j]

        # Per-row bias | gamma | beta (padded rows = 0)
        aff = np.zeros((r_out_pad, 3), f32)
        aff[:r_out, 0] = np.repeat(np.asarray(params[bk], f32), ho)
        aff[:r_out, 1] = np.repeat(np.asarray(params[gk], f32), ho)
        aff[:r_out, 2] = np.repeat(np.asarray(params[bbk], f32), ho)

        # Same-channel 0/1 matrix for BN batch stats (padded rows/cols = 0)
        grp = np.repeat(np.arange(cout), ho)
        bmat = np.zeros((r_out_pad, r_out_pad), f32)
        bmat[:r_out, :r_out] = (grp[:, None] == grp[None, :]).astype(f32)

        m_off = col                              # 128-lane aligned
        aff_off = m_off + kw * r_in_pad
        bmat_off = aff_off + 3
        placements += [(m_off, m), (aff_off, aff), (bmat_off, bmat)]
        layer_meta.append((kw, r_in_pad, r_out_pad, ho, wo,
                           m_off, aff_off, bmat_off))
        col = _pad_to(bmat_off + r_out_pad, 128)

        h_in, w_in, cin = ho, wo, cout
        r_in_pad = r_out_pad

    # Linear head: fold PyTorch's x.view(N,-1) flatten (C,H,W-major) into the
    # weight so the head is a single (A, W3*R3pad) @ (W3*R3pad, N) matmul.
    c3, h3, w3 = cin, h_in, w_in
    r3_pad = r_in_pad
    hw = np.asarray(params["head_w"], f32)
    a_act = hw.shape[0]
    assert a_act == num_actions and hw.shape[1] == c3 * h3 * w3
    hw4 = hw.reshape(a_act, c3, h3, w3)
    wh = np.zeros((a_act, w3 * r3_pad), f32)
    for wp in range(w3):
        wh[:, wp * r3_pad: wp * r3_pad + c3 * h3] = \
            hw4[:, :, :, wp].reshape(a_act, c3 * h3)
    hb = np.asarray(params["head_b"], f32).reshape(a_act, 1)

    wh_off = col
    hb_off = wh_off + w3 * r3_pad
    placements += [(wh_off, wh), (hb_off, hb)]
    col = _pad_to(hb_off + 1, 128)

    r_max = max(arr.shape[0] for _, arr in placements)
    packed = np.zeros((r_max, col), f32)
    for c0, arr in placements:
        packed[:arr.shape[0], c0:c0 + arr.shape[1]] = arr

    head_meta = (w3, r3_pad, a_act, wh_off, hb_off)
    meta = (tuple(layer_meta), head_meta, a0_rows, h, w, 1)
    return jnp.asarray(packed), meta


# ---------------------------------------------------------------------------
# Fused forward: one pallas_call for the whole network
# ---------------------------------------------------------------------------
def build_forward(meta):
    layer_meta, head_meta, a0_rows, h0, w0, c0 = meta
    w3, r3_pad, num_actions, wh_off, hb_off = head_meta

    def forward(x, packed):
        n = x.shape[0]
        assert x.shape[1:] == (c0, h0, w0)
        # (N,C,H,W) -> rows=(c,h) padded to 8, cols=(w,n) with n fastest.
        a0 = jnp.transpose(x, (1, 2, 3, 0)).reshape(c0 * h0, w0 * n)
        a0 = jnp.pad(a0, ((0, a0_rows - c0 * h0), (0, 0)))

        k_max = max(max(kw * rip for (kw, rip, *_r) in layer_meta),
                    w3 * r3_pad)
        wcols_max = max(wo * n for (_k, _ri, _ro, _h, wo, *_r) in layer_meta)

        def kernel(x_ref, p_ref, o_ref, rhs_ref):
            # Stack `pieces` shifted column groups of `act` into the VMEM
            # scratch -> contiguous RHS for a single MXU matmul.
            def stack(act, pieces, rip, wcols):
                for j in range(pieces):
                    rhs_ref[j * rip:(j + 1) * rip, 0:wcols] = \
                        act[:, j * n: j * n + wcols]
                return rhs_ref[0:pieces * rip, 0:wcols]

            act = x_ref[...]
            for (kw, rip, rop, ho, wo, m_off, aff_off, bmat_off) in layer_meta:
                wcols = wo * n
                inv_cnt = 1.0 / float(ho * wo * n)
                rhs = stack(act, kw, rip, wcols)
                m = p_ref[0:rop, m_off: m_off + kw * rip]
                aff = p_ref[0:rop, aff_off: aff_off + 3]
                bmat = p_ref[0:rop, bmat_off: bmat_off + rop]

                # VALID conv (stride 1): ONE stacked-K matmul on the MXU.
                y = jnp.dot(m, rhs, preferred_element_type=jnp.float32)
                y = y + aff[:, 0:1]                       # conv bias

                # BatchNorm2d training-mode batch stats: one merged bmat dot
                # on [sum(y), sum(y*y)], var = E[y^2] - mean^2.
                s1 = jnp.sum(y, axis=1, keepdims=True)
                s2 = jnp.sum(y * y, axis=1, keepdims=True)
                colsel = jax.lax.broadcasted_iota(jnp.int32, (rop, 2), 1)
                s12 = jnp.where(colsel == 0, s1, s2)      # (R, 2), no concat
                stats = jnp.dot(bmat, s12,
                                preferred_element_type=jnp.float32) * inv_cnt
                mean = stats[:, 0:1]
                var = jnp.maximum(stats[:, 1:2] - mean * mean, 0.0)
                z = (y - mean) * jax.lax.rsqrt(var + EPS) * aff[:, 1:2] \
                    + aff[:, 2:3]
                act = jnp.maximum(z, NEG_SLOPE * z)       # LeakyReLU(0.01)

            # Linear head: one (A, W3*R3pad) @ (W3*R3pad, N) matmul + 1 store.
            rhs_h = stack(act, w3, r3_pad, n)
            wh = p_ref[0:num_actions, wh_off: wh_off + w3 * r3_pad]
            hb = p_ref[0:num_actions, hb_off: hb_off + 1]
            o_ref[...] = jnp.dot(wh, rhs_h,
                                 preferred_element_type=jnp.float32) + hb

        vmem = pl.BlockSpec(memory_space=pltpu.MemorySpace.VMEM)
        q_t = pl.pallas_call(
            kernel,
            out_shape=jax.ShapeDtypeStruct((num_actions, n), jnp.float32),
            in_specs=[vmem, vmem],
            out_specs=vmem,
            scratch_shapes=[pltpu.VMEM((k_max, wcols_max), jnp.float32)],
        )(a0, packed)
        return q_t.T                                      # (N, A)

    return jax.jit(forward)


# ---------------------------------------------------------------------------
# Pure-JAX reference (verification only)
# ---------------------------------------------------------------------------
def dqn_forward_ref(x, params):
    def conv(x, w, b):
        y = jax.lax.conv_general_dilated(
            x, w, (1, 1), "VALID",
            dimension_numbers=("NCHW", "OIHW", "NCHW"))
        return y + b.reshape(1, -1, 1, 1)

    def bn(y, g, bt):
        mean = y.mean(axis=(0, 2, 3), keepdims=True)
        var = ((y - mean) ** 2).mean(axis=(0, 2, 3), keepdims=True)
        return ((y - mean) / jnp.sqrt(var + EPS)) * g.reshape(1, -1, 1, 1) \
            + bt.reshape(1, -1, 1, 1)

    def lrelu(z):
        return jnp.where(z >= 0, z, NEG_SLOPE * z)

    x = lrelu(bn(conv(x, params["w1"], params["b1"]), params["g1"], params["beta1"]))
    x = lrelu(bn(conv(x, params["w2"], params["b2"]), params["g2"], params["beta2"]))
    x = lrelu(bn(conv(x, params["w3"], params["b3"]), params["g3"], params["beta3"]))
    flat = x.reshape(x.shape[0], -1)
    return flat @ params["head_w"].T + params["head_b"]


# ---------------------------------------------------------------------------
def make_params(key, num_actions):
    ks = jax.random.split(key, 12)
    f32 = jnp.float32

    def rnd(k, shape, scale=0.1):
        return scale * jax.random.normal(k, shape, dtype=f32)

    return {
        # conv1: Conv2d(1, 5, k=2)
        "w1": rnd(ks[0], (5, 1, 2, 2)), "b1": rnd(ks[1], (5,)),
        "g1": 1.0 + rnd(ks[2], (5,)), "beta1": rnd(ks[3], (5,)),
        # conv2: Conv2d(5, 10, k=3)
        "w2": rnd(ks[4], (10, 5, 3, 3)), "b2": rnd(ks[5], (10,)),
        "g2": 1.0 + rnd(ks[6], (10,)), "beta2": rnd(ks[7], (10,)),
        # conv3: Conv2d(10, 10, k=3)
        "w3": rnd(ks[8], (10, 10, 3, 3)), "b3": rnd(ks[9], (10,)),
        "g3": 1.0 + rnd(ks[10], (10,)), "beta3": jnp.zeros((10,), f32),
        # head: Linear(200, num_actions)
        "head_w": rnd(ks[11], (num_actions, 200)),
        "head_b": jnp.zeros((num_actions,), f32),
    }


if __name__ == "__main__":
    num_actions = 4
    key = jax.random.PRNGKey(0)
    k_x, k_p = jax.random.split(key)

    # N=32 keeps every layer lane-dense: W*N = 288/256/192/128 columns.
    # (N, C, H, W) = (32, 1, 10, 9) -> conv stack -> (32, 10, 5, 4) -> 200 -> A
    N = 32
    x = jax.random.normal(k_x, (N, 1, 10, 9), dtype=jnp.float32)
    params = make_params(k_p, num_actions)

    packed, meta = prepare_params(params, h=10, w=9, num_actions=num_actions)
    fwd = build_forward(meta)

    out = jax.block_until_ready(fwd(x, packed))
    ref = jax.block_until_ready(dqn_forward_ref(x, params))

    assert out.shape == (N, num_actions), out.shape
    assert jnp.allclose(out, ref, rtol=1e-3, atol=1e-3), (out, ref)
    print("KERNEL_OK")
</pallas_src>

<mosaic_0001>
module attributes {stable_mosaic.version = 11 : i64} {
  func.func @kernel(%arg0: memref<16x288xf32, #tpu.memory_space<vmem>>, %arg1: memref<72x1024xf32, #tpu.memory_space<vmem>>, %arg2: memref<4x32xf32, #tpu.memory_space<vmem>>, %arg3: memref<224x256xf32, #tpu.memory_space<vmem>>) attributes {dimension_semantics = [], scalar_prefetch = 0 : i64, scratch_operands = 1 : i64, tpu.core_type = #tpu.core_type<tc>} {
    %c0 = arith.constant 0 : index
    %c0_0 = arith.constant 0 : index
    %0 = vector.load %arg0[%c0, %c0_0] : memref<16x288xf32, #tpu.memory_space<vmem>>, vector<16x288xf32>
    %1 = vector.extract_strided_slice %0 {offsets = [0, 0], sizes = [16, 256], strides = [1, 1]} : vector<16x288xf32> to vector<16x256xf32>
    %c0_1 = arith.constant 0 : index
    %c0_2 = arith.constant 0 : index
    %2 = vector.load %arg3[%c0_1, %c0_2] : memref<224x256xf32, #tpu.memory_space<vmem>>, vector<16x256xf32>
    tpu.vector_store %arg3[%c0_1, %c0_2], %1 {strides = array<i32>} : memref<224x256xf32, #tpu.memory_space<vmem>>, vector<16x256xf32>,
    %3 = vector.extract_strided_slice %0 {offsets = [0, 32], sizes = [16, 256], strides = [1, 1]} : vector<16x288xf32> to vector<16x256xf32>
    %c16 = arith.constant 16 : index
    %c0_3 = arith.constant 0 : index
    %4 = vector.load %arg3[%c16, %c0_3] : memref<224x256xf32, #tpu.memory_space<vmem>>, vector<16x256xf32>
    tpu.vector_store %arg3[%c16, %c0_3], %3 {strides = array<i32>} : memref<224x256xf32, #tpu.memory_space<vmem>>, vector<16x256xf32>,
    %c0_4 = arith.constant 0 : index
    %c0_5 = arith.constant 0 : index
    %5 = vector.load %arg3[%c0_4, %c0_5] : memref<224x256xf32, #tpu.memory_space<vmem>>, vector<32x256xf32>
    %c0_6 = arith.constant 0 : index
    %c0_7 = arith.constant 0 : index
    %6 = vector.load %arg1[%c0_6, %c0_7] : memref<72x1024xf32, #tpu.memory_space<vmem>>, vector<48x32xf32>
    %c0_8 = arith.constant 0 : index
    %c32 = arith.constant 32 : index
    %7 = vector.load %arg1[%c0_8, %c32] : memref<72x1024xf32, #tpu.memory_space<vmem>>, vector<48x3xf32>
    %c0_9 = arith.constant 0 : index
    %c35 = arith.constant 35 : index
    %8 = vector.load %arg1[%c0_9, %c35] : memref<72x1024xf32, #tpu.memory_space<vmem>>, vector<48x48xf32>
    %cst = arith.constant dense<0.000000e+00> : vector<48x256xf32>
    %9 = tpu.matmul %6, %5, %cst {dimension_numbers = #tpu.dot_dimension_numbers<[1], [0], [0], [1], [0, 0, 1, 1], [], []>} : vector<48x32xf32>, vector<32x256xf32>, vector<48x256xf32> -> vector<48x256xf32>
    %10 = vector.extract_strided_slice %7 {offsets = [0, 0], sizes = [48, 1], strides = [1, 1]} : vector<48x3xf32> to vector<48x1xf32>
    %11 = vector.broadcast %10 : vector<48x1xf32> to vector<48x256xf32>
    %12 = arith.addf %9, %11 : vector<48x256xf32>
    %cst_10 = arith.constant dense<0.000000e+00> : vector<48xf32>
    %13 = vector.multi_reduction <add>, %12, %cst_10 [1] : vector<48x256xf32> to vector<48xf32>
    %14 = vector.shape_cast %13 : vector<48xf32> to vector<48x1xf32>
    %15 = arith.mulf %12, %12 : vector<48x256xf32>
    %cst_11 = arith.constant dense<0.000000e+00> : vector<48xf32>
    %16 = vector.multi_reduction <add>, %15, %cst_11 [1] : vector<48x256xf32> to vector<48xf32>
    %17 = vector.shape_cast %16 : vector<48xf32> to vector<48x1xf32>
    %18 = tpu.iota {dimensions = array<i32: 1>} : vector<48x2xi32>
    %c0_i32 = arith.constant 0 : i32
    %19 = vector.broadcast %c0_i32 : i32 to vector<48x2xi32>
    %20 = arith.cmpi eq, %18, %19 : vector<48x2xi32>
    %21 = vector.shape_cast %14 : vector<48x1xf32> to vector<48x1xf32>
    %22 = vector.broadcast %21 : vector<48x1xf32> to vector<48x2xf32>
    %23 = vector.shape_cast %17 : vector<48x1xf32> to vector<48x1xf32>
    %24 = vector.broadcast %23 : vector<48x1xf32> to vector<48x2xf32>
    %25 = arith.select %20, %22, %24 : vector<48x2xi1>, vector<48x2xf32>
    %cst_12 = arith.constant dense<0.000000e+00> : vector<48x2xf32>
    %26 = tpu.matmul %8, %25, %cst_12 {dimension_numbers = #tpu.dot_dimension_numbers<[1], [0], [0], [1], [0, 0, 1, 1], [], []>} : vector<48x48xf32>, vector<48x2xf32>, vector<48x2xf32> -> vector<48x2xf32>
    %cst_13 = arith.constant 4.34027781E-4 : f32
    %27 = vector.broadcast %cst_13 : f32 to vector<48x2xf32>
    %28 = arith.mulf %26, %27 : vector<48x2xf32>
    %29 = vector.extract_strided_slice %28 {offsets = [0, 0], sizes = [48, 1], strides = [1, 1]} : vector<48x2xf32> to vector<48x1xf32>
    %30 = vector.extract_strided_slice %28 {offsets = [0, 1], sizes = [48, 1], strides = [1, 1]} : vector<48x2xf32> to vector<48x1xf32>
    %31 = arith.mulf %29, %29 : vector<48x1xf32>
    %32 = arith.subf %30, %31 : vector<48x1xf32>
    %cst_14 = arith.constant 0.000000e+00 : f32
    %33 = vector.broadcast %cst_14 : f32 to vector<48x1xf32>
    %34 = arith.maximumf %32, %33 : vector<48x1xf32>
    %35 = vector.broadcast %29 : vector<48x1xf32> to vector<48x256xf32>
    %36 = arith.subf %12, %35 : vector<48x256xf32>
    %cst_15 = arith.constant 9.99999974E-6 : f32
    %37 = vector.broadcast %cst_15 : f32 to vector<48x1xf32>
    %38 = arith.addf %34, %37 : vector<48x1xf32>
    %39 = math.rsqrt %38 : vector<48x1xf32>
    %40 = vector.broadcast %39 : vector<48x1xf32> to vector<48x256xf32>
    %41 = arith.mulf %36, %40 : vector<48x256xf32>
    %42 = vector.extract_strided_slice %7 {offsets = [0, 1], sizes = [48, 1], strides = [1, 1]} : vector<48x3xf32> to vector<48x1xf32>
    %43 = vector.broadcast %42 : vector<48x1xf32> to vector<48x256xf32>
    %44 = arith.mulf %41, %43 : vector<48x256xf32>
    %45 = vector.extract_strided_slice %7 {offsets = [0, 2], sizes = [48, 1], strides = [1, 1]} : vector<48x3xf32> to vector<48x1xf32>
    %46 = vector.broadcast %45 : vector<48x1xf32> to vector<48x256xf32>
    %47 = arith.addf %44, %46 : vector<48x256xf32>
    %cst_16 = arith.constant 0.00999999977 : f32
    %48 = vector.broadcast %cst_16 : f32 to vector<48x256xf32>
    %49 = arith.mulf %48, %47 : vector<48x256xf32>
    %50 = arith.maximumf %47, %49 : vector<48x256xf32>
    %51 = vector.extract_strided_slice %50 {offsets = [0, 0], sizes = [48, 192], strides = [1, 1]} : vector<48x256xf32> to vector<48x192xf32>
    %c0_17 = arith.constant 0 : index
    %c0_18 = arith.constant 0 : index
    %52 = vector.load %arg3[%c0_17, %c0_18] : memref<224x256xf32, #tpu.memory_space<vmem>>, vector<48x192xf32>
    tpu.vector_store %arg3[%c0_17, %c0_18], %51 {strides = array<i32>} : memref<224x256xf32, #tpu.memory_space<vmem>>, vector<48x192xf32>,
    %53 = vector.extract_strided_slice %50 {offsets = [0, 32], sizes = [48, 192], strides = [1, 1]} : vector<48x256xf32> to vector<48x192xf32>
    %c48 = arith.constant 48 : index
    %c0_19 = arith.constant 0 : index
    %54 = vector.load %arg3[%c48, %c0_19] : memref<224x256xf32, #tpu.memory_space<vmem>>, vector<48x192xf32>
    tpu.vector_store %arg3[%c48, %c0_19], %53 {strides = array<i32>} : memref<224x256xf32, #tpu.memory_space<vmem>>, vector<48x192xf32>,
    %55 = vector.extract_strided_slice %50 {offsets = [0, 64], sizes = [48, 192], strides = [1, 1]} : vector<48x256xf32> to vector<48x192xf32>
    %c96 = arith.constant 96 : index
    %c0_20 = arith.constant 0 : index
    %56 = vector.load %arg3[%c96, %c0_20] : memref<224x256xf32, #tpu.memory_space<vmem>>, vector<48x192xf32>
    tpu.vector_store %arg3[%c96, %c0_20], %55 {strides = array<i32>} : memref<224x256xf32, #tpu.memory_space<vmem>>, vector<48x192xf32>,
    %c0_21 = arith.constant 0 : index
    %c0_22 = arith.constant 0 : index
    %57 = vector.load %arg3[%c0_21, %c0_22] : memref<224x256xf32, #tpu.memory_space<vmem>>, vector<144x192xf32>
    %c0_23 = arith.constant 0 : index
    %c128 = arith.constant 128 : index
    %58 = vector.load %arg1[%c0_23, %c128] : memref<72x1024xf32, #tpu.memory_space<vmem>>, vector<72x144xf32>
    %c0_24 = arith.constant 0 : index
    %c272 = arith.constant 272 : index
    %59 = vector.load %arg1[%c0_24, %c272] : memref<72x1024xf32, #tpu.memory_space<vmem>>, vector<72x3xf32>
    %c0_25 = arith.constant 0 : index
    %c275 = arith.constant 275 : index
    %60 = vector.load %arg1[%c0_25, %c275] : memref<72x1024xf32, #tpu.memory_space<vmem>>, vector<72x72xf32>
    %cst_26 = arith.constant dense<0.000000e+00> : vector<72x192xf32>
    %61 = tpu.matmul %58, %57, %cst_26 {dimension_numbers = #tpu.dot_dimension_numbers<[1], [0], [0], [1], [0, 0, 1, 1], [], []>} : vector<72x144xf32>, vector<144x192xf32>, vector<72x192xf32> -> vector<72x192xf32>
    %62 = vector.extract_strided_slice %59 {offsets = [0, 0], sizes = [72, 1], strides = [1, 1]} : vector<72x3xf32> to vector<72x1xf32>
    %63 = vector.broadcast %62 : vector<72x1xf32> to vector<72x192xf32>
    %64 = arith.addf %61, %63 : vector<72x192xf32>
    %cst_27 = arith.constant dense<0.000000e+00> : vector<72xf32>
    %65 = vector.multi_reduction <add>, %64, %cst_27 [1] : vector<72x192xf32> to vector<72xf32>
    %66 = vector.shape_cast %65 : vector<72xf32> to vector<72x1xf32>
    %67 = arith.mulf %64, %64 : vector<72x192xf32>
    %cst_28 = arith.constant dense<0.000000e+00> : vector<72xf32>
    %68 = vector.multi_reduction <add>, %67, %cst_28 [1] : vector<72x192xf32> to vector<72xf32>
    %69 = vector.shape_cast %68 : vector<72xf32> to vector<72x1xf32>
    %70 = tpu.iota {dimensions = array<i32: 1>} : vector<72x2xi32>
    %c0_i32_29 = arith.constant 0 : i32
    %71 = vector.broadcast %c0_i32_29 : i32 to vector<72x2xi32>
    %72 = arith.cmpi eq, %70, %71 : vector<72x2xi32>
    %73 = vector.shape_cast %66 : vector<72x1xf32> to vector<72x1xf32>
    %74 = vector.broadcast %73 : vector<72x1xf32> to vector<72x2xf32>
    %75 = vector.shape_cast %69 : vector<72x1xf32> to vector<72x1xf32>
    %76 = vector.broadcast %75 : vector<72x1xf32> to vector<72x2xf32>
    %77 = arith.select %72, %74, %76 : vector<72x2xi1>, vector<72x2xf32>
    %cst_30 = arith.constant dense<0.000000e+00> : vector<72x2xf32>
    %78 = tpu.matmul %60, %77, %cst_30 {dimension_numbers = #tpu.dot_dimension_numbers<[1], [0], [0], [1], [0, 0, 1, 1], [], []>} : vector<72x72xf32>, vector<72x2xf32>, vector<72x2xf32> -> vector<72x2xf32>
    %cst_31 = arith.constant 7.44047633E-4 : f32
    %79 = vector.broadcast %cst_31 : f32 to vector<72x2xf32>
    %80 = arith.mulf %78, %79 : vector<72x2xf32>
    %81 = vector.extract_strided_slice %80 {offsets = [0, 0], sizes = [72, 1], strides = [1, 1]} : vector<72x2xf32> to vector<72x1xf32>
    %82 = vector.extract_strided_slice %80 {offsets = [0, 1], sizes = [72, 1], strides = [1, 1]} : vector<72x2xf32> to vector<72x1xf32>
    %83 = arith.mulf %81, %81 : vector<72x1xf32>
    %84 = arith.subf %82, %83 : vector<72x1xf32>
    %cst_32 = arith.constant 0.000000e+00 : f32
    %85 = vector.broadcast %cst_32 : f32 to vector<72x1xf32>
    %86 = arith.maximumf %84, %85 : vector<72x1xf32>
    %87 = vector.broadcast %81 : vector<72x1xf32> to vector<72x192xf32>
    %88 = arith.subf %64, %87 : vector<72x192xf32>
    %cst_33 = arith.constant 9.99999974E-6 : f32
    %89 = vector.broadcast %cst_33 : f32 to vector<72x1xf32>
    %90 = arith.addf %86, %89 : vector<72x1xf32>
    %91 = math.rsqrt %90 : vector<72x1xf32>
    %92 = vector.broadcast %91 : vector<72x1xf32> to vector<72x192xf32>
    %93 = arith.mulf %88, %92 : vector<72x192xf32>
    %94 = vector.extract_strided_slice %59 {offsets = [0, 1], sizes = [72, 1], strides = [1, 1]} : vector<72x3xf32> to vector<72x1xf32>
    %95 = vector.broadcast %94 : vector<72x1xf32> to vector<72x192xf32>
    %96 = arith.mulf %93, %95 : vector<72x192xf32>
    %97 = vector.extract_strided_slice %59 {offsets = [0, 2], sizes = [72, 1], strides = [1, 1]} : vector<72x3xf32> to vector<72x1xf32>
    %98 = vector.broadcast %97 : vector<72x1xf32> to vector<72x192xf32>
    %99 = arith.addf %96, %98 : vector<72x192xf32>
    %cst_34 = arith.constant 0.00999999977 : f32
    %100 = vector.broadcast %cst_34 : f32 to vector<72x192xf32>
    %101 = arith.mulf %100, %99 : vector<72x192xf32>
    %102 = arith.maximumf %99, %101 : vector<72x192xf32>
    %103 = vector.extract_strided_slice %102 {offsets = [0, 0], sizes = [72, 128], strides = [1, 1]} : vector<72x192xf32> to vector<72x128xf32>
    %c0_35 = arith.constant 0 : index
    %c0_36 = arith.constant 0 : index
    %104 = vector.load %arg3[%c0_35, %c0_36] : memref<224x256xf32, #tpu.memory_space<vmem>>, vector<72x128xf32>
    tpu.vector_store %arg3[%c0_35, %c0_36], %103 {strides = array<i32>} : memref<224x256xf32, #tpu.memory_space<vmem>>, vector<72x128xf32>,
    %105 = vector.extract_strided_slice %102 {offsets = [0, 32], sizes = [72, 128], strides = [1, 1]} : vector<72x192xf32> to vector<72x128xf32>
    %c72 = arith.constant 72 : index
    %c0_37 = arith.constant 0 : index
    %106 = vector.load %arg3[%c72, %c0_37] : memref<224x256xf32, #tpu.memory_space<vmem>>, vector<72x128xf32>
    tpu.vector_store %arg3[%c72, %c0_37], %105 {strides = array<i32>} : memref<224x256xf32, #tpu.memory_space<vmem>>, vector<72x128xf32>,
    %107 = vector.extract_strided_slice %102 {offsets = [0, 64], sizes = [72, 128], strides = [1, 1]} : vector<72x192xf32> to vector<72x128xf32>
    %c144 = arith.constant 144 : index
    %c0_38 = arith.constant 0 : index
    %108 = vector.load %arg3[%c144, %c0_38] : memref<224x256xf32, #tpu.memory_space<vmem>>, vector<72x128xf32>
    tpu.vector_store %arg3[%c144, %c0_38], %107 {strides = array<i32>} : memref<224x256xf32, #tpu.memory_space<vmem>>, vector<72x128xf32>,
    %c0_39 = arith.constant 0 : index
    %c0_40 = arith.constant 0 : index
    %109 = vector.load %arg3[%c0_39, %c0_40] : memref<224x256xf32, #tpu.memory_space<vmem>>, vector<216x128xf32>
    %c0_41 = arith.constant 0 : index
    %c384 = arith.constant 384 : index
    %110 = vector.load %arg1[%c0_41, %c384] : memref<72x1024xf32, #tpu.memory_space<vmem>>, vector<56x216xf32>
    %c0_42 = arith.constant 0 : index
    %c600 = arith.constant 600 : index
    %111 = vector.load %arg1[%c0_42, %c600] : memref<72x1024xf32, #tpu.memory_space<vmem>>, vector<56x3xf32>
    %c0_43 = arith.constant 0 : index
    %c603 = arith.constant 603 : index
    %112 = vector.load %arg1[%c0_43, %c603] : memref<72x1024xf32, #tpu.memory_space<vmem>>, vector<56x56xf32>
    %cst_44 = arith.constant dense<0.000000e+00> : vector<56x128xf32>
    %113 = tpu.matmul %110, %109, %cst_44 {dimension_numbers = #tpu.dot_dimension_numbers<[1], [0], [0], [1], [0, 0, 1, 1], [], []>} : vector<56x216xf32>, vector<216x128xf32>, vector<56x128xf32> -> vector<56x128xf32>
    %114 = vector.extract_strided_slice %111 {offsets = [0, 0], sizes = [56, 1], strides = [1, 1]} : vector<56x3xf32> to vector<56x1xf32>
    %115 = vector.broadcast %114 : vector<56x1xf32> to vector<56x128xf32>
    %116 = arith.addf %113, %115 : vector<56x128xf32>
    %cst_45 = arith.constant dense<0.000000e+00> : vector<56xf32>
    %117 = vector.multi_reduction <add>, %116, %cst_45 [1] : vector<56x128xf32> to vector<56xf32>
    %118 = vector.shape_cast %117 : vector<56xf32> to vector<56x1xf32>
    %119 = arith.mulf %116, %116 : vector<56x128xf32>
    %cst_46 = arith.constant dense<0.000000e+00> : vector<56xf32>
    %120 = vector.multi_reduction <add>, %119, %cst_46 [1] : vector<56x128xf32> to vector<56xf32>
    %121 = vector.shape_cast %120 : vector<56xf32> to vector<56x1xf32>
    %122 = tpu.iota {dimensions = array<i32: 1>} : vector<56x2xi32>
    %c0_i32_47 = arith.constant 0 : i32
    %123 = vector.broadcast %c0_i32_47 : i32 to vector<56x2xi32>
    %124 = arith.cmpi eq, %122, %123 : vector<56x2xi32>
    %125 = vector.shape_cast %118 : vector<56x1xf32> to vector<56x1xf32>
    %126 = vector.broadcast %125 : vector<56x1xf32> to vector<56x2xf32>
    %127 = vector.shape_cast %121 : vector<56x1xf32> to vector<56x1xf32>
    %128 = vector.broadcast %127 : vector<56x1xf32> to vector<56x2xf32>
    %129 = arith.select %124, %126, %128 : vector<56x2xi1>, vector<56x2xf32>
    %cst_48 = arith.constant dense<0.000000e+00> : vector<56x2xf32>
    %130 = tpu.matmul %112, %129, %cst_48 {dimension_numbers = #tpu.dot_dimension_numbers<[1], [0], [0], [1], [0, 0, 1, 1], [], []>} : vector<56x56xf32>, vector<56x2xf32>, vector<56x2xf32> -> vector<56x2xf32>
    %cst_49 = arith.constant 1.562500e-03 : f32
    %131 = vector.broadcast %cst_49 : f32 to vector<56x2xf32>
    %132 = arith.mulf %130, %131 : vector<56x2xf32>
    %133 = vector.extract_strided_slice %132 {offsets = [0, 0], sizes = [56, 1], strides = [1, 1]} : vector<56x2xf32> to vector<56x1xf32>
    %134 = vector.extract_strided_slice %132 {offsets = [0, 1], sizes = [56, 1], strides = [1, 1]} : vector<56x2xf32> to vector<56x1xf32>
    %135 = arith.mulf %133, %133 : vector<56x1xf32>
    %136 = arith.subf %134, %135 : vector<56x1xf32>
    %cst_50 = arith.constant 0.000000e+00 : f32
    %137 = vector.broadcast %cst_50 : f32 to vector<56x1xf32>
    %138 = arith.maximumf %136, %137 : vector<56x1xf32>
    %139 = vector.broadcast %133 : vector<56x1xf32> to vector<56x128xf32>
    %140 = arith.subf %116, %139 : vector<56x128xf32>
    %cst_51 = arith.constant 9.99999974E-6 : f32
    %141 = vector.broadcast %cst_51 : f32 to vector<56x1xf32>
    %142 = arith.addf %138, %141 : vector<56x1xf32>
    %143 = math.rsqrt %142 : vector<56x1xf32>
    %144 = vector.broadcast %143 : vector<56x1xf32> to vector<56x128xf32>
    %145 = arith.mulf %140, %144 : vector<56x128xf32>
    %146 = vector.extract_strided_slice %111 {offsets = [0, 1], sizes = [56, 1], strides = [1, 1]} : vector<56x3xf32> to vector<56x1xf32>
    %147 = vector.broadcast %146 : vector<56x1xf32> to vector<56x128xf32>
    %148 = arith.mulf %145, %147 : vector<56x128xf32>
    %149 = vector.extract_strided_slice %111 {offsets = [0, 2], sizes = [56, 1], strides = [1, 1]} : vector<56x3xf32> to vector<56x1xf32>
    %150 = vector.broadcast %149 : vector<56x1xf32> to vector<56x128xf32>
    %151 = arith.addf %148, %150 : vector<56x128xf32>
    %cst_52 = arith.constant 0.00999999977 : f32
    %152 = vector.broadcast %cst_52 : f32 to vector<56x128xf32>
    %153 = arith.mulf %152, %151 : vector<56x128xf32>
    %154 = arith.maximumf %151, %153 : vector<56x128xf32>
    %155 = vector.extract_strided_slice %154 {offsets = [0, 0], sizes = [56, 32], strides = [1, 1]} : vector<56x128xf32> to vector<56x32xf32>
    %c0_53 = arith.constant 0 : index
    %c0_54 = arith.constant 0 : index
    %156 = vector.load %arg3[%c0_53, %c0_54] : memref<224x256xf32, #tpu.memory_space<vmem>>, vector<56x32xf32>
    tpu.vector_store %arg3[%c0_53, %c0_54], %155 {strides = array<i32>} : memref<224x256xf32, #tpu.memory_space<vmem>>, vector<56x32xf32>,
    %157 = vector.extract_strided_slice %154 {offsets = [0, 32], sizes = [56, 32], strides = [1, 1]} : vector<56x128xf32> to vector<56x32xf32>
    %c56 = arith.constant 56 : index
    %c0_55 = arith.constant 0 : index
    %158 = vector.load %arg3[%c56, %c0_55] : memref<224x256xf32, #tpu.memory_space<vmem>>, vector<56x32xf32>
    tpu.vector_store %arg3[%c56, %c0_55], %157 {strides = array<i32>} : memref<224x256xf32, #tpu.memory_space<vmem>>, vector<56x32xf32>,
    %159 = vector.extract_strided_slice %154 {offsets = [0, 64], sizes = [56, 32], strides = [1, 1]} : vector<56x128xf32> to vector<56x32xf32>
    %c112 = arith.constant 112 : index
    %c0_56 = arith.constant 0 : index
    %160 = vector.load %arg3[%c112, %c0_56] : memref<224x256xf32, #tpu.memory_space<vmem>>, vector<56x32xf32>
    tpu.vector_store %arg3[%c112, %c0_56], %159 {strides = array<i32>} : memref<224x256xf32, #tpu.memory_space<vmem>>, vector<56x32xf32>,
    %161 = vector.extract_strided_slice %154 {offsets = [0, 96], sizes = [56, 32], strides = [1, 1]} : vector<56x128xf32> to vector<56x32xf32>
    %c168 = arith.constant 168 : index
    %c0_57 = arith.constant 0 : index
    %162 = vector.load %arg3[%c168, %c0_57] : memref<224x256xf32, #tpu.memory_space<vmem>>, vector<56x32xf32>
    tpu.vector_store %arg3[%c168, %c0_57], %161 {strides = array<i32>} : memref<224x256xf32, #tpu.memory_space<vmem>>, vector<56x32xf32>,
    %c0_58 = arith.constant 0 : index
    %c0_59 = arith.constant 0 : index
    %163 = vector.load %arg3[%c0_58, %c0_59] : memref<224x256xf32, #tpu.memory_space<vmem>>, vector<224x32xf32>
    %c0_60 = arith.constant 0 : index
    %c768 = arith.constant 768 : index
    %164 = vector.load %arg1[%c0_60, %c768] : memref<72x1024xf32, #tpu.memory_space<vmem>>, vector<4x224xf32>
    %c0_61 = arith.constant 0 : index
    %c992 = arith.constant 992 : index
    %165 = vector.load %arg1[%c0_61, %c992] : memref<72x1024xf32, #tpu.memory_space<vmem>>, vector<4x1xf32>
    %cst_62 = arith.constant dense<0.000000e+00> : vector<4x32xf32>
    %166 = tpu.matmul %164, %163, %cst_62 {dimension_numbers = #tpu.dot_dimension_numbers<[1], [0], [0], [1], [0, 0, 1, 1], [], []>} : vector<4x224xf32>, vector<224x32xf32>, vector<4x32xf32> -> vector<4x32xf32>
    %167 = vector.broadcast %165 : vector<4x1xf32> to vector<4x32xf32>
    %168 = arith.addf %166, %167 : vector<4x32xf32>
    %c0_63 = arith.constant 0 : index
    %c0_64 = arith.constant 0 : index
    %169 = vector.load %arg2[%c0_63, %c0_64] : memref<4x32xf32, #tpu.memory_space<vmem>>, vector<4x32xf32>
    tpu.vector_store %arg2[%c0_63, %c0_64], %168 {strides = array<i32>} : memref<4x32xf32, #tpu.memory_space<vmem>>, vector<4x32xf32>,
    return
  }
}

</mosaic_0001>

<bundles_post_ra>
// kernel: forward.1
= control target key start
LH: loop header
LB: loop body
LE: loop exit
PB: predicated region body
PF: predicated region fallthrough
CT: control target
= control target key end

     0   :  { %7 = vsyncpa [#allocation4], 0  ;;  %s4191_s0 = inlined_call_operand.vmem [shape: f32[16,288], index: 0, kind: input, shape index: {}]   ;;  %s4192_s1 = inlined_call_operand.hbm [shape: f32[72,1024], index: 1, kind: input, shape index: {}]   ;;  %s4193_s2 = inlined_call_operand.hbm [shape: f32[4,32], index: 2, kind: output, shape index: {}]  }
   0x1   :  { %8 = vsyncpa [#allocation5], 0  ;;  %s2998_s9 = smov [#allocation3]  }
   0x2   :  { %s16_s10 = sshll.u32 %s2998_s9, 4  ;;  %s17_s10 = int_to_ptr.vmem [resolvable:$true] %s16_s10 }
   0x3   :  { %s2962_s11 = scalar_lea.vmem %s17_s10, 9216  ;;  %p2967_p1 = scmp.lt.s32.totalorder %s17_s10, %s17_s10 }
   0x4   :  { %p2963_p0 = scmp.ne.s32.totalorder %s17_s10, %s2962_s11  ;;  %p2968_p2 = scmp.lt.s32.totalorder %s2962_s11, %s2962_s11 }
   0x6   :  { %p2969_p3 = por %p2968_p2, %p2967_p1 }
   0x8   :  { %p2970_p4 = pnand %p2969_p3, %p2963_p0 }
   0xa   :  { %2973 = shalt.err (!%p2970_p4)
}
   0xb   :  { %s2999_s12 = smov 1024   ;;  %s3000_s13 = smov 64  }
   0xc   :  { %22 = dma.hbm_to_vmem [thread:$0]  %s4192_s1, 9216, %s17_s10, [#allocation4], %s2999_s12, %s2999_s12, %s3000_s13  }
   0xd   :  { %2994 = dma.done.wait [#allocation4], 9216  }
   0xe   :  { %2995 = vsyncadd [#allocation4], 4294958080  ;;  %v30_v0 = vld [vmem:[%s4191_s0 + $0x20] sm:$0xff]  ;;  %v29_v1 = vld [vmem:[%s4191_s0 + $0x18] sm:$0xff]  ;;  %s3001_s20 = smov 96   ;;  %v3002_v4 = vmov 0.0  }
   0xf   :  { %50 = vrot.lane.b32.xlu0 %v30_v0, %s3001_s20  ;;  %35 = vst [vmem:[#allocation2 + $0x18] sm:$0xff] %v30_v0  ;;  %48 = vrot.lane.b32.xlu1 %v29_v1, %s3001_s20  ;;  %v27_v2 = vld [vmem:[%s4191_s0 + $0x8] sm:$0xff]  ;;  %v28_v5 = vld [vmem:[%s4191_s0 + $0x10] sm:$0xff]  ;;  %v3066_v7 = vld [vmem:[#allocation3 + $0x100] sm:$0xff]  ;;  %v3003_v9 = vmov 32   ;;  %vm54_vm0 = vcmask 785408  }
  0x10   :  { %v31_v3 = vld [vmem:[%s4191_s0 + $0x28] sm:$0xff]  ;;  %33 = vst [vmem:[#allocation2 + $0x8] sm:$0xff] %v27_v2  ;;  %188 = vmatprep.mubr.f32.mxu1 %v3002_v4  ;;  %v26_v6 = vld [vmem:[%s4191_s0] sm:$0xff]  ;;  %2843 = vset.pattern.permute.xlu0 %v3003_v9  ;;  %s3004_s0 = smov 93   ;;  %vm111_vm1 = vcmask 261120   ;;  %vm294_vm2 = vcmask 392192  }
  0x11   :  { %v3068_v8 = vld [vmem:[#allocation3 + $0x140] sm:$0xff]  ;;  %2844 = vset.pattern.permute.xlu1 %v3003_v9  ;;  %s3006_s28 = smov 1   ;;  %vm643_vm4 = vcmask 523264   ;;  %vm874_vm5 = vcmask 130048   ;;  %s3011_s29 = smov 109   ;;  %vm3012_vm6 = vmmov 0  }
  0x12   :  { %v3072_v10 = vld [vmem:[#allocation3 + $0x80] sm:$0xff]  ;;  %vm1129_vm7 = vcmask 588800   ;;  %vm1854_vm8 = vcmask 719872   ;;  %s3016_s30 = smov 37   ;;  %vm2046_vm9 = vcmask 302080   ;;  %vm2054_vm10 = vcmask 457728  }
  0x13   :  { %52 = vrot.lane.b32.xlu0 %v31_v3, %s3001_s20  ;;  %44 = vrot.lane.b32.xlu1 %v27_v2, %s3001_s20  ;;  %v3074_v11 = vld [vmem:[#allocation3 + $0xc0] sm:$0xff]  ;;  %s3019_s3 = smov 32   ;;  %s3021_s4 = smov [#allocation6]   ;;  %vm2612_vm11 = vcmask 257024  }
  0x14   :  { %v3078_v12 = vld [vmem:[#allocation3] sm:$0xff]  ;;  %s2620_s5 = sshll.u32 %s3021_s4, 4  ;;  %s2621_s5 = int_to_ptr.vmem [resolvable:$true] %s2620_s5 }
  0x15   :  { %v3080_v13 = vld [vmem:[#allocation3 + $0x40] sm:$0xff]  ;;  %s2974_s6 = scalar_lea.vmem %s2621_s5, 64  ;;  %p2979_p6 = scmp.lt.s32.totalorder %s2621_s5, %s2621_s5 }
  0x16   :  { %p2975_p5 = scmp.ne.s32.totalorder %s2621_s5, %s2974_s6  ;;  %p2980_p7 = scmp.lt.s32.totalorder %s2974_s6, %s2974_s6 }
  0x17   :  { %46 = vrot.lane.b32.xlu0 %v28_v5, %s3001_s20  ;;  %42 = vrot.lane.b32.xlu1 %v26_v6, %s3001_s20 }
  0x18   :  { %p2981_p8 = por %p2980_p7, %p2979_p6 }
  0x1a   :  { %p2982_p9 = pnand %p2981_p8, %p2975_p5 }
  0x1b   :  { %108 = vperm.xlu0 %2843, %v3068_v8   ;;  %103 = vperm.xlu1 %2844, %v3066_v7  }
  0x1f   :  { %93 = vperm.xlu0 %2843, %v3072_v10   ;;  %98 = vperm.xlu1 %2844, %v3074_v11  }
  0x23   :  { %83 = vperm.xlu0 %2843, %v3078_v12   ;;  %88 = vperm.xlu1 %2844, %v3080_v13  }
  0x27   :  { %284 = vrot.lane.b32.xlu1 %v3080_v13, %s3004_s0  ;;  %282 = vrot.lane.b32.xlu0 %v3078_v12, %s3004_s0 }
  0x2b   :  { %286 = vrot.lane.b32.xlu1 %v3072_v10, %s3004_s0 }
  0x81   :  { %v51_v14 = vpop.permute.xlu0 %50  ;;  %v49_v15 = vpop.permute.xlu1 %48 }
  0x82   :  { %v57_v19 = vsel %vm54_vm0, %v49_v15, %v51_v14 }
  0x85   :  { %v53_v16 = vpop.permute.xlu0 %52  ;;  %v45_v17 = vpop.permute.xlu1 %44 }
  0x86   :  { %v58_v18 = vsel %vm54_vm0, %v51_v14, %v53_v16 }
  0x87   :  { %66 = vst [vmem:[#allocation2 + $0x38] sm:$0xff] %v58_v18  ;;  %148 = vmatprep.subr.mxu1 %v58_v18 }
  0x88   :  { %149 = vmatpush1.msra.mxu1 %v57_v19 }
  0x89   :  { %v47_v20 = vpop.permute.xlu0 %46  ;;  %v43_v21 = vpop.permute.xlu1 %42 }
  0x8a   :  { %v56_v22 = vsel %vm54_vm0, %v45_v17, %v47_v20  ;;  %v55_v23 = vsel %vm54_vm0, %v43_v21, %v45_v17 }
  0x8b   :  { %64 = vst [vmem:[#allocation2 + $0x28] sm:$0xff] %v56_v22  ;;  %150 = vmatprep.subr.mxu1 %v56_v22 }
  0x8c   :  { %151 = vmatpush1.msra.mxu1 %v55_v23 }
  0x8d   :  { %152 = vmatprep.subr.mxu1 %v30_v0 }
  0x8e   :  { %153 = vmatpush1.msra.mxu1 %v29_v1 }
  0x8f   :  { %154 = vmatprep.subr.mxu1 %v27_v2 }
  0x90   :  { %155 = vmatpush1.msra.mxu1 %v26_v6 }
  0x91   :  { %2629 = vmatmul.mubr.msk.f32.vlgmr.msra.gmra.mxu1 %vm111_vm1, %v3078_v12 }
  0x92   :  { %194 = vmatprep.mubr.f32.mxu1 %v3002_v4 }
  0x95   :  { %2630 = vmatmul.mubr.msk.f32.gmra.mxu1 %vm111_vm1, %v3080_v13 }
  0x96   :  { %200 = vmatprep.mubr.f32.mxu1 %v3002_v4  ;;  %v109_v24 = vpop.permute.xlu0 %108  ;;  %v104_v28 = vpop.permute.xlu1 %103 }
  0x99   :  { %2631 = vmatmul.mubr.msk.f32.gmra.mxu1 %vm111_vm1, %v3072_v10 }
  0x9a   :  { %206 = vmatprep.mubr.f32.mxu1 %v3002_v4  ;;  %v94_v25 = vpop.permute.xlu0 %93  ;;  %v99_v29 = vpop.permute.xlu1 %98 }
  0x9d   :  { %2632 = vmatmul.mubr.msk.f32.gmra.mxu1 %vm111_vm1, %v3074_v11 }
  0x9e   :  { %212 = vmatprep.mubr.f32.mxu1 %v3002_v4  ;;  %v84_v26 = vpop.permute.xlu0 %83  ;;  %v89_v34 = vpop.permute.xlu1 %88 }
  0xa1   :  { %2633 = vmatmul.mubr.msk.f32.gmra.mxu1 %vm111_vm1, %v3066_v7 }
  0xa2   :  { %218 = vmatprep.mubr.f32.mxu1 %v3002_v4  ;;  %v283_v27 = vpop.permute.xlu0 %282  ;;  %v285_v22 = vpop.permute.xlu1 %284 }
  0xa5   :  { %2634 = vmatmul.mubr.msk.f32.gmra.mxu1 %vm111_vm1, %v3068_v8 }
  0xa6   :  { %2730 = vmatprep.mubr.msk.f32.mxu1 %vm294_vm2, %v283_v27  ;;  %v287_v23 = vpop.permute.xlu1 %286 }
 0x151   :  { %v190_v30 = vpop.f32.mrf.mxu1 }
 0x152   :  { %v3112_v31 = vadd.f32 %v190_v30, %v84_v26 }
 0x153   :  { %v192_v32 = vpop.f32.mrf.mxu1 }
 0x154   :  { %v3114_v33 = vadd.f32 %v192_v32, %v84_v26  ;;  %v243_v38 = vmul.f32 %v3112_v31, %v3112_v31 }
 0x155   :  { %v196_v35 = vpop.f32.mrf.mxu1 }
 0x156   :  { %v3116_v36 = vadd.f32 %v196_v35, %v89_v34  ;;  %v225_v37 = vadd.f32 %v3114_v33, %v3112_v31  ;;  %v244_v39 = vmul.f32 %v3114_v33, %v3114_v33 }
 0x157   :  { %v198_v40 = vpop.f32.mrf.mxu1 }
 0x158   :  { %v3124_v41 = vadd.f32 %v198_v40, %v89_v34  ;;  %226 = vadd.xlane.f32.xlu0 %v225_v37  ;;  %v255_v42 = vadd.f32 %v244_v39, %v243_v38  ;;  %v245_v46 = vmul.f32 %v3116_v36, %v3116_v36  ;;  %v273_v34 = vlaneseq }
 0x159   :  { %v202_v43 = vpop.f32.mrf.mxu1 }
 0x15a   :  { %v3126_v44 = vadd.f32 %v202_v43, %v94_v25  ;;  %256 = vadd.xlane.f32.xlu1 %v255_v42  ;;  %v228_v45 = vadd.f32 %v3124_v41, %v3116_v36  ;;  %v246_v47 = vmul.f32 %v3124_v41, %v3124_v41  ;;  %v3178_v38 = vand.u32 127, %v273_v34 }
 0x15b   :  { %v204_v48 = vpop.f32.mrf.mxu1 }
 0x15c   :  { %v3134_v49 = vadd.f32 %v204_v48, %v94_v25  ;;  %229 = vadd.xlane.f32.xlu0 %v228_v45  ;;  %v258_v50 = vadd.f32 %v246_v47, %v245_v46  ;;  %v247_v54 = vmul.f32 %v3126_v44, %v3126_v44  ;;  %vm275_vm3 = vcmp.eq.s32.totalorder %v3178_v38, 0 }
 0x15d   :  { %v208_v51 = vpop.f32.mrf.mxu1 }
 0x15e   :  { %v3136_v52 = vadd.f32 %v208_v51, %v99_v29  ;;  %259 = vadd.xlane.f32.xlu1 %v258_v50  ;;  %v231_v53 = vadd.f32 %v3134_v49, %v3126_v44  ;;  %v248_v55 = vmul.f32 %v3134_v49, %v3134_v49 }
 0x15f   :  { %v210_v56 = vpop.f32.mrf.mxu1 }
 0x160   :  { %v3144_v57 = vadd.f32 %v210_v56, %v99_v29  ;;  %232 = vadd.xlane.f32.xlu0 %v231_v53  ;;  %v261_v58 = vadd.f32 %v248_v55, %v247_v54  ;;  %v249_v62 = vmul.f32 %v3136_v52, %v3136_v52  ;;  %v3005_v54 = vmov 0  }
 0x161   :  { %v214_v59 = vpop.f32.mrf.mxu1  ;;  %2845 = vset.pattern.permute.xlu1 %v3005_v54  ;;  %2846 = vset.pattern.permute.xlu0 %v3005_v54 }
 0x162   :  { %v3146_v60 = vadd.f32 %v214_v59, %v104_v28  ;;  %262 = vadd.xlane.f32.xlu1 %v261_v58  ;;  %v234_v61 = vadd.f32 %v3144_v57, %v3136_v52  ;;  %v250_v63 = vmul.f32 %v3144_v57, %v3144_v57 }
 0x163   :  { %v216_v0 = vpop.f32.mrf.mxu1 }
 0x164   :  { %v3154_v1 = vadd.f32 %v216_v0, %v104_v28  ;;  %235 = vadd.xlane.f32.xlu0 %v234_v61  ;;  %v264_v2 = vadd.f32 %v250_v63, %v249_v62  ;;  %v251_v9 = vmul.f32 %v3146_v60, %v3146_v60 }
 0x165   :  { %v220_v3 = vpop.f32.mrf.mxu1 }
 0x166   :  { %v3156_v5 = vadd.f32 %v220_v3, %v109_v24  ;;  %265 = vadd.xlane.f32.xlu1 %v264_v2  ;;  %v237_v6 = vadd.f32 %v3154_v1, %v3146_v60  ;;  %v252_v14 = vmul.f32 %v3154_v1, %v3154_v1 }
 0x167   :  { %v222_v15 = vpop.f32.mrf.mxu1 }
 0x168   :  { %v3164_v16 = vadd.f32 %v222_v15, %v109_v24  ;;  %238 = vadd.xlane.f32.xlu0 %v237_v6  ;;  %v267_v17 = vadd.f32 %v252_v14, %v251_v9  ;;  %v253_v18 = vmul.f32 %v3156_v5, %v3156_v5 }
 0x16a   :  { %268 = vadd.xlane.f32.xlu1 %v267_v17  ;;  %v254_v19 = vmul.f32 %v3164_v16, %v3164_v16  ;;  %v240_v20 = vadd.f32 %v3164_v16, %v3156_v5 }
 0x16c   :  { %v270_v21 = vadd.f32 %v254_v19, %v253_v18 }
 0x16e   :  { %241 = vadd.xlane.f32.xlu1 %v240_v20  ;;  %271 = vadd.xlane.f32.xlu0 %v270_v21  ;;  %v3007_v21 = vmov 33  }
 0x17f   :  { %290 = vrot.lane.b32.xlu1 %v3066_v7, %s3004_s0 }
 0x184   :  { %288 = vrot.lane.b32.xlu0 %v3074_v11, %s3004_s0 }
 0x188   :  { %292 = vrot.lane.b32.xlu0 %v3068_v8, %s3004_s0 }
 0x1e1   :  { %v227_v24 = vpop.xlane.xlu0 %226 }
 0x1e3   :  { %v257_v25 = vpop.xlane.xlu1 %256 }
 0x1e4   :  { %v276_v48 = vsel %vm275_vm3, %v227_v24, %v257_v25 }
 0x1e5   :  { %v230_v26 = vpop.xlane.xlu0 %229 }
 0x1e7   :  { %v260_v27 = vpop.xlane.xlu1 %259 }
 0x1e8   :  { %v277_v47 = vsel %vm275_vm3, %v230_v26, %v260_v27 }
 0x1e9   :  { %v233_v28 = vpop.xlane.xlu0 %232 }
 0x1eb   :  { %v263_v29 = vpop.xlane.xlu1 %262 }
 0x1ec   :  { %v278_v46 = vsel %vm275_vm3, %v233_v28, %v263_v29 }
 0x1ed   :  { %v236_v30 = vpop.xlane.xlu0 %235 }
 0x1ef   :  { %v266_v32 = vpop.xlane.xlu1 %265 }
 0x1f0   :  { %v279_v45 = vsel %vm275_vm3, %v236_v30, %v266_v32 }
 0x1f1   :  { %v239_v35 = vpop.xlane.xlu0 %238 }
 0x1f3   :  { %v269_v37 = vpop.xlane.xlu1 %268 }
 0x1f4   :  { %v280_v43 = vsel %vm275_vm3, %v239_v35, %v269_v37 }
 0x1f7   :  { %v242_v39 = vpop.xlane.xlu1 %241  ;;  %v272_v40 = vpop.xlane.xlu0 %271 }
 0x1f8   :  { %v281_v42 = vsel %vm275_vm3, %v242_v39, %v272_v40 }
 0x1f9   :  { %2718 = vmatprep.subr.mxu1 %v281_v42 }
 0x1fa   :  { %2719 = vmatpush3.msra.mxu1 %v281_v42 }
 0x1fb   :  { %2720 = vmatprep.subr.mxu1 %v280_v43  ;;  %v289_v50 = vpop.permute.xlu0 %288  ;;  %v291_v51 = vpop.permute.xlu1 %290 }
 0x1fc   :  { %2721 = vmatpush3.msra.mxu1 %v280_v43 }
 0x1fd   :  { %2722 = vmatprep.subr.mxu1 %v279_v45 }
 0x1fe   :  { %2723 = vmatpush3.msra.mxu1 %v279_v45 }
 0x1ff   :  { %2724 = vmatprep.subr.mxu1 %v278_v46  ;;  %v293_v53 = vpop.permute.xlu0 %292 }
 0x200   :  { %2725 = vmatpush3.msra.mxu1 %v278_v46 }
 0x201   :  { %2726 = vmatprep.subr.mxu1 %v277_v47 }
 0x202   :  { %2727 = vmatpush3.msra.mxu1 %v277_v47 }
 0x203   :  { %2728 = vmatprep.subr.mxu1 %v276_v48 }
 0x204   :  { %2729 = vmatpush3.msra.mxu1 %v276_v48 }
 0x205   :  { %2731 = vmatmul.mubr.msk.f32.vlgmr.msra.gmra.mxu1 %vm294_vm2, %v285_v22  ;;  %2739 = vmatprep.subr.mxu1 %v3002_v4  ;;  %v3008_v22 = vmov 34  }
 0x206   :  { %2733 = vmatprep.mubr.msk.f32.mxu1 %vm294_vm2, %v287_v23  ;;  %v3009_v23 = vmov 1  }
 0x209   :  { %2734 = vmatmul.mubr.msk.f32.gmra.mxu1 %vm294_vm2, %v289_v50 }
 0x20a   :  { %2736 = vmatprep.mubr.msk.f32.mxu1 %vm294_vm2, %v291_v51 }
 0x20d   :  { %2737 = vmatmul.mubr.msk.f32.gmra.mxu1 %vm294_vm2, %v293_v53 }
 0x20e   :  { %2757 = vmatprep.mubr.msk.f32.mxu1 %vm3012_vm6, %v3002_v4 }
 0x2c5   :  { %v2732_v55 = vpop.f32.mrf.mxu1 }
 0x2c6   :  { %v403_v62 = vmul.f32 0.00043402778, %v2732_v55 }
 0x2c7   :  { %v373_v56 = vpop.f32.mrf.mxu1 }
 0x2c8   :  { %v402_v3 = vmul.f32 0.00043402778, %v373_v56  ;;  %v409_v15 = vmul.f32 %v403_v62, %v403_v62 }
 0x2c9   :  { %v2735_v58 = vpop.f32.mrf.mxu1 }
 0x2ca   :  { %v405_v59 = vmul.f32 0.00043402778, %v2735_v58  ;;  %v408_v18 = vmul.f32 %v402_v3, %v402_v3 }
 0x2cb   :  { %v383_v61 = vpop.f32.mrf.mxu1 }
 0x2cc   :  { %v404_v63 = vmul.f32 0.00043402778, %v383_v61  ;;  %v411_v0 = vmul.f32 %v405_v59, %v405_v59 }
 0x2cd   :  { %v2738_v2 = vpop.f32.mrf.mxu1 }
 0x2ce   :  { %426 = vrot.lane.b32.xlu1 %v411_v0, %s3006_s28  ;;  %v410_v6 = vmul.f32 %v404_v63, %v404_v63  ;;  %v407_v9 = vmul.f32 0.00043402778, %v2738_v2 }
 0x2cf   :  { %v393_v14 = vpop.f32.mrf.mxu1 }
 0x2d0   :  { %424 = vrot.lane.b32.xlu0 %v410_v6, %s3006_s28  ;;  %v406_v17 = vmul.f32 0.00043402778, %v393_v14  ;;  %v413_v19 = vmul.f32 %v407_v9, %v407_v9 }
 0x2d2   :  { %422 = vrot.lane.b32.xlu1 %v409_v15, %s3006_s28  ;;  %v412_v20 = vmul.f32 %v406_v17, %v406_v17 }
 0x2d4   :  { %420 = vrot.lane.b32.xlu0 %v408_v18, %s3006_s28 }
 0x2d6   :  { %430 = vrot.lane.b32.xlu1 %v413_v19, %s3006_s28 }
 0x2d8   :  { %428 = vrot.lane.b32.xlu0 %v412_v20, %s3006_s28 }
 0x2da   :  { %467 = vperm.xlu1 %2845, %v405_v59  }
 0x2dc   :  { %462 = vperm.xlu0 %2846, %v404_v63  }
 0x2de   :  { %457 = vperm.xlu1 %2845, %v403_v62  }
 0x2e0   :  { %2851 = vset.pattern.permute.xlu0 %v3007_v21 }
 0x2e1   :  { %551 = vperm.xlu0 %2851, %v3080_v13  }
 0x2e2   :  { %2847 = vset.pattern.permute.xlu1 %v3007_v21 }
 0x2e3   :  { %559 = vperm.xlu1 %2847, %v3074_v11  }
 0x2e5   :  { %2852 = vset.pattern.permute.xlu0 %v3008_v22 }
 0x2e6   :  { %595 = vperm.xlu0 %2852, %v3074_v11  }
 0x2e7   :  { %2848 = vset.pattern.permute.xlu1 %v3005_v54 }
 0x2e8   :  { %452 = vperm.xlu1 %2848, %v402_v3  }
 0x2ea   :  { %583 = vperm.xlu0 %2852, %v3078_v12  }
 0x2ec   :  { %2849 = vset.pattern.permute.xlu1 %v3007_v21 }
 0x2ed   :  { %555 = vperm.xlu1 %2849, %v3072_v10  }
 0x2ee   :  { %2859 = vset.pattern.permute.xlu0 %v3009_v23 }
 0x2f1   :  { %2850 = vset.pattern.permute.xlu1 %v3005_v54 }
 0x2f2   :  { %477 = vperm.xlu1 %2850, %v407_v9  }
 0x2f6   :  { %2853 = vset.pattern.permute.xlu1 %v3008_v22 }
 0x2f7   :  { %591 = vperm.xlu1 %2853, %v3072_v10  }
 0x2fb   :  { %2854 = vset.pattern.permute.xlu1 %v3005_v54 }
 0x2fc   :  { %472 = vperm.xlu1 %2854, %v406_v17  }
 0x300   :  { %2855 = vset.pattern.permute.xlu1 %v3007_v21 }
 0x301   :  { %547 = vperm.xlu1 %2855, %v3078_v12  }
 0x305   :  { %2856 = vset.pattern.permute.xlu1 %v3008_v22 }
 0x306   :  { %587 = vperm.xlu1 %2856, %v3080_v13  }
 0x30a   :  { %2857 = vset.pattern.permute.xlu1 %v3009_v23 }
 0x340   :  { %v427_v11 = vpop.permute.xlu1 %426 }
 0x341   :  { %v441_v27 = vsub.f32 %v405_v59, %v427_v11 }
 0x342   :  { %v425_v24 = vpop.permute.xlu0 %424 }
 0x343   :  { %v440_v25 = vsub.f32 %v404_v63, %v425_v24  ;;  %v447_v35 = vmax.f32 %v441_v27, 0.0 }
 0x344   :  { %v423_v26 = vpop.permute.xlu1 %422 }
 0x345   :  { %v439_v28 = vsub.f32 %v403_v62, %v423_v26  ;;  %v446_v10 = vmax.f32 %v440_v25, 0.0  ;;  %v495_v46 = vadd.f32 1e-05, %v447_v35 }
 0x346   :  { %v421_v29 = vpop.permute.xlu0 %420 }
 0x347   :  { %v445_v30 = vmax.f32 %v439_v28, 0.0  ;;  %v438_v32 = vsub.f32 %v402_v3, %v421_v29  ;;  %v494_v40 = vadd.f32 1e-05, %v446_v10 }
 0x348   :  { %v431_v34 = vpop.permute.xlu1 %430 }
 0x349   :  { %v493_v37 = vadd.f32 1e-05, %v445_v30  ;;  %v444_v12 = vmax.f32 %v438_v32, 0.0  ;;  %v443_v39 = vsub.f32 %v407_v9, %v431_v34 }
 0x34a   :  { %v429_v42 = vpop.permute.xlu0 %428 }
 0x34b   :  { %2909 = vrsqrt.f32 %v493_v37  ;;  %v492_v13 = vadd.f32 1e-05, %v444_v12  ;;  %v449_v43 = vmax.f32 %v443_v39, 0.0  ;;  %v442_v45 = vsub.f32 %v406_v17, %v429_v42 }
 0x34d   :  { %2911 = vrsqrt.f32 %v492_v13  ;;  %v497_v47 = vadd.f32 1e-05, %v449_v43  ;;  %v448_v48 = vmax.f32 %v442_v45, 0.0 }
 0x34e   :  { %2913 = vrsqrt.f32 %v494_v40 }
 0x34f   :  { %2915 = vrsqrt.f32 %v495_v46  ;;  %v496_v50 = vadd.f32 1e-05, %v448_v48 }
 0x350   :  { %2917 = vrsqrt.f32 %v497_v47 }
 0x351   :  { %2919 = vrsqrt.f32 %v496_v50 }
 0x355   :  { %v468_v61 = vpop.permute.xlu1 %467 }
 0x356   :  { %v486_v32 = vsub.f32 %v3136_v52, %v468_v61 }
 0x357   :  { %v463_v6 = vpop.permute.xlu0 %462 }
 0x358   :  { %v2910_v51 = vpop.eup %2909  ;;  %v485_v26 = vsub.f32 %v3134_v49, %v463_v6  ;;  %v484_v39 = vsub.f32 %v3126_v44, %v463_v6 }
 0x359   :  { %511 = vperm.xlu0 %2859, %v2910_v51   ;;  %v458_v62 = vpop.permute.xlu1 %457 }
 0x35a   :  { %v2912_v53 = vpop.eup %2911  ;;  %v482_v20 = vsub.f32 %v3116_v36, %v458_v62  ;;  %v487_v36 = vsub.f32 %v3144_v57, %v468_v61 }
 0x35b   :  { %506 = vperm.xlu1 %2857, %v2912_v53   ;;  %v2914_v55 = vpop.eup %2913 }
 0x35c   :  { %v2916_v56 = vpop.eup %2915  ;;  %v552_v14 = vpop.permute.xlu0 %551 }
 0x35d   :  { %516 = vperm.xlu0 %2859, %v2914_v55   ;;  %v2918_v58 = vpop.eup %2917 }
 0x35e   :  { %v2920_v59 = vpop.eup %2919  ;;  %v560_v63 = vpop.permute.xlu1 %559 }
 0x35f   :  { %521 = vperm.xlu1 %2857, %v2916_v56  }
 0x361   :  { %531 = vperm.xlu0 %2859, %v2918_v58   ;;  %v596_v17 = vpop.permute.xlu0 %595 }
 0x363   :  { %2858 = vset.pattern.permute.xlu1 %v3007_v21  ;;  %v453_v0 = vpop.permute.xlu1 %452 }
 0x364   :  { %567 = vperm.xlu1 %2858, %v3068_v8   ;;  %v481_v11 = vsub.f32 %v3114_v33, %v453_v0 }
 0x365   :  { %526 = vperm.xlu0 %2859, %v2920_v59  }
 0x368   :  { %563 = vperm.xlu1 %2858, %v3066_v7   ;;  %v556_v2 = vpop.permute.xlu1 %555 }
 0x369   :  { %2861 = vset.pattern.permute.xlu0 %v3008_v22 }
 0x36a   :  { %599 = vperm.xlu0 %2861, %v3066_v7   ;;  %v584_v7 = vpop.permute.xlu0 %583 }
 0x36c   :  { %2860 = vset.pattern.permute.xlu1 %v3008_v22  ;;  %v480_v22 = vsub.f32 %v3112_v31, %v453_v0 }
 0x36d   :  { %603 = vperm.xlu1 %2860, %v3068_v8   ;;  %v3234_v3 = vpop.permute.xlu1 %477  ;;  %v483_v8 = vsub.f32 %v3124_v41, %v458_v62 }
 0x36e   :  { %v491_v0 = vsub.f32 %v3164_v16, %v3234_v3 }
 0x372   :  { %v3236_v9 = vpop.permute.xlu1 %591 }
 0x377   :  { %v3238_v15 = vpop.permute.xlu1 %472 }
 0x378   :  { %v489_v44 = vsub.f32 %v3154_v1, %v3238_v15 }
 0x37c   :  { %v548_v18 = vpop.permute.xlu1 %547 }
 0x381   :  { %v588_v19 = vpop.permute.xlu1 %587 }
 0x3d4   :  { %v512_v21 = vpop.permute.xlu0 %511 }
 0x3d5   :  { %v536_v24 = vmul.f32 %v512_v21, %v482_v20  ;;  %v537_v25 = vmul.f32 %v512_v21, %v483_v8 }
 0x3d6   :  { %v507_v27 = vpop.permute.xlu1 %506 }
 0x3d7   :  { %v572_v28 = vmul.f32 %v552_v14, %v536_v24  ;;  %v573_v10 = vmul.f32 %v552_v14, %v537_v25  ;;  %v534_v29 = vmul.f32 %v507_v27, %v480_v22  ;;  %v535_v30 = vmul.f32 %v507_v27, %v481_v11 }
 0x3d8   :  { %v517_v34 = vpop.permute.xlu0 %516  ;;  %v488_v27 = vsub.f32 %v3146_v60, %v3238_v15 }
 0x3d9   :  { %v570_v41 = vmul.f32 %v548_v18, %v534_v29  ;;  %v571_v35 = vmul.f32 %v548_v18, %v535_v30  ;;  %v539_v37 = vmul.f32 %v517_v34, %v485_v26  ;;  %v609_v12 = vadd.f32 %v588_v19, %v573_v10 }
 0x3da   :  { %v522_v31 = vpop.permute.xlu1 %521  ;;  %v608_v33 = vadd.f32 %v588_v19, %v572_v28  ;;  %v538_v52 = vmul.f32 %v517_v34, %v484_v39  ;;  %v3317_v39 = vld [vmem:[#allocation3 + $0x10] sm:$0xff] }
 0x3db   :  { %v575_v40 = vmul.f32 %v556_v2, %v539_v37  ;;  %v540_v49 = vmul.f32 %v522_v31, %v486_v32  ;;  %v541_v42 = vmul.f32 %v522_v31, %v487_v36  ;;  %v621_v43 = vmul.f32 0.01, %v609_v12  ;;  %2641 = vmatprep.mubr.msk.f32.mxu0 %vm874_vm5, %v3317_v39 }
 0x3dc   :  { %v532_v13 = vpop.permute.xlu0 %531  ;;  %v620_v45 = vmul.f32 0.01, %v608_v33  ;;  %v607_v46 = vadd.f32 %v584_v7, %v571_v35  ;;  %v606_v47 = vadd.f32 %v584_v7, %v570_v41  ;;  %v574_v14 = vmul.f32 %v556_v2, %v538_v52  ;;  %v3343_v52 = vld [vmem:[#allocation3 + $0x50] sm:$0xff] }
 0x3dd   :  { %v576_v48 = vmul.f32 %v560_v63, %v540_v49  ;;  %v577_v50 = vmul.f32 %v560_v63, %v541_v42  ;;  %v3248_v57 = vmax.f32 %v609_v12, %v621_v43  ;;  %v611_v61 = vadd.f32 %v3236_v9, %v575_v40  ;;  %v3321_v40 = vld [vmem:[#allocation3 + $0x1d0] sm:$0xff] }
 0x3de   :  { %v3250_v51 = vmax.f32 %v608_v33, %v620_v45  ;;  %v619_v53 = vmul.f32 0.01, %v607_v46  ;;  %v618_v55 = vmul.f32 0.01, %v606_v47  ;;  %v545_v19 = vmul.f32 %v532_v13, %v491_v0  ;;  %v3323_v49 = vld [vmem:[#allocation3 + $0x210] sm:$0xff] }
 0x3df   :  { %v568_v56 = vpop.permute.xlu1 %567  ;;  %v613_v58 = vadd.f32 %v596_v17, %v577_v50  ;;  %v612_v59 = vadd.f32 %v596_v17, %v576_v48  ;;  %727 = vrot.lane.b32.xlu0 %v3248_v57, %s3000_s13  ;;  %646 = vst.msk [vmem:[#allocation2 + $0x18] sm:$0xff] %vm643_vm4, %v3248_v57  ;;  %v623_v7 = vmul.f32 0.01, %v611_v61  ;;  %v490_v2 = vsub.f32 %v3156_v5, %v3234_v3  ;;  %v3329_v43 = vld [vmem:[#allocation3 + $0x190] sm:$0xff] }
 0x3e0   :  { %725 = vrot.lane.b32.xlu1 %v3250_v51, %s3000_s13  ;;  %v527_v62 = vpop.permute.xlu0 %526  ;;  %v631_v63 = vmax.f32 %v607_v46, %v619_v53  ;;  %v3264_v17 = vmax.f32 %v606_v47, %v618_v55  ;;  %v610_v25 = vadd.f32 %v3236_v9, %v574_v14  ;;  %v581_v26 = vmul.f32 %v568_v56, %v545_v19  ;;  %v3333_v45 = vld [vmem:[#allocation3 + $0x90] sm:$0xff] }
 0x3e1   :  { %v543_v1 = vmul.f32 %v527_v62, %v489_v44  ;;  %v625_v6 = vmul.f32 0.01, %v613_v58  ;;  %v624_v18 = vmul.f32 0.01, %v612_v59  ;;  %v635_v16 = vmax.f32 %v611_v61, %v623_v7  ;;  %v3335_v46 = vld [vmem:[#allocation3 + $0x150] sm:$0xff] }
 0x3e2   :  { %644 = vst.msk [vmem:[#allocation2 + $0x8] sm:$0xff] %vm643_vm4, %v631_v63  ;;  %v544_v28 = vmul.f32 %v532_v13, %v490_v2  ;;  %v542_v3 = vmul.f32 %v527_v62, %v488_v27  ;;  %v622_v30 = vmul.f32 0.01, %v610_v25  ;;  %v3010_v42 = vmov 16   ;;  %v3327_v13 = vld [vmem:[#allocation3 + $0x110] sm:$0xff] }
 0x3e3   :  { %v564_v20 = vpop.permute.xlu1 %563  ;;  %v637_v8 = vmax.f32 %v613_v58, %v625_v6  ;;  %723 = vrot.lane.b32.xlu0 %v631_v63, %s3000_s13  ;;  %v3272_v24 = vmax.f32 %v612_v59, %v624_v18  ;;  %648 = vst.msk [vmem:[#allocation2 + $0x28] sm:$0xff] %vm643_vm4, %v635_v16  ;;  %2862 = vset.pattern.permute.xlu1 %v3010_v42  ;;  %v3339_v47 = vld [vmem:[#allocation3 + $0xd0] sm:$0xff] }
 0x3e4   :  { %v579_v21 = vmul.f32 %v564_v20, %v543_v1  ;;  %721 = vrot.lane.b32.xlu1 %v3264_v17, %s3000_s13  ;;  %v580_v9 = vmul.f32 %v568_v56, %v544_v28  ;;  %v578_v15 = vmul.f32 %v564_v20, %v542_v3  ;;  %v3285_v41 = vmax.f32 %v610_v25, %v622_v30 }
 0x3e5   :  { %v600_v22 = vpop.permute.xlu0 %599  ;;  %650 = vst.msk [vmem:[#allocation2 + $0x38] sm:$0xff] %vm643_vm4, %v637_v8  ;;  %2863 = vset.pattern.permute.xlu0 %v3010_v42 }
 0x3e6   :  { %v615_v11 = vadd.f32 %v600_v22, %v579_v21  ;;  %v614_v35 = vadd.f32 %v600_v22, %v578_v15 }
 0x3e7   :  { %735 = vrot.lane.b32.xlu0 %v637_v8, %s3000_s13 }
 0x3e8   :  { %v627_v10 = vmul.f32 0.01, %v615_v11  ;;  %733 = vrot.lane.b32.xlu1 %v3272_v24, %s3000_s13  ;;  %v604_v29 = vpop.permute.xlu1 %603  ;;  %v626_v31 = vmul.f32 0.01, %v614_v35 }
 0x3e9   :  { %v617_v5 = vadd.f32 %v604_v29, %v581_v26  ;;  %v616_v36 = vadd.f32 %v604_v29, %v580_v9 }
 0x3ea   :  { %v639_v32 = vmax.f32 %v615_v11, %v627_v10  ;;  %v3299_v33 = vmax.f32 %v614_v35, %v626_v31 }
 0x3eb   :  { %v629_v34 = vmul.f32 0.01, %v617_v5  ;;  %681 = vrot.lane.b32.xlu0 %v637_v8, %s3001_s20  ;;  %v628_v37 = vmul.f32 0.01, %v616_v36 }
 0x3ec   :  { %679 = vrot.lane.b32.xlu1 %v3272_v24, %s3001_s20  ;;  %652 = vst.msk [vmem:[#allocation2 + $0x48] sm:$0xff] %vm643_vm4, %v639_v32  ;;  %v782_v42 = vld [vmem:[#allocation2 + $0x38] sm:$0xff] }
 0x3ed   :  { %v641_v60 = vmax.f32 %v617_v5, %v629_v34  ;;  %v3294_v12 = vmax.f32 %v616_v36, %v628_v37 }
 0x3ef   :  { %654 = vst.msk [vmem:[#allocation2 + $0x58] sm:$0xff] %vm643_vm4, %v641_v60  ;;  %731 = vrot.lane.b32.xlu0 %v635_v16, %s3000_s13 }
 0x3f0   :  { %729 = vrot.lane.b32.xlu1 %v3285_v41, %s3000_s13 }
 0x3f3   :  { %677 = vrot.lane.b32.xlu0 %v635_v16, %s3001_s20  ;;  %v784_v31 = vld [vmem:[#allocation2 + $0x48] sm:$0xff] }
 0x3f4   :  { %675 = vrot.lane.b32.xlu1 %v3285_v41, %s3001_s20 }
 0x3f6   :  { %v786_v37 = vld [vmem:[#allocation2 + $0x58] sm:$0xff] }
 0x3f7   :  { %689 = vrot.lane.b32.xlu0 %v641_v60, %s3001_s20 }
 0x3f8   :  { %687 = vrot.lane.b32.xlu1 %v3294_v12, %s3001_s20 }
 0x3fb   :  { %685 = vrot.lane.b32.xlu0 %v639_v32, %s3001_s20 }
 0x3fc   :  { %683 = vrot.lane.b32.xlu1 %v3299_v33, %s3001_s20 }
 0x3ff   :  { %673 = vrot.lane.b32.xlu0 %v3248_v57, %s3001_s20 }
 0x400   :  { %671 = vrot.lane.b32.xlu1 %v3250_v51, %s3001_s20 }
 0x403   :  { %669 = vrot.lane.b32.xlu0 %v631_v63, %s3001_s20 }
 0x404   :  { %667 = vrot.lane.b32.xlu1 %v3264_v17, %s3001_s20 }
 0x407   :  { %743 = vrot.lane.b32.xlu0 %v641_v60, %s3000_s13 }
 0x408   :  { %741 = vrot.lane.b32.xlu1 %v3294_v12, %s3000_s13 }
 0x40b   :  { %739 = vrot.lane.b32.xlu0 %v639_v32, %s3000_s13 }
 0x40c   :  { %737 = vrot.lane.b32.xlu1 %v3299_v33, %s3000_s13 }
 0x40f   :  { %866 = vperm.xlu0 %2863, %v3321_v40  }
 0x410   :  { %871 = vperm.xlu1 %2862, %v3323_v49  }
 0x413   :  { %851 = vperm.xlu0 %2863, %v3327_v13  }
 0x414   :  { %861 = vperm.xlu1 %2862, %v3329_v43  }
 0x417   :  { %841 = vperm.xlu0 %2863, %v3333_v45  }
 0x418   :  { %856 = vperm.xlu1 %2862, %v3335_v46  }
 0x41b   :  { %831 = vperm.xlu0 %2863, %v3317_v39  }
 0x41c   :  { %846 = vperm.xlu1 %2862, %v3339_v47  }
 0x420   :  { %836 = vperm.xlu1 %2862, %v3343_v52  }
 0x424   :  { %2864 = vset.pattern.permute.xlu1 %v3005_v54 }
 0x451   :  { %v728_v50 = vpop.permute.xlu0 %727 }
 0x452   :  { %v726_v48 = vpop.permute.xlu1 %725  ;;  %766 = vst.msk [vmem:[#allocation2 + $0xd8] sm:$0xff] %vm643_vm4, %v728_v50 }
 0x453   :  { %v746_v20 = vsel %vm643_vm4, %v726_v48, %v728_v50  ;;  %v780_v50 = vld [vmem:[#allocation2 + $0x28] sm:$0xff] }
 0x455   :  { %v724_v53 = vpop.permute.xlu0 %723 }
 0x456   :  { %v722_v57 = vpop.permute.xlu1 %721  ;;  %764 = vst.msk [vmem:[#allocation2 + $0xc8] sm:$0xff] %vm643_vm4, %v724_v53 }
 0x457   :  { %v745_v22 = vsel %vm643_vm4, %v722_v57, %v724_v53  ;;  %v778_v57 = vld [vmem:[#allocation2 + $0x18] sm:$0xff]  ;;  %v776_v53 = vld [vmem:[#allocation2 + $0x8] sm:$0xff] }
 0x459   :  { %v736_v44 = vpop.permute.xlu0 %735  ;;  %v802_v19 = vld [vmem:[#allocation2 + $0xd8] sm:$0xff] }
 0x45a   :  { %v734_v55 = vpop.permute.xlu1 %733  ;;  %770 = vst.msk [vmem:[#allocation2 + $0xf8] sm:$0xff] %vm643_vm4, %v736_v44 }
 0x45b   :  { %v748_v63 = vsel %vm643_vm4, %v734_v55, %v736_v44 }
 0x45d   :  { %v682_v58 = vpop.permute.xlu0 %681  ;;  %v800_v21 = vld [vmem:[#allocation2 + $0xc8] sm:$0xff] }
 0x45e   :  { %v680_v56 = vpop.permute.xlu1 %679  ;;  %716 = vst.msk [vmem:[#allocation2 + $0x98] sm:$0xff] %vm643_vm4, %v682_v58 }
 0x45f   :  { %v694_v5 = vsel %vm54_vm0, %v680_v56, %v682_v58  ;;  %v819_v58 = vld [vmem:[#allocation3 + $0x108] sm:$0xff] }
 0x461   :  { %v732_v61 = vpop.permute.xlu0 %731  ;;  %v806_v62 = vld [vmem:[#allocation2 + $0xf8] sm:$0xff] }
 0x462   :  { %v730_v59 = vpop.permute.xlu1 %729  ;;  %768 = vst.msk [vmem:[#allocation2 + $0xe8] sm:$0xff] %vm643_vm4, %v732_v61  ;;  %893 = vmatprep.subr.mxu0 %v806_v62  ;;  %v825_v62 = vld [vmem:[#allocation3 + $0x1c8] sm:$0xff] }
 0x463   :  { %894 = vmatpush1.msra.mxu0 %v748_v63  ;;  %v747_v7 = vsel %vm643_vm4, %v730_v59, %v732_v61  ;;  %v821_v59 = vld [vmem:[#allocation3 + $0x148] sm:$0xff] }
 0x464   :  { %v823_v61 = vld [vmem:[#allocation3 + $0x188] sm:$0xff] }
 0x465   :  { %v678_v1 = vpop.permute.xlu0 %677  ;;  %v794_v29 = vld [vmem:[#allocation2 + $0x98] sm:$0xff]  ;;  %v827_v63 = vld [vmem:[#allocation3 + $0x208] sm:$0xff] }
 0x466   :  { %v676_v0 = vpop.permute.xlu1 %675  ;;  %714 = vst.msk [vmem:[#allocation2 + $0x88] sm:$0xff] %vm643_vm4, %v678_v1 }
 0x467   :  { %v693_v32 = vsel %vm54_vm0, %v676_v0, %v678_v1 }
 0x469   :  { %v690_v14 = vpop.permute.xlu0 %689  ;;  %v804_v18 = vld [vmem:[#allocation2 + $0xe8] sm:$0xff] }
 0x46a   :  { %v688_v6 = vpop.permute.xlu1 %687  ;;  %720 = vst.msk [vmem:[#allocation2 + $0xb8] sm:$0xff] %vm643_vm4, %v690_v14  ;;  %895 = vmatprep.subr.mxu0 %v804_v18 }
 0x46b   :  { %896 = vmatpush1.msra.mxu0 %v747_v7  ;;  %v696_v25 = vsel %vm54_vm0, %v688_v6, %v690_v14 }
 0x46c   :  { %897 = vmatprep.subr.mxu0 %v802_v19 }
 0x46d   :  { %898 = vmatpush1.msra.mxu0 %v746_v20  ;;  %v686_v8 = vpop.permute.xlu0 %685  ;;  %v792_v30 = vld [vmem:[#allocation2 + $0x88] sm:$0xff] }
 0x46e   :  { %718 = vst.msk [vmem:[#allocation2 + $0xa8] sm:$0xff] %vm643_vm4, %v686_v8  ;;  %899 = vmatprep.subr.mxu0 %v800_v21  ;;  %v684_v16 = vpop.permute.xlu1 %683 }
 0x46f   :  { %900 = vmatpush1.msra.mxu0 %v745_v22  ;;  %v695_v10 = vsel %vm54_vm0, %v684_v16, %v686_v8 }
 0x471   :  { %v674_v2 = vpop.permute.xlu0 %673  ;;  %v798_v11 = vld [vmem:[#allocation2 + $0xb8] sm:$0xff] }
 0x472   :  { %712 = vst.msk [vmem:[#allocation2 + $0x78] sm:$0xff] %vm643_vm4, %v674_v2  ;;  %901 = vmatprep.subr.mxu0 %v798_v11  ;;  %v672_v26 = vpop.permute.xlu1 %671 }
 0x473   :  { %902 = vmatpush1.msra.mxu0 %v696_v25  ;;  %v692_v60 = vsel %vm54_vm0, %v672_v26, %v674_v2 }
 0x475   :  { %v670_v27 = vpop.permute.xlu0 %669  ;;  %v796_v28 = vld [vmem:[#allocation2 + $0xa8] sm:$0xff] }
 0x476   :  { %710 = vst.msk [vmem:[#allocation2 + $0x68] sm:$0xff] %vm643_vm4, %v670_v27  ;;  %903 = vmatprep.subr.mxu0 %v796_v28  ;;  %v668_v34 = vpop.permute.xlu1 %667 }
 0x477   :  { %904 = vmatpush1.msra.mxu0 %v695_v10  ;;  %v691_v35 = vsel %vm54_vm0, %v668_v34, %v670_v27 }
 0x478   :  { %905 = vmatprep.subr.mxu0 %v794_v29 }
 0x479   :  { %906 = vmatpush1.msra.mxu0 %v694_v5  ;;  %v744_v3 = vpop.permute.xlu0 %743  ;;  %v790_v9 = vld [vmem:[#allocation2 + $0x78] sm:$0xff] }
 0x47a   :  { %774 = vst.msk [vmem:[#allocation2 + $0x118] sm:$0xff] %vm643_vm4, %v744_v3  ;;  %907 = vmatprep.subr.mxu0 %v792_v30  ;;  %v742_v48 = vpop.permute.xlu1 %741 }
 0x47b   :  { %908 = vmatpush1.msra.mxu0 %v693_v32 }
 0x47c   :  { %909 = vmatprep.subr.mxu0 %v790_v9 }
 0x47d   :  { %910 = vmatpush1.msra.mxu0 %v692_v60  ;;  %v740_v15 = vpop.permute.xlu0 %739  ;;  %v788_v36 = vld [vmem:[#allocation2 + $0x68] sm:$0xff] }
 0x47e   :  { %772 = vst.msk [vmem:[#allocation2 + $0x108] sm:$0xff] %vm643_vm4, %v740_v15  ;;  %911 = vmatprep.subr.mxu0 %v788_v36 }
 0x47f   :  { %912 = vmatpush1.msra.mxu0 %v691_v35 }
 0x480   :  { %913 = vmatprep.subr.mxu0 %v786_v37 }
 0x481   :  { %914 = vmatpush1.msra.mxu0 %v3294_v12  ;;  %v738_v12 = vpop.permute.xlu1 %737  ;;  %v810_v55 = vld [vmem:[#allocation2 + $0x118] sm:$0xff] }
 0x482   :  { %915 = vmatprep.subr.mxu0 %v784_v31  ;;  %v749_v56 = vsel %vm643_vm4, %v738_v12, %v740_v15 }
 0x483   :  { %916 = vmatpush1.msra.mxu0 %v3299_v33  ;;  %v750_v33 = vsel %vm643_vm4, %v742_v48, %v744_v3 }
 0x484   :  { %917 = vmatprep.subr.mxu0 %v782_v42 }
 0x485   :  { %918 = vmatpush1.msra.mxu0 %v3272_v24  ;;  %v808_v44 = vld [vmem:[#allocation2 + $0x108] sm:$0xff] }
 0x486   :  { %919 = vmatprep.subr.mxu0 %v780_v50  ;;  %v811_v24 = vld [vmem:[#allocation3 + $0x8] sm:$0xff] }
 0x487   :  { %920 = vmatpush1.msra.mxu0 %v3285_v41  ;;  %v817_v41 = vld [vmem:[#allocation3 + $0xc8] sm:$0xff] }
 0x488   :  { %921 = vmatprep.subr.mxu0 %v778_v57 }
 0x489   :  { %922 = vmatpush1.msra.mxu0 %v3250_v51  ;;  %v813_v51 = vld [vmem:[#allocation3 + $0x48] sm:$0xff] }
 0x48a   :  { %923 = vmatprep.subr.mxu0 %v776_v53  ;;  %v3396_v1 = vpop.permute.xlu0 %866 }
 0x48b   :  { %924 = vmatpush1.msra.mxu0 %v3264_v17  ;;  %v815_v17 = vld [vmem:[#allocation3 + $0x88] sm:$0xff]  ;;  %v3394_v0 = vpop.permute.xlu1 %871 }
 0x48c   :  { %953 = vmatprep.subr.mxu0 %v810_v55 }
 0x48d   :  { %954 = vmatpush2.msra.mxu0 %v750_v33 }
 0x48e   :  { %955 = vmatprep.subr.mxu0 %v808_v44  ;;  %v852_v14 = vpop.permute.xlu0 %851 }
 0x48f   :  { %956 = vmatpush2.msra.mxu0 %v749_v56  ;;  %v3398_v6 = vpop.permute.xlu1 %861 }
 0x490   :  { %958 = vmatmul.mubr.f32.vlgmr.msra.gmra.mxu0 %v811_v24  ;;  %2784 = vmatprep.subr.mxu0 %v3002_v4 }
 0x491   :  { %2642 = vmatprep.mubr.msk.f32.mxu0 %vm874_vm5, %v3343_v52 }
 0x492   :  { %v842_v7 = vpop.permute.xlu0 %841 }
 0x493   :  { %v3400_v18 = vpop.permute.xlu1 %856 }
 0x494   :  { %964 = vmatmul.mubr.f32.gmra.mxu0 %v813_v51 }
 0x495   :  { %2643 = vmatprep.mubr.msk.f32.mxu0 %vm874_vm5, %v3333_v45 }
 0x496   :  { %v832_v8 = vpop.permute.xlu0 %831 }
 0x497   :  { %v847_v19 = vpop.permute.xlu1 %846 }
 0x498   :  { %970 = vmatmul.mubr.f32.gmra.mxu0 %v815_v17 }
 0x499   :  { %2644 = vmatprep.mubr.msk.f32.mxu0 %vm874_vm5, %v3339_v47 }
 0x49b   :  { %v837_v11 = vpop.permute.xlu1 %836 }
 0x49c   :  { %976 = vmatmul.mubr.f32.gmra.mxu0 %v817_v41 }
 0x49d   :  { %2645 = vmatprep.mubr.msk.f32.mxu0 %vm874_vm5, %v3327_v13 }
 0x4a0   :  { %982 = vmatmul.mubr.f32.gmra.mxu0 %v819_v58 }
 0x4a1   :  { %2646 = vmatprep.mubr.msk.f32.mxu0 %vm874_vm5, %v3335_v46 }
 0x4a4   :  { %988 = vmatmul.mubr.f32.gmra.mxu0 %v821_v59 }
 0x4a5   :  { %2647 = vmatprep.mubr.msk.f32.mxu0 %vm874_vm5, %v3329_v43 }
 0x4a8   :  { %994 = vmatmul.mubr.f32.gmra.mxu0 %v823_v61 }
 0x4a9   :  { %2648 = vmatprep.mubr.msk.f32.mxu0 %vm874_vm5, %v3321_v40 }
 0x4ac   :  { %1000 = vmatmul.mubr.f32.gmra.mxu0 %v825_v62 }
 0x4ad   :  { %2649 = vmatprep.mubr.msk.f32.mxu0 %vm874_vm5, %v3323_v49 }
 0x4b0   :  { %1006 = vmatmul.mubr.f32.gmra.mxu0 %v827_v63 }
 0x4b1   :  { %2798 = vmatprep.mubr.msk.f32.mxu0 %vm3012_vm6, %v3002_v4 }
 0x550   :  { %v959_v20 = vpop.f32.mrf.mxu0 }
 0x551   :  { %v3402_v21 = vadd.f32 %v959_v20, %v832_v8 }
 0x552   :  { %v961_v22 = vpop.f32.mrf.mxu0 }
 0x553   :  { %v3404_v16 = vadd.f32 %v961_v22, %v832_v8  ;;  %v1048_v27 = vmul.f32 %v3402_v21, %v3402_v21 }
 0x554   :  { %v965_v2 = vpop.f32.mrf.mxu0 }
 0x555   :  { %v1049_v25 = vmul.f32 %v3404_v16, %v3404_v16  ;;  %v1012_v26 = vsel %vm643_vm4, %v3404_v16, 0.0  ;;  %v3412_v28 = vadd.f32 %v965_v2, %v837_v11 }
 0x556   :  { %v967_v10 = vpop.f32.mrf.mxu0  ;;  %v1013_v29 = vadd.f32 %v1012_v26, %v3402_v21 }
 0x557   :  { %v3415_v5 = vadd.f32 %v967_v10, %v837_v11  ;;  %v1066_v3 = vsel %vm643_vm4, %v1049_v25, 0.0  ;;  %v1050_v60 = vmul.f32 %v3412_v28, %v3412_v28 }
 0x558   :  { %v971_v30 = vpop.f32.mrf.mxu0  ;;  %1014 = vadd.xlane.f32.xlu0 %v1013_v29  ;;  %v1067_v32 = vadd.f32 %v1066_v3, %v1048_v27 }
 0x559   :  { %v1051_v34 = vmul.f32 %v3415_v5, %v3415_v5  ;;  %v1016_v9 = vsel %vm643_vm4, %v3415_v5, 0.0  ;;  %v3424_v15 = vadd.f32 %v971_v30, %v842_v7 }
 0x55a   :  { %v973_v36 = vpop.f32.mrf.mxu0  ;;  %1068 = vadd.xlane.f32.xlu1 %v1067_v32  ;;  %v1017_v35 = vadd.f32 %v1016_v9, %v3412_v28 }
 0x55b   :  { %v3427_v37 = vadd.f32 %v973_v36, %v842_v7  ;;  %v1070_v31 = vsel %vm643_vm4, %v1051_v34, 0.0  ;;  %v1052_v53 = vmul.f32 %v3424_v15, %v3424_v15 }
 0x55c   :  { %v977_v42 = vpop.f32.mrf.mxu0  ;;  %1018 = vadd.xlane.f32.xlu0 %v1017_v35  ;;  %v1071_v48 = vadd.f32 %v1070_v31, %v1050_v60 }
 0x55d   :  { %v1053_v50 = vmul.f32 %v3427_v37, %v3427_v37  ;;  %v1020_v57 = vsel %vm643_vm4, %v3427_v37, 0.0  ;;  %v3436_v12 = vadd.f32 %v977_v42, %v847_v19 }
 0x55e   :  { %v979_v55 = vpop.f32.mrf.mxu0  ;;  %1072 = vadd.xlane.f32.xlu1 %v1071_v48  ;;  %v1021_v33 = vadd.f32 %v1020_v57, %v3424_v15 }
 0x55f   :  { %v3439_v44 = vadd.f32 %v979_v55, %v847_v19  ;;  %v1074_v24 = vsel %vm643_vm4, %v1053_v50, 0.0  ;;  %v1054_v58 = vmul.f32 %v3436_v12, %v3436_v12 }
 0x560   :  { %v983_v56 = vpop.f32.mrf.mxu0  ;;  %1022 = vadd.xlane.f32.xlu0 %v1021_v33  ;;  %v1075_v51 = vadd.f32 %v1074_v24, %v1052_v53 }
 0x561   :  { %v1055_v17 = vmul.f32 %v3439_v44, %v3439_v44  ;;  %v1024_v41 = vsel %vm643_vm4, %v3439_v44, 0.0  ;;  %v3448_v59 = vadd.f32 %v983_v56, %v852_v14 }
 0x562   :  { %v985_v61 = vpop.f32.mrf.mxu0  ;;  %1076 = vadd.xlane.f32.xlu1 %v1075_v51  ;;  %v1025_v62 = vadd.f32 %v1024_v41, %v3436_v12 }
 0x563   :  { %v3451_v63 = vadd.f32 %v985_v61, %v852_v14  ;;  %v1078_v7 = vsel %vm643_vm4, %v1055_v17, 0.0  ;;  %v1056_v2 = vmul.f32 %v3448_v59, %v3448_v59 }
 0x564   :  { %v989_v19 = vpop.f32.mrf.mxu0  ;;  %1026 = vadd.xlane.f32.xlu0 %v1025_v62  ;;  %v1079_v20 = vadd.f32 %v1078_v7, %v1054_v58 }
 0x565   :  { %v1057_v8 = vmul.f32 %v3451_v63, %v3451_v63  ;;  %v1028_v22 = vsel %vm643_vm4, %v3451_v63, 0.0  ;;  %v3461_v11 = vadd.f32 %v989_v19, %v3400_v18 }
 0x566   :  { %v991_v25 = vpop.f32.mrf.mxu0  ;;  %1080 = vadd.xlane.f32.xlu1 %v1079_v20  ;;  %v1029_v14 = vadd.f32 %v1028_v22, %v3448_v59 }
 0x567   :  { %v3465_v26 = vadd.f32 %v991_v25, %v3400_v18  ;;  %v1082_v27 = vsel %vm643_vm4, %v1057_v8, 0.0  ;;  %v1058_v32 = vmul.f32 %v3461_v11, %v3461_v11 }
 0x568   :  { %v995_v10 = vpop.f32.mrf.mxu0  ;;  %1030 = vadd.xlane.f32.xlu0 %v1029_v14  ;;  %v1083_v29 = vadd.f32 %v1082_v27, %v1056_v2 }
 0x569   :  { %v1059_v3 = vmul.f32 %v3465_v26, %v3465_v26  ;;  %v1032_v30 = vsel %vm643_vm4, %v3465_v26, 0.0  ;;  %v3475_v34 = vadd.f32 %v995_v10, %v3398_v6 }
 0x56a   :  { %v997_v9 = vpop.f32.mrf.mxu0  ;;  %1084 = vadd.xlane.f32.xlu1 %v1083_v29  ;;  %v1033_v18 = vadd.f32 %v1032_v30, %v3461_v11 }
 0x56b   :  { %v3479_v60 = vadd.f32 %v997_v9, %v3398_v6  ;;  %v1086_v36 = vsel %vm643_vm4, %v1059_v3, 0.0  ;;  %v1060_v50 = vmul.f32 %v3475_v34, %v3475_v34 }
 0x56c   :  { %v1001_v35 = vpop.f32.mrf.mxu0  ;;  %1034 = vadd.xlane.f32.xlu0 %v1033_v18  ;;  %v1087_v31 = vadd.f32 %v1086_v36, %v1058_v32 }
 0x56d   :  { %v1061_v42 = vmul.f32 %v3479_v60, %v3479_v60  ;;  %v1036_v48 = vsel %vm643_vm4, %v3479_v60, 0.0  ;;  %v3489_v57 = vadd.f32 %v1001_v35, %v3396_v1 }
 0x56e   :  { %v1003_v53 = vpop.f32.mrf.mxu0  ;;  %1088 = vadd.xlane.f32.xlu1 %v1087_v31  ;;  %v1037_v6 = vadd.f32 %v1036_v48, %v3475_v34 }
 0x56f   :  { %v3493_v55 = vadd.f32 %v1003_v53, %v3396_v1  ;;  %v1090_v33 = vsel %vm643_vm4, %v1061_v42, 0.0  ;;  %v1062_v41 = vmul.f32 %v3489_v57, %v3489_v57 }
 0x570   :  { %v1007_v24 = vpop.f32.mrf.mxu0  ;;  %1038 = vadd.xlane.f32.xlu0 %v1037_v6  ;;  %v1091_v56 = vadd.f32 %v1090_v33, %v1060_v50 }
 0x571   :  { %v1063_v51 = vmul.f32 %v3493_v55, %v3493_v55  ;;  %v1040_v17 = vsel %vm643_vm4, %v3493_v55, 0.0  ;;  %v3503_v58 = vadd.f32 %v1007_v24, %v3394_v0 }
 0x572   :  { %v1009_v61 = vpop.f32.mrf.mxu0  ;;  %1092 = vadd.xlane.f32.xlu1 %v1091_v56  ;;  %v1041_v1 = vadd.f32 %v1040_v17, %v3489_v57 }
 0x573   :  { %v3507_v62 = vadd.f32 %v1009_v61, %v3394_v0  ;;  %v1094_v7 = vsel %vm643_vm4, %v1063_v51, 0.0  ;;  %v1064_v22 = vmul.f32 %v3503_v58, %v3503_v58 }
 0x574   :  { %1042 = vadd.xlane.f32.xlu0 %v1041_v1  ;;  %v1095_v19 = vadd.f32 %v1094_v7, %v1062_v41 }
 0x575   :  { %v1065_v20 = vmul.f32 %v3507_v62, %v3507_v62  ;;  %v1044_v8 = vsel %vm643_vm4, %v3507_v62, 0.0 }
 0x576   :  { %1096 = vadd.xlane.f32.xlu1 %v1095_v19  ;;  %v1045_v25 = vadd.f32 %v1044_v8, %v3503_v58 }
 0x577   :  { %v1098_v2 = vsel %vm643_vm4, %v1065_v20, 0.0 }
 0x578   :  { %v1099_v0 = vadd.f32 %v1098_v2, %v1064_v22 }
 0x57a   :  { %1046 = vadd.xlane.f32.xlu1 %v1045_v25  ;;  %1100 = vadd.xlane.f32.xlu0 %v1099_v0 }
 0x58b   :  { %1113 = vrot.lane.b32.xlu1 %v3343_v52, %s3011_s29 }
 0x58f   :  { %1115 = vrot.lane.b32.xlu1 %v3333_v45, %s3011_s29 }
 0x590   :  { %1111 = vrot.lane.b32.xlu0 %v3317_v39, %s3011_s29 }
 0x593   :  { %1119 = vrot.lane.b32.xlu1 %v3327_v13, %s3011_s29 }
 0x594   :  { %1117 = vrot.lane.b32.xlu0 %v3339_v47, %s3011_s29 }
 0x597   :  { %1123 = vrot.lane.b32.xlu1 %v3329_v43, %s3011_s29 }
 0x598   :  { %1121 = vrot.lane.b32.xlu0 %v3335_v46, %s3011_s29 }
 0x59b   :  { %1127 = vrot.lane.b32.xlu1 %v3323_v49, %s3011_s29 }
 0x59c   :  { %1125 = vrot.lane.b32.xlu0 %v3321_v40, %s3011_s29 }
 0x5e1   :  { %v1015_v14 = vpop.xlane.xlu0 %1014 }
 0x5e3   :  { %v1069_v27 = vpop.xlane.xlu1 %1068 }
 0x5e4   :  { %v1102_v19 = vsel %vm275_vm3, %v1015_v14, %v1069_v27 }
 0x5e5   :  { %v1019_v10 = vpop.xlane.xlu0 %1018 }
 0x5e7   :  { %v1073_v29 = vpop.xlane.xlu1 %1072 }
 0x5e8   :  { %v1103_v1 = vsel %vm275_vm3, %v1019_v10, %v1073_v29  ;;  %v3013_v10 = vmov 17  }
 0x5e9   :  { %v1023_v3 = vpop.xlane.xlu0 %1022  ;;  %2869 = vset.pattern.permute.xlu0 %v3013_v10 }
 0x5eb   :  { %v1077_v30 = vpop.xlane.xlu1 %1076 }
 0x5ec   :  { %v1104_v61 = vsel %vm275_vm3, %v1023_v3, %v1077_v30 }
 0x5ed   :  { %v1027_v32 = vpop.xlane.xlu0 %1026 }
 0x5ef   :  { %v1081_v9 = vpop.xlane.xlu1 %1080 }
 0x5f0   :  { %v1105_v41 = vsel %vm275_vm3, %v1027_v32, %v1081_v9 }
 0x5f1   :  { %v1031_v18 = vpop.xlane.xlu0 %1030 }
 0x5f3   :  { %v1085_v36 = vpop.xlane.xlu1 %1084 }
 0x5f4   :  { %v1106_v17 = vsel %vm275_vm3, %v1031_v18, %v1085_v36 }
 0x5f5   :  { %v1035_v35 = vpop.xlane.xlu0 %1034 }
 0x5f7   :  { %v1089_v31 = vpop.xlane.xlu1 %1088 }
 0x5f8   :  { %v1107_v51 = vsel %vm275_vm3, %v1035_v35, %v1089_v31 }
 0x5f9   :  { %v1039_v42 = vpop.xlane.xlu0 %1038 }
 0x5fb   :  { %v1093_v48 = vpop.xlane.xlu1 %1092 }
 0x5fc   :  { %v1108_v56 = vsel %vm275_vm3, %v1039_v42, %v1093_v48 }
 0x5fd   :  { %v1043_v50 = vpop.xlane.xlu0 %1042 }
 0x5ff   :  { %v1097_v53 = vpop.xlane.xlu1 %1096 }
 0x600   :  { %v1109_v24 = vsel %vm275_vm3, %v1043_v50, %v1097_v53 }
 0x603   :  { %v1047_v6 = vpop.xlane.xlu1 %1046  ;;  %v1101_v33 = vpop.xlane.xlu0 %1100 }
 0x604   :  { %v1110_v40 = vsel %vm275_vm3, %v1047_v6, %v1101_v33 }
 0x605   :  { %2740 = vmatpush3.msra.mxu1 %v1110_v40 }
 0x606   :  { %2741 = vmatprep.subr.mxu1 %v3002_v4 }
 0x607   :  { %2742 = vmatpush3.msra.mxu1 %v1109_v24  ;;  %v1112_v7 = vpop.permute.xlu0 %1111  ;;  %v1114_v20 = vpop.permute.xlu1 %1113 }
 0x608   :  { %2743 = vmatprep.subr.mxu1 %v3002_v4 }
 0x609   :  { %2744 = vmatpush3.msra.mxu1 %v1108_v56 }
 0x60a   :  { %2745 = vmatprep.subr.mxu1 %v3002_v4 }
 0x60b   :  { %2746 = vmatpush3.msra.mxu1 %v1107_v51  ;;  %v1116_v8 = vpop.permute.xlu1 %1115  ;;  %v1118_v22 = vpop.permute.xlu0 %1117 }
 0x60c   :  { %2747 = vmatprep.subr.mxu1 %v3002_v4 }
 0x60d   :  { %2748 = vmatpush3.msra.mxu1 %v1106_v17 }
 0x60e   :  { %2749 = vmatprep.subr.mxu1 %v3002_v4 }
 0x60f   :  { %2750 = vmatpush3.msra.mxu1 %v1105_v41  ;;  %v1120_v2 = vpop.permute.xlu1 %1119  ;;  %v1122_v25 = vpop.permute.xlu0 %1121 }
 0x610   :  { %2751 = vmatprep.subr.mxu1 %v3002_v4 }
 0x611   :  { %2752 = vmatpush3.msra.mxu1 %v1104_v61 }
 0x612   :  { %2753 = vmatprep.subr.mxu1 %v3002_v4 }
 0x613   :  { %2754 = vmatpush3.msra.mxu1 %v1103_v1  ;;  %v1124_v0 = vpop.permute.xlu1 %1123  ;;  %v1126_v14 = vpop.permute.xlu0 %1125 }
 0x614   :  { %2755 = vmatprep.subr.mxu1 %v3002_v4 }
 0x615   :  { %2756 = vmatpush3.msra.mxu1 %v1102_v19 }
 0x616   :  { %2758 = vmatmul.mubr.msk.f32.vlgmr.msra.gmra.mxu1 %vm1129_vm7, %v1112_v7  ;;  %1869 = vmatprep.subr.mxu1 %v3002_v4 }
 0x617   :  { %2760 = vmatprep.mubr.msk.f32.mxu1 %vm3012_vm6, %v3002_v4  ;;  %v1128_v27 = vpop.permute.xlu1 %1127 }
 0x61a   :  { %2761 = vmatmul.mubr.msk.f32.gmra.mxu1 %vm1129_vm7, %v1114_v20 }
 0x61b   :  { %2763 = vmatprep.mubr.msk.f32.mxu1 %vm3012_vm6, %v3002_v4 }
 0x61e   :  { %2764 = vmatmul.mubr.msk.f32.gmra.mxu1 %vm1129_vm7, %v1116_v8 }
 0x61f   :  { %2766 = vmatprep.mubr.msk.f32.mxu1 %vm3012_vm6, %v3002_v4 }
 0x622   :  { %2767 = vmatmul.mubr.msk.f32.gmra.mxu1 %vm1129_vm7, %v1118_v22 }
 0x623   :  { %2769 = vmatprep.mubr.msk.f32.mxu1 %vm3012_vm6, %v3002_v4 }
 0x626   :  { %2770 = vmatmul.mubr.msk.f32.gmra.mxu1 %vm1129_vm7, %v1120_v2 }
 0x627   :  { %2772 = vmatprep.mubr.msk.f32.mxu1 %vm3012_vm6, %v3002_v4 }
 0x62a   :  { %2773 = vmatmul.mubr.msk.f32.gmra.mxu1 %vm1129_vm7, %v1122_v25 }
 0x62b   :  { %2775 = vmatprep.mubr.msk.f32.mxu1 %vm3012_vm6, %v3002_v4 }
 0x62e   :  { %2776 = vmatmul.mubr.msk.f32.gmra.mxu1 %vm1129_vm7, %v1124_v0 }
 0x62f   :  { %2778 = vmatprep.mubr.msk.f32.mxu1 %vm3012_vm6, %v3002_v4 }
 0x632   :  { %2779 = vmatmul.mubr.msk.f32.gmra.mxu1 %vm1129_vm7, %v1126_v14 }
 0x633   :  { %2781 = vmatprep.mubr.msk.f32.mxu1 %vm3012_vm6, %v3002_v4 }
 0x636   :  { %2782 = vmatmul.mubr.msk.f32.gmra.mxu1 %vm1129_vm7, %v1128_v27 }
 0x6d6   :  { %v1214_v29 = vpop.f32.mrf.mxu1 }
 0x6d7   :  { %v3611_v25 = vmul.f32 0.00074404763, %v1214_v29 }
 0x6d8   :  { %v2759_v3 = vpop.f32.mrf.mxu1 }
 0x6d9   :  { %v1267_v3 = vmul.f32 %v3611_v25, %v3611_v25 }
 0x6da   :  { %v1219_v30 = vpop.f32.mrf.mxu1 }
 0x6db   :  { %v3593_v51 = vmul.f32 0.00074404763, %v1219_v30 }
 0x6dc   :  { %v2762_v32 = vpop.f32.mrf.mxu1 }
 0x6dd   :  { %v1268_v19 = vmul.f32 %v3593_v51, %v3593_v51  ;;  %v3014_v32 = vmov 18  }
 0x6de   :  { %v1224_v9 = vpop.f32.mrf.mxu1 }
 0x6df   :  { %v3605_v20 = vmul.f32 0.00074404763, %v1224_v9 }
 0x6e0   :  { %v2765_v18 = vpop.f32.mrf.mxu1 }
 0x6e1   :  { %v1269_v0 = vmul.f32 %v3605_v20, %v3605_v20 }
 0x6e2   :  { %v1229_v36 = vpop.f32.mrf.mxu1 }
 0x6e3   :  { %v3586_v6 = vmul.f32 0.00074404763, %v1229_v36 }
 0x6e4   :  { %v2768_v35 = vpop.f32.mrf.mxu1 }
 0x6e5   :  { %v1270_v17 = vmul.f32 %v3586_v6, %v3586_v6 }
 0x6e6   :  { %v1234_v31 = vpop.f32.mrf.mxu1 }
 0x6e7   :  { %v3597_v41 = vmul.f32 0.00074404763, %v1234_v31 }
 0x6e8   :  { %v2771_v42 = vpop.f32.mrf.mxu1 }
 0x6e9   :  { %v1271_v8 = vmul.f32 %v3597_v41, %v3597_v41 }
 0x6ea   :  { %v1239_v48 = vpop.f32.mrf.mxu1 }
 0x6eb   :  { %v3584_v50 = vmul.f32 0.00074404763, %v1239_v48 }
 0x6ec   :  { %v2774_v53 = vpop.f32.mrf.mxu1 }
 0x6ed   :  { %v1272_v33 = vmul.f32 %v3584_v50, %v3584_v50 }
 0x6ee   :  { %v1244_v40 = vpop.f32.mrf.mxu1 }
 0x6ef   :  { %v3590_v24 = vmul.f32 0.00074404763, %v1244_v40  ;;  %1295 = vrot.lane.b32.xlu1 %v1272_v33, %s3006_s28 }
 0x6f0   :  { %v2777_v56 = vpop.f32.mrf.mxu1 }
 0x6f1   :  { %v1273_v61 = vmul.f32 %v3590_v24, %v3590_v24 }
 0x6f2   :  { %v1249_v1 = vpop.f32.mrf.mxu1 }
 0x6f3   :  { %1291 = vrot.lane.b32.xlu1 %v1270_v17, %s3006_s28  ;;  %1297 = vrot.lane.b32.xlu0 %v1273_v61, %s3006_s28  ;;  %v3615_v14 = vmul.f32 0.00074404763, %v1249_v1 }
 0x6f4   :  { %v2780_v7 = vpop.f32.mrf.mxu1 }
 0x6f5   :  { %v1274_v30 = vmul.f32 %v3615_v14, %v3615_v14 }
 0x6f6   :  { %v1254_v22 = vpop.f32.mrf.mxu1 }
 0x6f7   :  { %1287 = vrot.lane.b32.xlu1 %v1268_v19, %s3006_s28  ;;  %1293 = vrot.lane.b32.xlu0 %v1271_v8, %s3006_s28  ;;  %v3619_v27 = vmul.f32 0.00074404763, %v1254_v22 }
 0x6f8   :  { %v2783_v2 = vpop.f32.mrf.mxu1 }
 0x6f9   :  { %v1275_v29 = vmul.f32 %v3619_v27, %v3619_v27 }
 0x6fb   :  { %1362 = vperm.xlu1 %2864, %v3590_v24   ;;  %1289 = vrot.lane.b32.xlu0 %v1269_v0, %s3006_s28 }
 0x6ff   :  { %1352 = vperm.xlu1 %2864, %v3597_v41   ;;  %1285 = vrot.lane.b32.xlu0 %v1267_v3, %s3006_s28 }
 0x703   :  { %1299 = vrot.lane.b32.xlu0 %v1274_v30, %s3006_s28  ;;  %1301 = vrot.lane.b32.xlu1 %v1275_v29, %s3006_s28 }
 0x704   :  { %2865 = vset.pattern.permute.xlu1 %v3013_v10 }
 0x707   :  { %1491 = vperm.xlu0 %2869, %v3327_v13   ;;  %1499 = vperm.xlu1 %2865, %v3329_v43  }
 0x70b   :  { %2870 = vset.pattern.permute.xlu0 %v3005_v54  ;;  %2866 = vset.pattern.permute.xlu1 %v3005_v54 }
 0x70c   :  { %1357 = vperm.xlu0 %2870, %v3584_v50   ;;  %1347 = vperm.xlu1 %2866, %v3586_v6  }
 0x710   :  { %1332 = vperm.xlu0 %2870, %v3611_v25   ;;  %2867 = vset.pattern.permute.xlu1 %v3013_v10 }
 0x711   :  { %1495 = vperm.xlu1 %2867, %v3335_v46  }
 0x714   :  { %2875 = vset.pattern.permute.xlu0 %v3014_v32 }
 0x715   :  { %2868 = vset.pattern.permute.xlu1 %v3005_v54  ;;  %1553 = vperm.xlu0 %2875, %v3329_v43  }
 0x716   :  { %1342 = vperm.xlu1 %2868, %v3605_v20  }
 0x719   :  { %1541 = vperm.xlu0 %2875, %v3339_v47  }
 0x71a   :  { %2871 = vset.pattern.permute.xlu1 %v3014_v32 }
 0x71b   :  { %1549 = vperm.xlu1 %2871, %v3335_v46  }
 0x71d   :  { %2878 = vset.pattern.permute.xlu0 %v3009_v23 }
 0x71f   :  { %2872 = vset.pattern.permute.xlu1 %v3005_v54 }
 0x720   :  { %1337 = vperm.xlu1 %2872, %v3593_v51  }
 0x724   :  { %2873 = vset.pattern.permute.xlu1 %v3013_v10 }
 0x725   :  { %1487 = vperm.xlu1 %2873, %v3339_v47  }
 0x729   :  { %2874 = vset.pattern.permute.xlu1 %v3014_v32 }
 0x72a   :  { %1545 = vperm.xlu1 %2874, %v3327_v13  }
 0x72e   :  { %2876 = vset.pattern.permute.xlu1 %v3013_v10 }
 0x72f   :  { %1483 = vperm.xlu1 %2876, %v3333_v45  }
 0x733   :  { %2877 = vset.pattern.permute.xlu1 %v3009_v23 }
 0x761   :  { %v1296_v43 = vpop.permute.xlu1 %1295 }
 0x762   :  { %v1317_v56 = vsub.f32 %v3584_v50, %v1296_v43 }
 0x764   :  { %v1326_v8 = vmax.f32 %v1317_v56, 0.0 }
 0x765   :  { %v1292_v46 = vpop.permute.xlu1 %1291  ;;  %v1298_v9 = vpop.permute.xlu0 %1297 }
 0x766   :  { %v1315_v18 = vsub.f32 %v3586_v6, %v1292_v46  ;;  %v1318_v42 = vsub.f32 %v3590_v24, %v1298_v9  ;;  %v1398_v2 = vadd.f32 1e-05, %v1326_v8 }
 0x768   :  { %v1324_v47 = vmax.f32 %v1315_v18, 0.0  ;;  %v1327_v61 = vmax.f32 %v1318_v42, 0.0 }
 0x769   :  { %v1288_v36 = vpop.permute.xlu1 %1287  ;;  %v1294_v35 = vpop.permute.xlu0 %1293 }
 0x76a   :  { %v1313_v31 = vsub.f32 %v3593_v51, %v1288_v36  ;;  %v1316_v13 = vsub.f32 %v3597_v41, %v1294_v35  ;;  %v1396_v17 = vadd.f32 1e-05, %v1324_v47  ;;  %v1399_v24 = vadd.f32 1e-05, %v1327_v61 }
 0x76c   :  { %v1322_v48 = vmax.f32 %v1313_v31, 0.0  ;;  %v1325_v6 = vmax.f32 %v1316_v13, 0.0 }
 0x76d   :  { %v1290_v53 = vpop.permute.xlu0 %1289 }
 0x76e   :  { %v1394_v33 = vadd.f32 1e-05, %v1322_v48  ;;  %v1314_v40 = vsub.f32 %v3605_v20, %v1290_v53  ;;  %v1397_v22 = vadd.f32 1e-05, %v1325_v6 }
 0x770   :  { %2921 = vrsqrt.f32 %v1394_v33  ;;  %v1323_v1 = vmax.f32 %v1314_v40, 0.0 }
 0x771   :  { %v1286_v7 = vpop.permute.xlu0 %1285  ;;  %2923 = vrsqrt.f32 %v1396_v17 }
 0x772   :  { %v1395_v19 = vadd.f32 1e-05, %v1323_v1  ;;  %v1312_v51 = vsub.f32 %v3611_v25, %v1286_v7 }
 0x774   :  { %2925 = vrsqrt.f32 %v1395_v19  ;;  %v1321_v41 = vmax.f32 %v1312_v51, 0.0 }
 0x775   :  { %2927 = vrsqrt.f32 %v1399_v24  ;;  %v1300_v30 = vpop.permute.xlu0 %1299 }
 0x776   :  { %2929 = vrsqrt.f32 %v1397_v22  ;;  %v1393_v20 = vadd.f32 1e-05, %v1321_v41  ;;  %v3665_v0 = vpop.permute.xlu1 %1362  ;;  %v1319_v25 = vsub.f32 %v3615_v14, %v1300_v30 }
 0x777   :  { %2931 = vrsqrt.f32 %v1398_v2  ;;  %v1387_v41 = vsub.f32 %v3475_v34, %v3665_v0 }
 0x778   :  { %2933 = vrsqrt.f32 %v1393_v20  ;;  %v1328_v18 = vmax.f32 %v1319_v25, 0.0 }
 0x77a   :  { %v3668_v46 = vpop.permute.xlu1 %1352  ;;  %v1400_v47 = vadd.f32 1e-05, %v1328_v18 }
 0x77b   :  { %v1383_v20 = vsub.f32 %v3448_v59, %v3668_v46  ;;  %v1384_v34 = vsub.f32 %v3451_v63, %v3668_v46  ;;  %v1388_v63 = vsub.f32 %v3479_v60, %v3665_v0 }
 0x77c   :  { %2935 = vrsqrt.f32 %v1400_v47 }
 0x77d   :  { %v2922_v50 = vpop.eup %2921 }
 0x77e   :  { %1418 = vperm.xlu1 %2877, %v2922_v50   ;;  %v2924_v3 = vpop.eup %2923  ;;  %v1302_v31 = vpop.permute.xlu1 %1301 }
 0x77f   :  { %v1320_v42 = vsub.f32 %v3619_v27, %v1302_v31 }
 0x781   :  { %v2926_v29 = vpop.eup %2925  ;;  %v1329_v48 = vmax.f32 %v1320_v42, 0.0 }
 0x782   :  { %1428 = vperm.xlu1 %2877, %v2924_v3   ;;  %1423 = vperm.xlu0 %2878, %v2926_v29   ;;  %v2928_v43 = vpop.eup %2927 }
 0x783   :  { %v2930_v9 = vpop.eup %2929  ;;  %v1401_v13 = vadd.f32 1e-05, %v1329_v48 }
 0x784   :  { %v2932_v36 = vpop.eup %2931 }
 0x785   :  { %v2934_v35 = vpop.eup %2933  ;;  %2937 = vrsqrt.f32 %v1401_v13 }
 0x786   :  { %1443 = vperm.xlu1 %2877, %v2928_v43   ;;  %1433 = vperm.xlu0 %2878, %v2930_v9  }
 0x789   :  { %v2936_v53 = vpop.eup %2935 }
 0x78a   :  { %1438 = vperm.xlu0 %2878, %v2932_v36   ;;  %1413 = vperm.xlu1 %2877, %v2934_v35  }
 0x78e   :  { %2880 = vset.pattern.permute.xlu0 %v3014_v32  ;;  %2879 = vset.pattern.permute.xlu1 %v3013_v10 }
 0x78f   :  { %1537 = vperm.xlu0 %2880, %v3333_v45   ;;  %1479 = vperm.xlu1 %2879, %v3343_v52  }
 0x792   :  { %v2938_v45 = vpop.eup %2937 }
 0x793   :  { %1533 = vperm.xlu0 %2880, %v3343_v52   ;;  %1475 = vperm.xlu1 %2879, %v3317_v39   ;;  %v3691_v52 = vpop.permute.xlu1 %1499 }
 0x797   :  { %2882 = vset.pattern.permute.xlu0 %v3005_v54  ;;  %2881 = vset.pattern.permute.xlu1 %v3014_v32 }
 0x798   :  { %1372 = vperm.xlu0 %2882, %v3619_v27   ;;  %1529 = vperm.xlu1 %2881, %v3317_v39   ;;  %v2953_v39 = vld [vmem:[#allocation3 + $0x1d0] sm:$0xff] }
 0x79c   :  { %2885 = vset.pattern.permute.xlu0 %v3009_v23  ;;  %2883 = vset.pattern.permute.xlu1 %v3005_v54 }
 0x79d   :  { %1367 = vperm.xlu1 %2883, %v3615_v14   ;;  %1448 = vperm.xlu0 %2885, %v2936_v53   ;;  %v1348_v14 = vpop.permute.xlu1 %1347 }
 0x79e   :  { %v1381_v51 = vsub.f32 %v3436_v12, %v1348_v14  ;;  %v1382_v50 = vsub.f32 %v3439_v44, %v1348_v14 }
 0x7a1   :  { %2884 = vset.pattern.permute.xlu1 %v3013_v10  ;;  %2888 = vset.pattern.permute.xlu0 %v3014_v32  ;;  %v3693_v27 = vpop.permute.xlu1 %1495 }
 0x7a2   :  { %1507 = vperm.xlu1 %2884, %v3323_v49   ;;  %1561 = vperm.xlu0 %2888, %v3323_v49   ;;  %v1492_v49 = vpop.permute.xlu0 %1491 }
 0x7a5   :  { %v1343_v33 = vpop.permute.xlu1 %1342 }
 0x7a6   :  { %2886 = vset.pattern.permute.xlu1 %v3009_v23  ;;  %v1358_v61 = vpop.permute.xlu0 %1357  ;;  %v1379_v12 = vsub.f32 %v3424_v15, %v1343_v33  ;;  %v1380_v18 = vsub.f32 %v3427_v37, %v1343_v33 }
 0x7a7   :  { %1453 = vperm.xlu1 %2886, %v2938_v45   ;;  %v1385_v59 = vsub.f32 %v3461_v11, %v1358_v61 }
 0x7a9   :  { %v3695_v40 = vpop.permute.xlu1 %1549 }
 0x7ab   :  { %2887 = vset.pattern.permute.xlu1 %v3013_v10  ;;  %v3701_v10 = vpop.permute.xlu0 %1332 }
 0x7ac   :  { %1503 = vperm.xlu1 %2887, %v2953_v39  }
 0x7ad   :  { %v3697_v56 = vpop.permute.xlu1 %1337 }
 0x7ae   :  { %v1377_v11 = vsub.f32 %v3412_v28, %v3697_v56 }
 0x7af   :  { %v3703_v1 = vpop.permute.xlu0 %1553 }
 0x7b0   :  { %2889 = vset.pattern.permute.xlu1 %v3014_v32 }
 0x7b1   :  { %1557 = vperm.xlu1 %2889, %v2953_v39   ;;  %v1488_v17 = vpop.permute.xlu1 %1487 }
 0x7b3   :  { %v1542_v7 = vpop.permute.xlu0 %1541 }
 0x7b5   :  { %v3699_v6 = vpop.permute.xlu1 %1545 }
 0x7b9   :  { %v1484_v32 = vpop.permute.xlu1 %1483 }
 0x7f9   :  { %v3705_v19 = vpop.permute.xlu1 %1418 }
 0x7fd   :  { %v1429_v8 = vpop.permute.xlu1 %1428  ;;  %v1424_v24 = vpop.permute.xlu0 %1423 }
 0x7fe   :  { %v1462_v22 = vmul.f32 %v1429_v8, %v1381_v51  ;;  %v1463_v43 = vmul.f32 %v1429_v8, %v1382_v50  ;;  %v1460_v42 = vmul.f32 %v1424_v24, %v1379_v12  ;;  %v1461_v48 = vmul.f32 %v1424_v24, %v1380_v18 }
 0x7ff   :  { %v1386_v51 = vsub.f32 %v3465_v26, %v1358_v61  ;;  %v1375_v26 = vsub.f32 %v3402_v21, %v3701_v10 }
 0x800   :  { %v1516_v2 = vmul.f32 %v1488_v17, %v1462_v22  ;;  %v1517_v53 = vmul.f32 %v1488_v17, %v1463_v43  ;;  %v1514_v17 = vmul.f32 %v1484_v32, %v1460_v42  ;;  %v1515_v24 = vmul.f32 %v1484_v32, %v1461_v48 }
 0x801   :  { %v1444_v3 = vpop.permute.xlu1 %1443  ;;  %v1434_v30 = vpop.permute.xlu0 %1433 }
 0x802   :  { %v1570_v29 = vadd.f32 %v1542_v7, %v1516_v2  ;;  %v1468_v25 = vmul.f32 %v1444_v3, %v1387_v41  ;;  %v1464_v9 = vmul.f32 %v1434_v30, %v1383_v20  ;;  %v1465_v15 = vmul.f32 %v1434_v30, %v1384_v34 }
 0x803   :  { %v1458_v2 = vmul.f32 %v3705_v19, %v1377_v11  ;;  %v1571_v20 = vadd.f32 %v1542_v7, %v1517_v53 }
 0x804   :  { %v1522_v36 = vmul.f32 %v3691_v52, %v1468_v25  ;;  %v1588_v35 = vmul.f32 0.01, %v1570_v29  ;;  %v1518_v31 = vmul.f32 %v1492_v49, %v1464_v9  ;;  %v1519_v60 = vmul.f32 %v1492_v49, %v1465_v15 }
 0x805   :  { %v3719_v44 = vpop.permute.xlu1 %1413  ;;  %v1439_v47 = vpop.permute.xlu0 %1438  ;;  %v1469_v25 = vmul.f32 %v1444_v3, %v1388_v63 }
 0x806   :  { %v1576_v13 = vadd.f32 %v3703_v1, %v1522_v36  ;;  %v1572_v37 = vadd.f32 %v3699_v6, %v1518_v31  ;;  %v1466_v45 = vmul.f32 %v1439_v47, %v1385_v59  ;;  %v3723_v39 = vmax.f32 %v1570_v29, %v1588_v35 }
 0x807   :  { %v1467_v28 = vmul.f32 %v1439_v47, %v1386_v51  ;;  %v1573_v49 = vadd.f32 %v3699_v6, %v1519_v60  ;;  %v1456_v18 = vmul.f32 %v3719_v44, %v1375_v26  ;;  %v1589_v35 = vmul.f32 0.01, %v1571_v20 }
 0x808   :  { %v1594_v14 = vmul.f32 0.01, %v1576_v13  ;;  %v1520_v46 = vmul.f32 %v3693_v27, %v1466_v45  ;;  %v1590_v33 = vmul.f32 0.01, %v1572_v37  ;;  %1621 = vst [vmem:[#allocation2 + $0x30] sm:$0xff] %v3723_v39 }
 0x809   :  { %v1521_v34 = vmul.f32 %v3693_v27, %v1467_v28  ;;  %v1523_v27 = vmul.f32 %v3691_v52, %v1469_v25  ;;  %v3761_v53 = vmax.f32 %v1571_v20, %v1589_v35  ;;  %v1591_v15 = vmul.f32 0.01, %v1573_v49 }
 0x80a   :  { %v1480_v8 = vpop.permute.xlu1 %1479  ;;  %v1538_v22 = vpop.permute.xlu0 %1537  ;;  %v3732_v41 = vmax.f32 %v1576_v13, %v1594_v14  ;;  %v1574_v0 = vadd.f32 %v3695_v40, %v1520_v46  ;;  %v3736_v29 = vmax.f32 %v1572_v37, %v1590_v33  ;;  %v1378_v37 = vsub.f32 %v3415_v5, %v3697_v56 }
 0x80b   :  { %v1568_v50 = vadd.f32 %v1538_v22, %v1514_v17  ;;  %v1569_v30 = vadd.f32 %v1538_v22, %v1515_v24  ;;  %v1512_v61 = vmul.f32 %v1480_v8, %v1458_v2  ;;  %v1575_v48 = vadd.f32 %v3695_v40, %v1521_v34 }
 0x80c   :  { %1624 = vst [vmem:[#allocation2 + $0x60] sm:$0xff] %v3732_v41  ;;  %v1592_v32 = vmul.f32 0.01, %v1574_v0  ;;  %1622 = vst [vmem:[#allocation2 + $0x40] sm:$0xff] %v3736_v29  ;;  %v1459_v52 = vmul.f32 %v3705_v19, %v1378_v37  ;;  %v1577_v40 = vadd.f32 %v3703_v1, %v1523_v27  ;;  %v1609_v63 = vmax.f32 %v1573_v49, %v1591_v15  ;;  %v3844_v37 = vld [vmem:[#allocation3 + $0x1a0] sm:$0xff] }
 0x80d   :  { %v1586_v43 = vmul.f32 0.01, %v1568_v50  ;;  %v1587_v9 = vmul.f32 0.01, %v1569_v30  ;;  %v1593_v11 = vmul.f32 0.01, %v1575_v48  ;;  %v1376_v5 = vsub.f32 %v3404_v16, %v3701_v10 }
 0x80e   :  { %v1476_v12 = vpop.permute.xlu1 %1475  ;;  %v1534_v7 = vpop.permute.xlu0 %1533  ;;  %v3749_v31 = vmax.f32 %v1574_v0, %v1592_v32  ;;  %v1513_v56 = vmul.f32 %v1480_v8, %v1459_v52  ;;  %v1595_v17 = vmul.f32 0.01, %v1577_v40  ;;  %v3848_v52 = vld [vmem:[#allocation3 + $0xa0] sm:$0xff] }
 0x80f   :  { %v1566_v36 = vadd.f32 %v1534_v7, %v1512_v61  ;;  %v3745_v59 = vmax.f32 %v1568_v50, %v1586_v43  ;;  %v3747_v21 = vmax.f32 %v1569_v30, %v1587_v9  ;;  %v1510_v47 = vmul.f32 %v1476_v12, %v1456_v18 }
 0x810   :  { %1623 = vst [vmem:[#allocation2 + $0x50] sm:$0xff] %v3749_v31  ;;  %v1457_v19 = vmul.f32 %v3719_v44, %v1376_v5  ;;  %v1567_v1 = vadd.f32 %v1534_v7, %v1513_v56  ;;  %v1611_v51 = vmax.f32 %v1575_v48, %v1593_v11  ;;  %v1613_v2 = vmax.f32 %v1577_v40, %v1595_v17  ;;  %v3850_v40 = vld [vmem:[#allocation3 + $0x120] sm:$0xff] }
 0x811   :  { %v1584_v3 = vmul.f32 0.01, %v1566_v36  ;;  %1620 = vst [vmem:[#allocation2 + $0x20] sm:$0xff] %v3745_v59  ;;  %1655 = vrot.lane.b32.xlu0 %v3747_v21, %s3001_s20  ;;  %1653 = vrot.lane.b32.xlu1 %v3745_v59, %s3001_s20  ;;  %v3858_v11 = vld [vmem:[#allocation3 + $0x60] sm:$0xff] }
 0x812   :  { %v1511_v22 = vmul.f32 %v1476_v12, %v1457_v19  ;;  %v1585_v16 = vmul.f32 0.01, %v1567_v1 }
 0x813   :  { %v3758_v6 = vmax.f32 %v1566_v36, %v1584_v3  ;;  %v1530_v42 = vpop.permute.xlu1 %1529  ;;  %v1373_v33 = vpop.permute.xlu0 %1372 }
 0x814   :  { %v1564_v13 = vadd.f32 %v1530_v42, %v1510_v47  ;;  %v1565_v10 = vadd.f32 %v1530_v42, %v1511_v22  ;;  %v1391_v20 = vsub.f32 %v3503_v58, %v1373_v33  ;;  %v1603_v0 = vmax.f32 %v1567_v1, %v1585_v16 }
 0x815   :  { %1619 = vst [vmem:[#allocation2 + $0x10] sm:$0xff] %v3758_v6  ;;  %1659 = vrot.lane.b32.xlu0 %v3761_v53, %s3001_s20  ;;  %1657 = vrot.lane.b32.xlu1 %v3723_v39, %s3001_s20  ;;  %v1392_v18 = vsub.f32 %v3507_v62, %v1373_v33 }
 0x816   :  { %v1582_v45 = vmul.f32 0.01, %v1564_v13  ;;  %v1583_v28 = vmul.f32 0.01, %v1565_v10 }
 0x818   :  { %v3772_v14 = vmax.f32 %v1564_v13, %v1582_v45  ;;  %v1368_v46 = vpop.permute.xlu1 %1367  ;;  %v1449_v8 = vpop.permute.xlu0 %1448  ;;  %v1601_v32 = vmax.f32 %v1565_v10, %v1583_v28  ;;  %v3015_v45 = vmov 88  }
 0x819   :  { %1663 = vrot.lane.b32.xlu0 %v1609_v63, %s3001_s20  ;;  %1661 = vrot.lane.b32.xlu1 %v3736_v29, %s3001_s20  ;;  %v1389_v30 = vsub.f32 %v3489_v57, %v1368_v46  ;;  %v1390_v57 = vsub.f32 %v3493_v55, %v1368_v46  ;;  %v1812_v46 = vld [vmem:[#allocation3 + $0x28] sm:$0xff] }
 0x81a   :  { %1618 = vst [vmem:[#allocation2] sm:$0xff] %v3772_v14  ;;  %2890 = vset.pattern.permute.xlu1 %v3015_v45  ;;  %2891 = vset.pattern.permute.xlu0 %v3015_v45 }
 0x81b   :  { %v1470_v25 = vmul.f32 %v1449_v8, %v1389_v30  ;;  %v1471_v35 = vmul.f32 %v1449_v8, %v1390_v57 }
 0x81d   :  { %v1508_v24 = vpop.permute.xlu1 %1507  ;;  %1667 = vrot.lane.b32.xlu0 %v1611_v51, %s3001_s20  ;;  %1665 = vrot.lane.b32.xlu1 %v3749_v31, %s3001_s20  ;;  %v1562_v50 = vpop.permute.xlu0 %1561 }
 0x821   :  { %1671 = vrot.lane.b32.xlu0 %v1613_v2, %s3001_s20  ;;  %1669 = vrot.lane.b32.xlu1 %v3732_v41, %s3001_s20 }
 0x822   :  { %v1454_v44 = vpop.permute.xlu1 %1453 }
 0x823   :  { %v1472_v60 = vmul.f32 %v1454_v44, %v1391_v20  ;;  %v1473_v34 = vmul.f32 %v1454_v44, %v1392_v18 }
 0x825   :  { %v1526_v26 = vmul.f32 %v1508_v24, %v1472_v60  ;;  %1651 = vrot.lane.b32.xlu0 %v1603_v0, %s3001_s20  ;;  %1649 = vrot.lane.b32.xlu1 %v3758_v6, %s3001_s20  ;;  %v1527_v55 = vmul.f32 %v1508_v24, %v1473_v34 }
 0x827   :  { %v1580_v61 = vadd.f32 %v1562_v50, %v1526_v26  ;;  %v1504_v58 = vpop.permute.xlu1 %1503  ;;  %v1581_v27 = vadd.f32 %v1562_v50, %v1527_v55 }
 0x828   :  { %v1524_v9 = vmul.f32 %v1504_v58, %v1470_v25  ;;  %v1525_v47 = vmul.f32 %v1504_v58, %v1471_v35 }
 0x829   :  { %v1598_v43 = vmul.f32 0.01, %v1580_v61  ;;  %1647 = vrot.lane.b32.xlu0 %v1601_v32, %s3001_s20  ;;  %1645 = vrot.lane.b32.xlu1 %v3772_v14, %s3001_s20  ;;  %v1599_v48 = vmul.f32 0.01, %v1581_v27 }
 0x82b   :  { %v3795_v12 = vmax.f32 %v1580_v61, %v1598_v43  ;;  %v1617_v15 = vmax.f32 %v1581_v27, %v1599_v48 }
 0x82c   :  { %v1558_v7 = vpop.permute.xlu1 %1557 }
 0x82d   :  { %v1578_v49 = vadd.f32 %v1558_v7, %v1524_v9  ;;  %1626 = vst [vmem:[#allocation2 + $0x80] sm:$0xff] %v3795_v12  ;;  %1730 = vrot.lane.b32.xlu0 %v1611_v51, %s3000_s13  ;;  %1728 = vrot.lane.b32.xlu1 %v3749_v31, %s3000_s13  ;;  %v1579_v62 = vadd.f32 %v1558_v7, %v1525_v47 }
 0x82f   :  { %v1596_v36 = vmul.f32 0.01, %v1578_v49  ;;  %v1597_v42 = vmul.f32 0.01, %v1579_v62 }
 0x831   :  { %v3803_v3 = vmax.f32 %v1578_v49, %v1596_v36  ;;  %1726 = vrot.lane.b32.xlu0 %v1609_v63, %s3000_s13  ;;  %1724 = vrot.lane.b32.xlu1 %v3736_v29, %s3000_s13  ;;  %v1615_v13 = vmax.f32 %v1579_v62, %v1597_v42  ;;  %v3854_v63 = vld [vmem:[#allocation3 + $0xe0] sm:$0xff] }
 0x833   :  { %1625 = vst [vmem:[#allocation2 + $0x70] sm:$0xff] %v3803_v3 }
 0x835   :  { %1722 = vrot.lane.b32.xlu0 %v3761_v53, %s3000_s13  ;;  %1720 = vrot.lane.b32.xlu1 %v3723_v39, %s3000_s13  ;;  %v3829_v53 = vld [vmem:[#allocation3 + $0x20] sm:$0xff] }
 0x836   :  { %2659 = vmatprep.mubr.msk.f32.mxu1 %vm1854_vm8, %v3829_v53 }
 0x839   :  { %1734 = vrot.lane.b32.xlu0 %v1613_v2, %s3000_s13  ;;  %1732 = vrot.lane.b32.xlu1 %v3732_v41, %s3000_s13 }
 0x83d   :  { %1738 = vrot.lane.b32.xlu0 %v1615_v13, %s3000_s13  ;;  %1736 = vrot.lane.b32.xlu1 %v3803_v3, %s3000_s13 }
 0x841   :  { %1742 = vrot.lane.b32.xlu0 %v1617_v15, %s3000_s13  ;;  %1740 = vrot.lane.b32.xlu1 %v3795_v12, %s3000_s13 }
 0x845   :  { %1718 = vrot.lane.b32.xlu0 %v3747_v21, %s3000_s13  ;;  %1716 = vrot.lane.b32.xlu1 %v3745_v59, %s3000_s13  ;;  %v3842_v21 = vld [vmem:[#allocation3 + $0x160] sm:$0xff] }
 0x849   :  { %1714 = vrot.lane.b32.xlu0 %v1603_v0, %s3000_s13  ;;  %1712 = vrot.lane.b32.xlu1 %v3758_v6, %s3000_s13 }
 0x84d   :  { %1710 = vrot.lane.b32.xlu0 %v1601_v32, %s3000_s13  ;;  %1708 = vrot.lane.b32.xlu1 %v3772_v14, %s3000_s13 }
 0x851   :  { %1679 = vrot.lane.b32.xlu0 %v1617_v15, %s3001_s20  ;;  %1677 = vrot.lane.b32.xlu1 %v3795_v12, %s3001_s20 }
 0x855   :  { %1675 = vrot.lane.b32.xlu0 %v1615_v13, %s3001_s20  ;;  %1673 = vrot.lane.b32.xlu1 %v3803_v3, %s3001_s20 }
 0x859   :  { %1851 = vperm.xlu1 %2890, %v3844_v37   ;;  %1846 = vperm.xlu0 %2891, %v3842_v21  }
 0x85d   :  { %1841 = vperm.xlu1 %2890, %v3850_v40   ;;  %1831 = vperm.xlu0 %2891, %v3848_v52  }
 0x861   :  { %1836 = vperm.xlu1 %2890, %v3854_v63   ;;  %1821 = vperm.xlu0 %2891, %v3829_v53  }
 0x865   :  { %1826 = vperm.xlu1 %2890, %v3858_v11   ;;  %2018 = vrot.lane.b32.xlu0 %v3829_v53, %s3016_s30 }
 0x866   :  { %2892 = vset.pattern.permute.xlu0 %v3005_v54 }
 0x869   :  { %2020 = vrot.lane.b32.xlu1 %v1812_v46, %s3016_s30 }
 0x86a   :  { %2893 = vset.pattern.permute.xlu1 %v3005_v54 }
 0x86d   :  { %2022 = vrot.lane.b32.xlu1 %v3858_v11, %s3016_s30 }
 0x883   :  { %v1654_v5 = vpop.permute.xlu1 %1653  ;;  %v1656_v56 = vpop.permute.xlu0 %1655 }
 0x884   :  { %v1683_v33 = vsel %vm54_vm0, %v1654_v5, %v1656_v56  ;;  %v1798_v5 = vld [vmem:[#allocation3 + $0x18] sm:$0xff] }
 0x885   :  { %1701 = vst [vmem:[#allocation2 + $0xb0] sm:$0xff] %v1683_v33 }
 0x887   :  { %v1658_v19 = vpop.permute.xlu1 %1657  ;;  %v1660_v1 = vpop.permute.xlu0 %1659 }
 0x888   :  { %v1684_v51 = vsel %vm54_vm0, %v1658_v19, %v1660_v1  ;;  %v1802_v19 = vld [vmem:[#allocation3 + $0x98] sm:$0xff] }
 0x889   :  { %1702 = vst [vmem:[#allocation2 + $0xc0] sm:$0xff] %v1684_v51  ;;  %v1804_v1 = vld [vmem:[#allocation3 + $0xd8] sm:$0xff] }
 0x88b   :  { %v1662_v17 = vpop.permute.xlu1 %1661  ;;  %v1664_v24 = vpop.permute.xlu0 %1663 }
 0x88c   :  { %v1685_v22 = vsel %vm54_vm0, %v1662_v17, %v1664_v24  ;;  %v1808_v17 = vld [vmem:[#allocation3 + $0x158] sm:$0xff] }
 0x88d   :  { %1703 = vst [vmem:[#allocation2 + $0xd0] sm:$0xff] %v1685_v22  ;;  %v1810_v24 = vld [vmem:[#allocation3 + $0x198] sm:$0xff] }
 0x88f   :  { %v1666_v16 = vpop.permute.xlu1 %1665  ;;  %v1668_v10 = vpop.permute.xlu0 %1667 }
 0x890   :  { %v1686_v8 = vsel %vm54_vm0, %v1666_v16, %v1668_v10 }
 0x891   :  { %1704 = vst [vmem:[#allocation2 + $0xe0] sm:$0xff] %v1686_v8 }
 0x893   :  { %v1670_v2 = vpop.permute.xlu1 %1669  ;;  %v1672_v20 = vpop.permute.xlu0 %1671 }
 0x894   :  { %v1687_v44 = vsel %vm54_vm0, %v1670_v2, %v1672_v20 }
 0x895   :  { %1705 = vst [vmem:[#allocation2 + $0xf0] sm:$0xff] %v1687_v44  ;;  %1870 = vmatpush1.msra.mxu1 %v1687_v44 }
 0x896   :  { %1871 = vmatprep.subr.mxu1 %v3002_v4 }
 0x897   :  { %v1650_v60 = vpop.permute.xlu1 %1649  ;;  %v1652_v0 = vpop.permute.xlu0 %1651  ;;  %1872 = vmatpush1.msra.mxu1 %v1686_v8 }
 0x898   :  { %v1682_v28 = vsel %vm54_vm0, %v1650_v60, %v1652_v0  ;;  %1873 = vmatprep.subr.mxu1 %v3002_v4 }
 0x899   :  { %1700 = vst [vmem:[#allocation2 + $0xa0] sm:$0xff] %v1682_v28  ;;  %1874 = vmatpush1.msra.mxu1 %v1685_v22 }
 0x89a   :  { %1875 = vmatprep.subr.mxu1 %v3002_v4 }
 0x89b   :  { %v1646_v50 = vpop.permute.xlu1 %1645  ;;  %v1648_v30 = vpop.permute.xlu0 %1647  ;;  %1876 = vmatpush1.msra.mxu1 %v1684_v51  ;;  %v1806_v51 = vld [vmem:[#allocation3 + $0x118] sm:$0xff] }
 0x89c   :  { %v1681_v26 = vsel %vm54_vm0, %v1646_v50, %v1648_v30  ;;  %1877 = vmatprep.subr.mxu1 %v3002_v4 }
 0x89d   :  { %1699 = vst [vmem:[#allocation2 + $0x90] sm:$0xff] %v1681_v26  ;;  %1878 = vmatpush1.msra.mxu1 %v1683_v33  ;;  %v1800_v33 = vld [vmem:[#allocation3 + $0x58] sm:$0xff] }
 0x89e   :  { %1879 = vmatprep.subr.mxu1 %v3002_v4 }
 0x89f   :  { %v1729_v61 = vpop.permute.xlu1 %1728  ;;  %v1731_v58 = vpop.permute.xlu0 %1730  ;;  %1880 = vmatpush1.msra.mxu1 %v1682_v28 }
 0x8a0   :  { %v1749_v32 = vsel %vm643_vm4, %v1729_v61, %v1731_v58  ;;  %1881 = vmatprep.subr.mxu1 %v3002_v4 }
 0x8a1   :  { %1767 = vst [vmem:[#allocation2 + $0x170] sm:$0xff] %v1749_v32  ;;  %1882 = vmatpush1.msra.mxu1 %v1681_v26 }
 0x8a2   :  { %1883 = vmatprep.subr.mxu1 %v3002_v4 }
 0x8a3   :  { %v1725_v25 = vpop.permute.xlu1 %1724  ;;  %v1727_v43 = vpop.permute.xlu0 %1726  ;;  %1884 = vmatpush1.msra.mxu1 %v3795_v12 }
 0x8a4   :  { %v1748_v9 = vsel %vm643_vm4, %v1725_v25, %v1727_v43  ;;  %1885 = vmatprep.subr.mxu1 %v3002_v4 }
 0x8a5   :  { %1766 = vst [vmem:[#allocation2 + $0x160] sm:$0xff] %v1748_v9  ;;  %1886 = vmatpush1.msra.mxu1 %v3803_v3 }
 0x8a6   :  { %1887 = vmatprep.subr.mxu1 %v3002_v4 }
 0x8a7   :  { %v1721_v57 = vpop.permute.xlu1 %1720  ;;  %v1723_v7 = vpop.permute.xlu0 %1722  ;;  %1888 = vmatpush1.msra.mxu1 %v3732_v41 }
 0x8a8   :  { %v1747_v49 = vsel %vm643_vm4, %v1721_v57, %v1723_v7  ;;  %1889 = vmatprep.subr.mxu1 %v3002_v4 }
 0x8a9   :  { %1765 = vst [vmem:[#allocation2 + $0x150] sm:$0xff] %v1747_v49  ;;  %1890 = vmatpush1.msra.mxu1 %v3749_v31 }
 0x8aa   :  { %1891 = vmatprep.subr.mxu1 %v3002_v4 }
 0x8ab   :  { %v1733_v12 = vpop.permute.xlu1 %1732  ;;  %v1735_v18 = vpop.permute.xlu0 %1734  ;;  %1892 = vmatpush1.msra.mxu1 %v3736_v29 }
 0x8ac   :  { %v1750_v36 = vsel %vm643_vm4, %v1733_v12, %v1735_v18  ;;  %1893 = vmatprep.subr.mxu1 %v3002_v4 }
 0x8ad   :  { %1768 = vst [vmem:[#allocation2 + $0x180] sm:$0xff] %v1750_v36  ;;  %1894 = vmatpush1.msra.mxu1 %v3723_v39 }
 0x8ae   :  { %1895 = vmatprep.subr.mxu1 %v3002_v4 }
 0x8af   :  { %v1737_v41 = vpop.permute.xlu1 %1736  ;;  %v1739_v35 = vpop.permute.xlu0 %1738  ;;  %1896 = vmatpush1.msra.mxu1 %v3745_v59 }
 0x8b0   :  { %v1751_v31 = vsel %vm643_vm4, %v1737_v41, %v1739_v35  ;;  %1897 = vmatprep.subr.mxu1 %v3002_v4 }
 0x8b1   :  { %1769 = vst [vmem:[#allocation2 + $0x190] sm:$0xff] %v1751_v31  ;;  %1898 = vmatpush1.msra.mxu1 %v3758_v6 }
 0x8b2   :  { %1899 = vmatprep.subr.mxu1 %v3002_v4 }
 0x8b3   :  { %v1741_v29 = vpop.permute.xlu1 %1740  ;;  %v1743_v34 = vpop.permute.xlu0 %1742  ;;  %1900 = vmatpush1.msra.mxu1 %v3772_v14 }
 0x8b4   :  { %v1752_v39 = vsel %vm643_vm4, %v1741_v29, %v1743_v34  ;;  %1911 = vmatprep.subr.mxu1 %v3002_v4 }
 0x8b5   :  { %1770 = vst [vmem:[#allocation2 + $0x1a0] sm:$0xff] %v1752_v39  ;;  %1912 = vmatpush2.msra.mxu1 %v1752_v39 }
 0x8b6   :  { %1913 = vmatprep.subr.mxu1 %v3002_v4 }
 0x8b7   :  { %v1717_v59 = vpop.permute.xlu1 %1716  ;;  %v1719_v3 = vpop.permute.xlu0 %1718  ;;  %1914 = vmatpush2.msra.mxu1 %v1751_v31 }
 0x8b8   :  { %v1746_v47 = vsel %vm643_vm4, %v1717_v59, %v1719_v3  ;;  %1915 = vmatprep.subr.mxu1 %v3002_v4 }
 0x8b9   :  { %1764 = vst [vmem:[#allocation2 + $0x140] sm:$0xff] %v1746_v47  ;;  %1916 = vmatpush2.msra.mxu1 %v1750_v36 }
 0x8ba   :  { %1917 = vmatprep.subr.mxu1 %v3002_v4 }
 0x8bb   :  { %v1713_v6 = vpop.permute.xlu1 %1712  ;;  %v1715_v14 = vpop.permute.xlu0 %1714  ;;  %1918 = vmatpush2.msra.mxu1 %v1749_v32 }
 0x8bc   :  { %v1745_v55 = vsel %vm643_vm4, %v1713_v6, %v1715_v14  ;;  %1919 = vmatprep.subr.mxu1 %v3002_v4  ;;  %v1813_v14 = vld [vmem:[#allocation3 + $0x68] sm:$0xff] }
 0x8bd   :  { %1763 = vst [vmem:[#allocation2 + $0x130] sm:$0xff] %v1745_v55  ;;  %1920 = vmatpush2.msra.mxu1 %v1748_v9 }
 0x8be   :  { %1921 = vmatprep.subr.mxu1 %v3002_v4 }
 0x8bf   :  { %v1709_v62 = vpop.permute.xlu1 %1708  ;;  %v1711_v27 = vpop.permute.xlu0 %1710  ;;  %1922 = vmatpush2.msra.mxu1 %v1747_v49 }
 0x8c0   :  { %v1744_v42 = vsel %vm643_vm4, %v1709_v62, %v1711_v27  ;;  %1923 = vmatprep.subr.mxu1 %v3002_v4  ;;  %v1815_v62 = vld [vmem:[#allocation3 + $0xe8] sm:$0xff] }
 0x8c1   :  { %1762 = vst [vmem:[#allocation2 + $0x120] sm:$0xff] %v1744_v42  ;;  %1924 = vmatpush2.msra.mxu1 %v1746_v47  ;;  %v1816_v27 = vld [vmem:[#allocation3 + $0x128] sm:$0xff] }
 0x8c2   :  { %1925 = vmatprep.subr.mxu1 %v3002_v4 }
 0x8c3   :  { %v1678_v48 = vpop.permute.xlu1 %1677  ;;  %v1680_v13 = vpop.permute.xlu0 %1679  ;;  %1926 = vmatpush2.msra.mxu1 %v1745_v55  ;;  %v1814_v55 = vld [vmem:[#allocation3 + $0xa8] sm:$0xff] }
 0x8c4   :  { %v1689_v15 = vsel %vm54_vm0, %v1678_v48, %v1680_v13  ;;  %1927 = vmatprep.subr.mxu1 %v3002_v4  ;;  %v1818_v48 = vld [vmem:[#allocation3 + $0x1a8] sm:$0xff] }
 0x8c5   :  { %1707 = vst [vmem:[#allocation2 + $0x110] sm:$0xff] %v1689_v15  ;;  %1928 = vmatpush2.msra.mxu1 %v1744_v42  ;;  %v1817_v42 = vld [vmem:[#allocation3 + $0x168] sm:$0xff] }
 0x8c6   :  { %1929 = vmatprep.subr.mxu1 %v3002_v4 }
 0x8c7   :  { %v1674_v45 = vpop.permute.xlu1 %1673  ;;  %v1676_v46 = vpop.permute.xlu0 %1675  ;;  %1930 = vmatpush2.msra.mxu1 %v1689_v15 }
 0x8c8   :  { %v1688_v56 = vsel %vm54_vm0, %v1674_v45, %v1676_v46  ;;  %1931 = vmatprep.subr.mxu1 %v3002_v4 }
 0x8c9   :  { %1706 = vst [vmem:[#allocation2 + $0x100] sm:$0xff] %v1688_v56  ;;  %1932 = vmatpush2.msra.mxu1 %v1688_v56 }
 0x8ca   :  { %1934 = vmatmul.mubr.f32.vlgmr.msra.gmra.mxu1 %v1798_v5 }
 0x8cb   :  { %2660 = vmatprep.mubr.msk.f32.mxu1 %vm1854_vm8, %v3858_v11 }
 0x8ce   :  { %1939 = vmatmul.mubr.f32.gmra.mxu1 %v1800_v33 }
 0x8cf   :  { %2661 = vmatprep.mubr.msk.f32.mxu1 %vm1854_vm8, %v3848_v52 }
 0x8d2   :  { %1944 = vmatmul.mubr.f32.gmra.mxu1 %v1802_v19 }
 0x8d3   :  { %2662 = vmatprep.mubr.msk.f32.mxu1 %vm1854_vm8, %v3854_v63 }
 0x8d4   :  { %v1852_v22 = vpop.permute.xlu1 %1851  ;;  %v1847_v16 = vpop.permute.xlu0 %1846 }
 0x8d6   :  { %1949 = vmatmul.mubr.f32.gmra.mxu1 %v1804_v1 }
 0x8d7   :  { %2663 = vmatprep.mubr.msk.f32.mxu1 %vm1854_vm8, %v3850_v40 }
 0x8d8   :  { %v1842_v10 = vpop.permute.xlu1 %1841  ;;  %v1832_v8 = vpop.permute.xlu0 %1831 }
 0x8da   :  { %1954 = vmatmul.mubr.f32.gmra.mxu1 %v1806_v51 }
 0x8db   :  { %2664 = vmatprep.mubr.msk.f32.mxu1 %vm1854_vm8, %v3842_v21 }
 0x8dc   :  { %v1837_v2 = vpop.permute.xlu1 %1836  ;;  %v1822_v20 = vpop.permute.xlu0 %1821 }
 0x8de   :  { %1959 = vmatmul.mubr.f32.gmra.mxu1 %v1808_v17 }
 0x8df   :  { %2665 = vmatprep.mubr.msk.f32.mxu1 %vm1854_vm8, %v3844_v37 }
 0x8e0   :  { %v1827_v50 = vpop.permute.xlu1 %1826  ;;  %v2019_v15 = vpop.permute.xlu0 %2018 }
 0x8e2   :  { %1964 = vmatmul.mubr.f32.gmra.mxu1 %v1810_v24 }
 0x8e4   :  { %v2021_v13 = vpop.permute.xlu1 %2020 }
 0x8e8   :  { %v2023_v45 = vpop.permute.xlu1 %2022 }
 0x98a   :  { %v1935_v44 = vpop.f32.mrf.mxu1 }
 0x98b   :  { %v3933_v60 = vadd.f32 %v1935_v44, %v1822_v20 }
 0x98c   :  { %v1937_v0 = vpop.f32.mrf.mxu1 }
 0x98d   :  { %1969 = vadd.xlane.f32.xlu0 %v3933_v60  ;;  %v1983_v28 = vmul.f32 %v3933_v60, %v3933_v60 }
 0x98e   :  { %v1940_v30 = vpop.f32.mrf.mxu1 }
 0x98f   :  { %v3938_v26 = vadd.f32 %v1940_v30, %v1827_v50  ;;  %1990 = vadd.xlane.f32.xlu1 %v1983_v28 }
 0x990   :  { %v1942_v61 = vpop.f32.mrf.mxu1 }
 0x991   :  { %1971 = vadd.xlane.f32.xlu0 %v3938_v26  ;;  %v1984_v58 = vmul.f32 %v3938_v26, %v3938_v26 }
 0x992   :  { %v1945_v32 = vpop.f32.mrf.mxu1 }
 0x993   :  { %v3943_v25 = vadd.f32 %v1945_v32, %v1832_v8  ;;  %1992 = vadd.xlane.f32.xlu1 %v1984_v58 }
 0x994   :  { %v1947_v43 = vpop.f32.mrf.mxu1 }
 0x995   :  { %1973 = vadd.xlane.f32.xlu0 %v3943_v25  ;;  %v1985_v9 = vmul.f32 %v3943_v25, %v3943_v25 }
 0x996   :  { %v1950_v57 = vpop.f32.mrf.mxu1 }
 0x997   :  { %v3948_v7 = vadd.f32 %v1950_v57, %v1837_v2  ;;  %1994 = vadd.xlane.f32.xlu1 %v1985_v9  ;;  %v2047_v9 = vsel %vm2046_vm9, %v2019_v15, %v2021_v13 }
 0x998   :  { %v1952_v49 = vpop.f32.mrf.mxu1 }
 0x999   :  { %1975 = vadd.xlane.f32.xlu0 %v3948_v7  ;;  %v1986_v12 = vmul.f32 %v3948_v7, %v3948_v7 }
 0x99a   :  { %v1955_v18 = vpop.f32.mrf.mxu1 }
 0x99b   :  { %v3953_v36 = vadd.f32 %v1955_v18, %v1842_v10  ;;  %1996 = vadd.xlane.f32.xlu1 %v1986_v12 }
 0x99c   :  { %v1957_v41 = vpop.f32.mrf.mxu1 }
 0x99d   :  { %1977 = vadd.xlane.f32.xlu0 %v3953_v36  ;;  %v1987_v35 = vmul.f32 %v3953_v36, %v3953_v36 }
 0x99e   :  { %v1960_v31 = vpop.f32.mrf.mxu1 }
 0x99f   :  { %v3958_v29 = vadd.f32 %v1960_v31, %v1847_v16  ;;  %1998 = vadd.xlane.f32.xlu1 %v1987_v35 }
 0x9a0   :  { %v1962_v34 = vpop.f32.mrf.mxu1 }
 0x9a1   :  { %1979 = vadd.xlane.f32.xlu0 %v3958_v29  ;;  %v1988_v39 = vmul.f32 %v3958_v29, %v3958_v29 }
 0x9a2   :  { %v1965_v59 = vpop.f32.mrf.mxu1 }
 0x9a3   :  { %v3963_v3 = vadd.f32 %v1965_v59, %v1852_v22  ;;  %2000 = vadd.xlane.f32.xlu1 %v1988_v39 }
 0x9a4   :  { %v1967_v47 = vpop.f32.mrf.mxu1 }
 0x9a5   :  { %v1989_v6 = vmul.f32 %v3963_v3, %v3963_v3 }
 0x9a7   :  { %2002 = vadd.xlane.f32.xlu0 %v1989_v6  ;;  %1981 = vadd.xlane.f32.xlu1 %v3963_v3 }
 0x9b8   :  { %2026 = vrot.lane.b32.xlu1 %v3848_v52, %s3016_s30 }
 0x9bc   :  { %2030 = vrot.lane.b32.xlu1 %v3854_v63, %s3016_s30 }
 0x9bd   :  { %2024 = vrot.lane.b32.xlu0 %v1813_v14, %s3016_s30 }
 0x9c0   :  { %2034 = vrot.lane.b32.xlu1 %v3850_v40, %s3016_s30 }
 0x9c1   :  { %2028 = vrot.lane.b32.xlu0 %v1814_v55, %s3016_s30 }
 0x9c4   :  { %2038 = vrot.lane.b32.xlu1 %v3842_v21, %s3016_s30 }
 0x9c5   :  { %2032 = vrot.lane.b32.xlu0 %v1815_v62, %s3016_s30 }
 0x9c8   :  { %2042 = vrot.lane.b32.xlu1 %v3844_v37, %s3016_s30 }
 0x9c9   :  { %2036 = vrot.lane.b32.xlu0 %v1816_v27, %s3016_s30 }
 0x9cd   :  { %2040 = vrot.lane.b32.xlu0 %v1817_v42, %s3016_s30 }
 0x9d1   :  { %2044 = vrot.lane.b32.xlu0 %v1818_v48, %s3016_s30 }
 0xa16   :  { %v1970_v46 = vpop.xlane.xlu0 %1969 }
 0xa18   :  { %v1991_v5 = vpop.xlane.xlu1 %1990 }
 0xa19   :  { %v2004_v43 = vsel %vm275_vm3, %v1970_v46, %v1991_v5 }
 0xa1a   :  { %v1972_v56 = vpop.xlane.xlu0 %1971 }
 0xa1c   :  { %v1993_v33 = vpop.xlane.xlu1 %1992 }
 0xa1d   :  { %v2005_v32 = vsel %vm275_vm3, %v1972_v56, %v1993_v33 }
 0xa1e   :  { %v1974_v19 = vpop.xlane.xlu0 %1973 }
 0xa20   :  { %v1995_v1 = vpop.xlane.xlu1 %1994 }
 0xa21   :  { %v2006_v30 = vsel %vm275_vm3, %v1974_v19, %v1995_v1 }
 0xa22   :  { %v1976_v51 = vpop.xlane.xlu0 %1975 }
 0xa24   :  { %v1997_v17 = vpop.xlane.xlu1 %1996 }
 0xa25   :  { %v2007_v50 = vsel %vm275_vm3, %v1976_v51, %v1997_v17 }
 0xa26   :  { %v1978_v24 = vpop.xlane.xlu0 %1977 }
 0xa28   :  { %v1999_v22 = vpop.xlane.xlu1 %1998 }
 0xa29   :  { %v2008_v0 = vsel %vm275_vm3, %v1978_v24, %v1999_v22 }
 0xa2a   :  { %v1980_v16 = vpop.xlane.xlu0 %1979 }
 0xa2c   :  { %v2001_v10 = vpop.xlane.xlu1 %2000 }
 0xa2d   :  { %v2009_v44 = vsel %vm275_vm3, %v1980_v16, %v2001_v10 }
 0xa30   :  { %v1982_v8 = vpop.xlane.xlu1 %1981  ;;  %v2003_v2 = vpop.xlane.xlu0 %2002 }
 0xa31   :  { %v2010_v20 = vsel %vm275_vm3, %v1982_v8, %v2003_v2 }
 0xa32   :  { %2785 = vmatpush3.msra.mxu0 %v2010_v20 }
 0xa33   :  { %2786 = vmatprep.subr.mxu0 %v3002_v4 }
 0xa34   :  { %2787 = vmatpush3.msra.mxu0 %v2009_v44  ;;  %v2025_v28 = vpop.permute.xlu0 %2024  ;;  %v2027_v61 = vpop.permute.xlu1 %2026 }
 0xa35   :  { %2788 = vmatprep.subr.mxu0 %v3002_v4  ;;  %v2048_v12 = vsel %vm2046_vm9, %v2023_v45, %v2025_v28 }
 0xa36   :  { %2789 = vmatpush3.msra.mxu0 %v2008_v0 }
 0xa37   :  { %2790 = vmatprep.subr.mxu0 %v3002_v4 }
 0xa38   :  { %2791 = vmatpush3.msra.mxu0 %v2007_v50  ;;  %v2029_v58 = vpop.permute.xlu0 %2028  ;;  %v2031_v57 = vpop.permute.xlu1 %2030 }
 0xa39   :  { %2792 = vmatprep.subr.mxu0 %v3002_v4  ;;  %v2049_v38 = vsel %vm2046_vm9, %v2027_v61, %v2029_v58  ;;  %v3017_v61 = vmov 90   ;;  %v3018_v58 = vmov 89  }
 0xa3a   :  { %2793 = vmatpush3.msra.mxu0 %v2006_v30 }
 0xa3b   :  { %2794 = vmatprep.subr.mxu0 %v3002_v4 }
 0xa3c   :  { %2795 = vmatpush3.msra.mxu0 %v2005_v32  ;;  %v2033_v49 = vpop.permute.xlu0 %2032  ;;  %v2035_v18 = vpop.permute.xlu1 %2034 }
 0xa3d   :  { %2796 = vmatprep.subr.mxu0 %v3002_v4  ;;  %v2050_v35 = vsel %vm2046_vm9, %v2031_v57, %v2033_v49 }
 0xa3e   :  { %2797 = vmatpush3.msra.mxu0 %v2004_v43 }
 0xa3f   :  { %2799 = vmatmul.mubr.msk.f32.vlgmr.msra.gmra.mxu0 %vm2054_vm10, %v2047_v9  ;;  %2542 = vmatprep.subr.mxu0 %v3002_v4 }
 0xa40   :  { %2801 = vmatprep.mubr.msk.f32.mxu0 %vm3012_vm6, %v3002_v4  ;;  %v2037_v41 = vpop.permute.xlu0 %2036  ;;  %v2039_v31 = vpop.permute.xlu1 %2038 }
 0xa41   :  { %v2051_v39 = vsel %vm2046_vm9, %v2035_v18, %v2037_v41 }
 0xa43   :  { %2802 = vmatmul.mubr.msk.f32.gmra.mxu0 %vm2054_vm10, %v2048_v12 }
 0xa44   :  { %2804 = vmatprep.mubr.msk.f32.mxu0 %vm3012_vm6, %v3002_v4  ;;  %v2041_v34 = vpop.permute.xlu0 %2040  ;;  %v2043_v47 = vpop.permute.xlu1 %2042 }
 0xa45   :  { %v2052_v59 = vsel %vm2046_vm9, %v2039_v31, %v2041_v34 }
 0xa47   :  { %2805 = vmatmul.mubr.msk.f32.gmra.mxu0 %vm2054_vm10, %v2049_v38 }
 0xa48   :  { %2807 = vmatprep.mubr.msk.f32.mxu0 %vm3012_vm6, %v3002_v4  ;;  %v2045_v6 = vpop.permute.xlu0 %2044 }
 0xa49   :  { %v2053_v14 = vsel %vm2046_vm9, %v2043_v47, %v2045_v6 }
 0xa4b   :  { %2808 = vmatmul.mubr.msk.f32.gmra.mxu0 %vm2054_vm10, %v2050_v35 }
 0xa4c   :  { %2810 = vmatprep.mubr.msk.f32.mxu0 %vm3012_vm6, %v3002_v4 }
 0xa4f   :  { %2811 = vmatmul.mubr.msk.f32.gmra.mxu0 %vm2054_vm10, %v2051_v39 }
 0xa50   :  { %2813 = vmatprep.mubr.msk.f32.mxu0 %vm3012_vm6, %v3002_v4 }
 0xa53   :  { %2814 = vmatmul.mubr.msk.f32.gmra.mxu0 %vm2054_vm10, %v2052_v59 }
 0xa54   :  { %2816 = vmatprep.mubr.msk.f32.mxu0 %vm3012_vm6, %v3002_v4 }
 0xa57   :  { %2817 = vmatmul.mubr.msk.f32.gmra.mxu0 %vm2054_vm10, %v2053_v14 }
 0xaff   :  { %v2135_v55 = vpop.f32.mrf.mxu0 }
 0xb00   :  { %v4031_v62 = vmul.f32 0.0015625, %v2135_v55 }
 0xb01   :  { %v2800_v27 = vpop.f32.mrf.mxu0 }
 0xb02   :  { %v2176_v42 = vmul.f32 %v4031_v62, %v4031_v62 }
 0xb03   :  { %v2140_v48 = vpop.f32.mrf.mxu0 }
 0xb04   :  { %v4035_v13 = vmul.f32 0.0015625, %v2140_v48  ;;  %2190 = vrot.lane.b32.xlu0 %v2176_v42, %s3006_s28 }
 0xb05   :  { %v2803_v15 = vpop.f32.mrf.mxu0 }
 0xb06   :  { %v2177_v45 = vmul.f32 %v4035_v13, %v4035_v13 }
 0xb07   :  { %v2145_v46 = vpop.f32.mrf.mxu0 }
 0xb08   :  { %2192 = vrot.lane.b32.xlu1 %v2177_v45, %s3006_s28  ;;  %v4056_v28 = vmul.f32 0.0015625, %v2145_v46 }
 0xb09   :  { %v2806_v5 = vpop.f32.mrf.mxu0 }
 0xb0a   :  { %v2178_v30 = vmul.f32 %v4056_v28, %v4056_v28 }
 0xb0b   :  { %v2150_v56 = vpop.f32.mrf.mxu0 }
 0xb0c   :  { %v4043_v22 = vmul.f32 0.0015625, %v2150_v56 }
 0xb0d   :  { %v2809_v33 = vpop.f32.mrf.mxu0 }
 0xb0e   :  { %v2179_v20 = vmul.f32 %v4043_v22, %v4043_v22 }
 0xb0f   :  { %v2155_v19 = vpop.f32.mrf.mxu0 }
 0xb10   :  { %v2173_v44 = vmul.f32 0.0015625, %v2155_v19 }
 0xb11   :  { %v2812_v1 = vpop.f32.mrf.mxu0 }
 0xb12   :  { %v2180_v50 = vmul.f32 %v2173_v44, %v2173_v44 }
 0xb13   :  { %v2160_v51 = vpop.f32.mrf.mxu0 }
 0xb14   :  { %v4041_v17 = vmul.f32 0.0015625, %v2160_v51 }
 0xb15   :  { %v2815_v24 = vpop.f32.mrf.mxu0 }
 0xb16   :  { %v2181_v16 = vmul.f32 %v4041_v17, %v4041_v17 }
 0xb17   :  { %v2165_v10 = vpop.f32.mrf.mxu0 }
 0xb18   :  { %v4047_v8 = vmul.f32 0.0015625, %v2165_v10  ;;  %2200 = vrot.lane.b32.xlu0 %v2181_v16, %s3006_s28 }
 0xb19   :  { %v2818_v2 = vpop.f32.mrf.mxu0 }
 0xb1a   :  { %v2182_v0 = vmul.f32 %v4047_v8, %v4047_v8 }
 0xb1c   :  { %2196 = vrot.lane.b32.xlu0 %v2179_v20, %s3006_s28  ;;  %2202 = vrot.lane.b32.xlu1 %v2182_v0, %s3006_s28 }
 0xb20   :  { %2232 = vperm.xlu0 %2892, %v4035_v13   ;;  %2198 = vrot.lane.b32.xlu1 %v2180_v50, %s3006_s28 }
 0xb24   :  { %2257 = vperm.xlu0 %2892, %v4047_v8   ;;  %2194 = vrot.lane.b32.xlu1 %v2178_v30, %s3006_s28 }
 0xb28   :  { %2247 = vperm.xlu0 %2892, %v2173_v44   ;;  %2227 = vperm.xlu1 %2893, %v4031_v62  }
 0xb2c   :  { %2252 = vperm.xlu1 %2893, %v4041_v17   ;;  %2896 = vset.pattern.permute.xlu0 %v3017_v61 }
 0xb2d   :  { %2359 = vperm.xlu0 %2896, %v3829_v53  }
 0xb30   :  { %2894 = vset.pattern.permute.xlu1 %v3017_v61 }
 0xb31   :  { %2363 = vperm.xlu1 %2894, %v3858_v11   ;;  %2897 = vset.pattern.permute.xlu0 %v3018_v58 }
 0xb32   :  { %2328 = vperm.xlu0 %2897, %v3858_v11  }
 0xb35   :  { %2895 = vset.pattern.permute.xlu1 %v3018_v58 }
 0xb36   :  { %2348 = vperm.xlu1 %2895, %v3844_v37   ;;  %2324 = vperm.xlu0 %2897, %v3829_v53  }
 0xb3a   :  { %2898 = vset.pattern.permute.xlu1 %v3005_v54  ;;  %2344 = vperm.xlu0 %2897, %v3842_v21  }
 0xb3b   :  { %2242 = vperm.xlu1 %2898, %v4043_v22  }
 0xb3e   :  { %2904 = vset.pattern.permute.xlu0 %v3009_v23 }
 0xb3f   :  { %2899 = vset.pattern.permute.xlu1 %v3017_v61 }
 0xb40   :  { %2383 = vperm.xlu1 %2899, %v3844_v37  }
 0xb44   :  { %2900 = vset.pattern.permute.xlu1 %v3005_v54 }
 0xb45   :  { %2237 = vperm.xlu1 %2900, %v4056_v28  }
 0xb49   :  { %2901 = vset.pattern.permute.xlu1 %v3018_v58 }
 0xb4a   :  { %2340 = vperm.xlu1 %2901, %v3850_v40  }
 0xb4e   :  { %2902 = vset.pattern.permute.xlu1 %v3017_v61 }
 0xb4f   :  { %2379 = vperm.xlu1 %2902, %v3842_v21  }
 0xb53   :  { %2903 = vset.pattern.permute.xlu1 %v3009_v23 }
 0xb76   :  { %v2191_v53 = vpop.permute.xlu0 %2190 }
 0xb77   :  { %v2211_v11 = vsub.f32 %v4031_v62, %v2191_v53 }
 0xb79   :  { %v2218_v32 = vmax.f32 %v2211_v11, 0.0 }
 0xb7a   :  { %v2193_v43 = vpop.permute.xlu1 %2192 }
 0xb7b   :  { %v2267_v37 = vadd.f32 1e-05, %v2218_v32  ;;  %v2212_v54 = vsub.f32 %v4035_v13, %v2193_v43 }
 0xb7d   :  { %2939 = vrsqrt.f32 %v2267_v37  ;;  %v2219_v9 = vmax.f32 %v2212_v54, 0.0 }
 0xb7f   :  { %v2268_v57 = vadd.f32 1e-05, %v2219_v9 }
 0xb81   :  { %2941 = vrsqrt.f32 %v2268_v57 }
 0xb8a   :  { %v2940_v49 = vpop.eup %2939  ;;  %v2201_v12 = vpop.permute.xlu0 %2200 }
 0xb8b   :  { %2283 = vperm.xlu1 %2903, %v2940_v49   ;;  %v2216_v23 = vsub.f32 %v4041_v17, %v2201_v12 }
 0xb8d   :  { %v2223_v31 = vmax.f32 %v2216_v23, 0.0 }
 0xb8e   :  { %v2942_v38 = vpop.eup %2941  ;;  %v2203_v18 = vpop.permute.xlu1 %2202 }
 0xb8f   :  { %2288 = vperm.xlu1 %2903, %v2942_v38   ;;  %v2197_v21 = vpop.permute.xlu0 %2196  ;;  %v2217_v34 = vsub.f32 %v4047_v8, %v2203_v18  ;;  %v2272_v55 = vadd.f32 1e-05, %v2223_v31 }
 0xb90   :  { %v2214_v39 = vsub.f32 %v4043_v22, %v2197_v21 }
 0xb91   :  { %v2224_v62 = vmax.f32 %v2217_v34, 0.0 }
 0xb92   :  { %v2199_v41 = vpop.permute.xlu1 %2198  ;;  %v2221_v27 = vmax.f32 %v2214_v39, 0.0 }
 0xb93   :  { %v2215_v35 = vsub.f32 %v2173_v44, %v2199_v41  ;;  %v2273_v13 = vadd.f32 1e-05, %v2224_v62 }
 0xb94   :  { %v2270_v15 = vadd.f32 1e-05, %v2221_v27 }
 0xb95   :  { %v2222_v59 = vmax.f32 %v2215_v35, 0.0 }
 0xb96   :  { %v2195_v47 = vpop.permute.xlu1 %2194 }
 0xb97   :  { %v2271_v6 = vadd.f32 1e-05, %v2222_v59  ;;  %v2213_v14 = vsub.f32 %v4056_v28, %v2195_v47 }
 0xb99   :  { %2943 = vrsqrt.f32 %v2271_v6  ;;  %v2220_v42 = vmax.f32 %v2213_v14, 0.0 }
 0xb9a   :  { %2945 = vrsqrt.f32 %v2272_v55 }
 0xb9b   :  { %v2269_v48 = vadd.f32 1e-05, %v2220_v42  ;;  %v2233_v24 = vpop.permute.xlu0 %2232 }
 0xb9c   :  { %v2261_v30 = vsub.f32 %v3938_v26, %v2233_v24 }
 0xb9d   :  { %2947 = vrsqrt.f32 %v2269_v48 }
 0xb9e   :  { %2949 = vrsqrt.f32 %v2273_v13 }
 0xb9f   :  { %2951 = vrsqrt.f32 %v2270_v15  ;;  %v2258_v16 = vpop.permute.xlu0 %2257 }
 0xba0   :  { %v2266_v21 = vsub.f32 %v3963_v3, %v2258_v16 }
 0xba3   :  { %v2228_v19 = vpop.permute.xlu1 %2227  ;;  %v2248_v8 = vpop.permute.xlu0 %2247 }
 0xba4   :  { %v2264_v23 = vsub.f32 %v3953_v36, %v2248_v8  ;;  %v3020_v8 = vmov 96  }
 0xba6   :  { %v2944_v45 = vpop.eup %2943 }
 0xba7   :  { %2303 = vperm.xlu1 %2903, %v2944_v45   ;;  %v2946_v46 = vpop.eup %2945  ;;  %v2253_v1 = vpop.permute.xlu1 %2252 }
 0xba8   :  { %v2360_v20 = vpop.permute.xlu0 %2359  ;;  %v2265_v49 = vsub.f32 %v3958_v29, %v2253_v1 }
 0xbaa   :  { %v2948_v5 = vpop.eup %2947 }
 0xbab   :  { %2293 = vperm.xlu0 %2904, %v2948_v5   ;;  %2308 = vperm.xlu1 %2903, %v2946_v46   ;;  %v2950_v56 = vpop.eup %2949 }
 0xbac   :  { %v2952_v33 = vpop.eup %2951  ;;  %v2364_v51 = vpop.permute.xlu1 %2363 }
 0xbad   :  { %v2329_v0 = vpop.permute.xlu0 %2328 }
 0xbaf   :  { %2313 = vperm.xlu1 %2903, %v2950_v56   ;;  %2298 = vperm.xlu0 %2904, %v2952_v33  }
 0xbb1   :  { %v2349_v17 = vpop.permute.xlu1 %2348  ;;  %v2325_v50 = vpop.permute.xlu0 %2324 }
 0xbb3   :  { %2905 = vset.pattern.permute.xlu1 %v3018_v58  ;;  %2906 = vset.pattern.permute.xlu0 %v3017_v61 }
 0xbb4   :  { %2336 = vperm.xlu1 %2905, %v3854_v63   ;;  %2375 = vperm.xlu0 %2906, %v3850_v40  }
 0xbb5   :  { %v2345_v57 = vpop.permute.xlu0 %2344 }
 0xbb6   :  { %v4102_v22 = vpop.permute.xlu1 %2242 }
 0xbb7   :  { %v2263_v15 = vsub.f32 %v3948_v7, %v4102_v22 }
 0xbb8   :  { %2332 = vperm.xlu1 %2905, %v3848_v52   ;;  %2367 = vperm.xlu0 %2906, %v3848_v52   ;;  %v2260_v52 = vsub.f32 %v3933_v60, %v2228_v19 }
 0xbbb   :  { %v2384_v10 = vpop.permute.xlu1 %2383 }
 0xbbc   :  { %2907 = vset.pattern.permute.xlu1 %v3017_v61  ;;  %2908 = vset.pattern.permute.xlu0 %v3020_v8 }
 0xbbd   :  { %2371 = vperm.xlu1 %2907, %v3854_v63  }
 0xbc0   :  { %v2238_v2 = vpop.permute.xlu1 %2237 }
 0xbc1   :  { %v2262_v42 = vsub.f32 %v3943_v25, %v2238_v2 }
 0xbc5   :  { %v2341_v40 = vpop.permute.xlu1 %2340 }
 0xbca   :  { %v2380_v44 = vpop.permute.xlu1 %2379 }
 0xc06   :  { %v2284_v28 = vpop.permute.xlu1 %2283 }
 0xc07   :  { %v2316_v63 = vmul.f32 %v2284_v28, %v2260_v52 }
 0xc09   :  { %v2351_v61 = vmul.f32 %v2325_v50, %v2316_v63 }
 0xc0a   :  { %v2289_v58 = vpop.permute.xlu1 %2288 }
 0xc0b   :  { %v2386_v53 = vadd.f32 %v2360_v20, %v2351_v61  ;;  %v2317_v11 = vmul.f32 %v2289_v58, %v2261_v30 }
 0xc0d   :  { %v2393_v32 = vmul.f32 0.01, %v2386_v53  ;;  %v2352_v43 = vmul.f32 %v2329_v0, %v2317_v11 }
 0xc0f   :  { %v4106_v37 = vmax.f32 %v2386_v53, %v2393_v32  ;;  %v2387_v54 = vadd.f32 %v2364_v51, %v2352_v43 }
 0xc11   :  { %2407 = vst.msk [vmem:[#allocation2] sm:$0xff] %vm111_vm1, %v4106_v37  ;;  %v2394_v9 = vmul.f32 0.01, %v2387_v54  ;;  %2449 = vrot.lane.b32.xlu0 %v4106_v37, %s3000_s13 }
 0xc13   :  { %v2401_v60 = vmax.f32 %v2387_v54, %v2394_v9 }
 0xc15   :  { %2408 = vst.msk [vmem:[#allocation2 + $0x10] sm:$0xff] %vm111_vm1, %v2401_v60  ;;  %2451 = vrot.lane.b32.xlu1 %v2401_v60, %s3000_s13 }
 0xc22   :  { %v2304_v26 = vpop.permute.xlu1 %2303 }
 0xc23   :  { %v2320_v35 = vmul.f32 %v2304_v26, %v2264_v23 }
 0xc25   :  { %v2355_v14 = vmul.f32 %v2341_v40, %v2320_v35 }
 0xc26   :  { %v2309_v12 = vpop.permute.xlu1 %2308  ;;  %v2294_v38 = vpop.permute.xlu0 %2293 }
 0xc27   :  { %v2321_v18 = vmul.f32 %v2309_v12, %v2265_v49  ;;  %v2318_v3 = vmul.f32 %v2294_v38, %v2262_v42 }
 0xc29   :  { %v2356_v41 = vmul.f32 %v2345_v57, %v2321_v18 }
 0xc2a   :  { %v2314_v31 = vpop.permute.xlu1 %2313  ;;  %v2299_v34 = vpop.permute.xlu0 %2298 }
 0xc2b   :  { %v2391_v39 = vadd.f32 %v2380_v44, %v2356_v41  ;;  %v2322_v59 = vmul.f32 %v2314_v31, %v2266_v21  ;;  %v2319_v19 = vmul.f32 %v2299_v34, %v2263_v15 }
 0xc2d   :  { %v2398_v47 = vmul.f32 0.01, %v2391_v39  ;;  %v2357_v6 = vmul.f32 %v2349_v17, %v2322_v59 }
 0xc2f   :  { %v2405_v55 = vmax.f32 %v2391_v39, %v2398_v47  ;;  %v2392_v62 = vadd.f32 %v2384_v10, %v2357_v6  ;;  %v2337_v27 = vpop.permute.xlu1 %2336  ;;  %v2376_v29 = vpop.permute.xlu0 %2375  ;;  %v2534_v10 = vld [vmem:[#allocation3 + $0x38] sm:$0xf]  ;;  %v2506_v47 = vld [vmem:[#allocation2 + $0x10] sm:$0xff] }
 0xc30   :  { %v2390_v48 = vadd.f32 %v2376_v29, %v2355_v14  ;;  %v2354_v1 = vmul.f32 %v2337_v27, %v2319_v19  ;;  %2673 = vmatprep.mubr.msk.f32.mxu0 %vm54_vm0, %v2534_v10  ;;  %v2505_v14 = vld [vmem:[#allocation2] sm:$0xff] }
 0xc31   :  { %2412 = vst.msk [vmem:[#allocation2 + $0x50] sm:$0xff] %vm111_vm1, %v2405_v55  ;;  %v2399_v36 = vmul.f32 0.01, %v2392_v62  ;;  %2431 = vrot.lane.b32.xlu0 %v2405_v55, %s3001_s20 }
 0xc32   :  { %v2397_v13 = vmul.f32 0.01, %v2390_v48 }
 0xc33   :  { %v2406_v45 = vmax.f32 %v2392_v62, %v2399_v36  ;;  %v2333_v46 = vpop.permute.xlu1 %2332  ;;  %v2368_v5 = vpop.permute.xlu0 %2367 }
 0xc34   :  { %v2404_v56 = vmax.f32 %v2390_v48, %v2397_v13  ;;  %v2353_v33 = vmul.f32 %v2333_v46, %v2318_v3  ;;  %v2533_v46 = vld [vmem:[#allocation3 + $0x30] sm:$0xf] }
 0xc35   :  { %2413 = vst.msk [vmem:[#allocation2 + $0x60] sm:$0xff] %vm111_vm1, %v2406_v45  ;;  %2433 = vrot.lane.b32.xlu1 %v2406_v45, %s3001_s20 }
 0xc36   :  { %2411 = vst.msk [vmem:[#allocation2 + $0x40] sm:$0xff] %vm111_vm1, %v2404_v56  ;;  %v2388_v25 = vadd.f32 %v2368_v5, %v2353_v33 }
 0xc38   :  { %v2395_v51 = vmul.f32 0.01, %v2388_v25  ;;  %v2372_v17 = vpop.permute.xlu1 %2371  ;;  %v2510_v23 = vld [vmem:[#allocation2 + $0x50] sm:$0xff] }
 0xc39   :  { %v2389_v24 = vadd.f32 %v2372_v17, %v2354_v1  ;;  %2429 = vrot.lane.b32.xlu1 %v2404_v56, %s3001_s20 }
 0xc3a   :  { %v2402_v7 = vmax.f32 %v2388_v25, %v2395_v51 }
 0xc3b   :  { %v2396_v22 = vmul.f32 0.01, %v2389_v24 }
 0xc3c   :  { %2409 = vst.msk [vmem:[#allocation2 + $0x20] sm:$0xff] %vm111_vm1, %v2402_v7  ;;  %v2511_v38 = vld [vmem:[#allocation2 + $0x60] sm:$0xff] }
 0xc3d   :  { %v2403_v16 = vmax.f32 %v2389_v24, %v2396_v22  ;;  %2425 = vrot.lane.b32.xlu1 %v2402_v7, %s3001_s20  ;;  %v2509_v41 = vld [vmem:[#allocation2 + $0x40] sm:$0xff] }
 0xc3f   :  { %2410 = vst.msk [vmem:[#allocation2 + $0x30] sm:$0xff] %vm111_vm1, %v2403_v16  ;;  %2427 = vrot.lane.b32.xlu0 %v2403_v16, %s3001_s20 }
 0xc41   :  { %2421 = vrot.lane.b32.xlu1 %v4106_v37, %s3001_s20 }
 0xc43   :  { %2423 = vrot.lane.b32.xlu0 %v2401_v60, %s3001_s20  ;;  %v2507_v39 = vld [vmem:[#allocation2 + $0x20] sm:$0xff] }
 0xc45   :  { %2487 = vrot.lane.b32.xlu1 %v2405_v55, %s3019_s3 }
 0xc46   :  { %v2508_v31 = vld [vmem:[#allocation2 + $0x30] sm:$0xff] }
 0xc47   :  { %2489 = vrot.lane.b32.xlu0 %v2406_v45, %s3019_s3 }
 0xc49   :  { %2483 = vrot.lane.b32.xlu1 %v2403_v16, %s3019_s3 }
 0xc4b   :  { %2485 = vrot.lane.b32.xlu0 %v2404_v56, %s3019_s3 }
 0xc4d   :  { %2479 = vrot.lane.b32.xlu1 %v2401_v60, %s3019_s3 }
 0xc4f   :  { %2481 = vrot.lane.b32.xlu0 %v2402_v7, %s3019_s3 }
 0xc51   :  { %2461 = vrot.lane.b32.xlu1 %v2406_v45, %s3000_s13 }
 0xc53   :  { %2477 = vrot.lane.b32.xlu0 %v4106_v37, %s3019_s3 }
 0xc55   :  { %2457 = vrot.lane.b32.xlu1 %v2404_v56, %s3000_s13 }
 0xc57   :  { %2459 = vrot.lane.b32.xlu0 %v2405_v55, %s3000_s13 }
 0xc59   :  { %2453 = vrot.lane.b32.xlu1 %v2402_v7, %s3000_s13 }
 0xc5b   :  { %2455 = vrot.lane.b32.xlu0 %v2403_v16, %s3000_s13 }
 0xc5f   :  { %2537 = vperm.xlu0 %2908, %v2534_v10  }
 0xc83   :  { %v2450_v2 = vpop.permute.xlu0 %2449 }
 0xc84   :  { %2470 = vst.msk [vmem:[#allocation2 + $0xe0] sm:$0xff] %vm111_vm1, %v2450_v2 }
 0xc87   :  { %v2452_v40 = vpop.permute.xlu1 %2451 }
 0xc88   :  { %2471 = vst.msk [vmem:[#allocation2 + $0xf0] sm:$0xff] %vm111_vm1, %v2452_v40 }
 0xc8b   :  { %v2519_v44 = vld [vmem:[#allocation2 + $0xe0] sm:$0xff] }
 0xc8f   :  { %v2520_v20 = vld [vmem:[#allocation2 + $0xf0] sm:$0xff] }
 0xc90   :  { %2543 = vmatpush1.msra.mxu0 %v2520_v20 }
 0xc91   :  { %2544 = vmatprep.subr.mxu0 %v3002_v4 }
 0xc92   :  { %2545 = vmatpush1.msra.mxu0 %v2519_v44 }
 0xc93   :  { %2546 = vmatprep.subr.mxu0 %v3002_v4 }
 0xca3   :  { %v2432_v0 = vpop.permute.xlu0 %2431 }
 0xca4   :  { %2447 = vst.msk [vmem:[#allocation2 + $0xc0] sm:$0xff] %vm111_vm1, %v2432_v0 }
 0xca7   :  { %v2434_v52 = vpop.permute.xlu1 %2433 }
 0xca8   :  { %2448 = vst.msk [vmem:[#allocation2 + $0xd0] sm:$0xff] %vm111_vm1, %v2434_v52 }
 0xcab   :  { %v2430_v28 = vpop.permute.xlu1 %2429  ;;  %v2517_v61 = vld [vmem:[#allocation2 + $0xc0] sm:$0xff] }
 0xcac   :  { %2446 = vst.msk [vmem:[#allocation2 + $0xb0] sm:$0xff] %vm111_vm1, %v2430_v28 }
 0xcaf   :  { %v2426_v50 = vpop.permute.xlu1 %2425  ;;  %v2518_v63 = vld [vmem:[#allocation2 + $0xd0] sm:$0xff] }
 0xcb0   :  { %2444 = vst.msk [vmem:[#allocation2 + $0x90] sm:$0xff] %vm111_vm1, %v2426_v50  ;;  %2547 = vmatpush1.msra.mxu0 %v2518_v63 }
 0xcb1   :  { %2548 = vmatprep.subr.mxu0 %v3002_v4  ;;  %v2428_v30 = vpop.permute.xlu0 %2427 }
 0xcb2   :  { %2445 = vst.msk [vmem:[#allocation2 + $0xa0] sm:$0xff] %vm111_vm1, %v2428_v30  ;;  %2549 = vmatpush1.msra.mxu0 %v2517_v61 }
 0xcb3   :  { %v2422_v58 = vpop.permute.xlu1 %2421  ;;  %2550 = vmatprep.subr.mxu0 %v3002_v4  ;;  %v2516_v53 = vld [vmem:[#allocation2 + $0xb0] sm:$0xff] }
 0xcb4   :  { %2442 = vst.msk [vmem:[#allocation2 + $0x70] sm:$0xff] %vm111_vm1, %v2422_v58  ;;  %2551 = vmatpush1.msra.mxu0 %v2516_v53 }
 0xcb5   :  { %v2424_v11 = vpop.permute.xlu0 %2423  ;;  %2552 = vmatprep.subr.mxu0 %v3002_v4 }
 0xcb6   :  { %2443 = vst.msk [vmem:[#allocation2 + $0x80] sm:$0xff] %vm111_vm1, %v2424_v11 }
 0xcb7   :  { %v2488_v32 = vpop.permute.xlu1 %2487  ;;  %v2514_v9 = vld [vmem:[#allocation2 + $0x90] sm:$0xff] }
 0xcb8   :  { %2503 = vst.msk [vmem:[#allocation2 + $0x1a0] sm:$0xff] %vm111_vm1, %v2488_v32 }
 0xcb9   :  { %v2490_v43 = vpop.permute.xlu0 %2489  ;;  %v2515_v37 = vld [vmem:[#allocation2 + $0xa0] sm:$0xff] }
 0xcba   :  { %2504 = vst.msk [vmem:[#allocation2 + $0x1b0] sm:$0xff] %vm111_vm1, %v2490_v43  ;;  %2553 = vmatpush1.msra.mxu0 %v2515_v37 }
 0xcbb   :  { %v2484_v54 = vpop.permute.xlu1 %2483  ;;  %2554 = vmatprep.subr.mxu0 %v3002_v4  ;;  %v2512_v49 = vld [vmem:[#allocation2 + $0x70] sm:$0xff] }
 0xcbc   :  { %2501 = vst.msk [vmem:[#allocation2 + $0x180] sm:$0xff] %vm111_vm1, %v2484_v54  ;;  %2555 = vmatpush1.msra.mxu0 %v2514_v9 }
 0xcbd   :  { %2556 = vmatprep.subr.mxu0 %v3002_v4  ;;  %v2486_v60 = vpop.permute.xlu0 %2485  ;;  %v2513_v26 = vld [vmem:[#allocation2 + $0x80] sm:$0xff] }
 0xcbe   :  { %2502 = vst.msk [vmem:[#allocation2 + $0x190] sm:$0xff] %vm111_vm1, %v2486_v60  ;;  %2557 = vmatpush1.msra.mxu0 %v2513_v26 }
 0xcbf   :  { %v2480_v57 = vpop.permute.xlu1 %2479  ;;  %2558 = vmatprep.subr.mxu0 %v3002_v4  ;;  %v2531_v62 = vld [vmem:[#allocation2 + $0x1a0] sm:$0xff] }
 0xcc0   :  { %2499 = vst.msk [vmem:[#allocation2 + $0x160] sm:$0xff] %vm111_vm1, %v2480_v57  ;;  %2559 = vmatpush1.msra.mxu0 %v2512_v49 }
 0xcc1   :  { %2560 = vmatprep.subr.mxu0 %v3002_v4  ;;  %v2482_v12 = vpop.permute.xlu0 %2481  ;;  %v2532_v55 = vld [vmem:[#allocation2 + $0x1b0] sm:$0xff] }
 0xcc2   :  { %2500 = vst.msk [vmem:[#allocation2 + $0x170] sm:$0xff] %vm111_vm1, %v2482_v12  ;;  %2561 = vmatpush1.msra.mxu0 %v2511_v38 }
 0xcc3   :  { %v2462_v18 = vpop.permute.xlu1 %2461  ;;  %2562 = vmatprep.subr.mxu0 %v3002_v4  ;;  %v2529_v29 = vld [vmem:[#allocation2 + $0x180] sm:$0xff] }
 0xcc4   :  { %2476 = vst.msk [vmem:[#allocation2 + $0x140] sm:$0xff] %vm111_vm1, %v2462_v18  ;;  %2563 = vmatpush1.msra.mxu0 %v2510_v23 }
 0xcc5   :  { %2564 = vmatprep.subr.mxu0 %v3002_v4  ;;  %v2478_v21 = vpop.permute.xlu0 %2477  ;;  %v2530_v27 = vld [vmem:[#allocation2 + $0x190] sm:$0xff] }
 0xcc6   :  { %2498 = vst.msk [vmem:[#allocation2 + $0x150] sm:$0xff] %vm111_vm1, %v2478_v21  ;;  %2565 = vmatpush1.msra.mxu0 %v2509_v41 }
 0xcc7   :  { %v2458_v35 = vpop.permute.xlu1 %2457  ;;  %2566 = vmatprep.subr.mxu0 %v3002_v4  ;;  %v2527_v48 = vld [vmem:[#allocation2 + $0x160] sm:$0xff] }
 0xcc8   :  { %2474 = vst.msk [vmem:[#allocation2 + $0x120] sm:$0xff] %vm111_vm1, %v2458_v35  ;;  %2567 = vmatpush1.msra.mxu0 %v2508_v31 }
 0xcc9   :  { %2568 = vmatprep.subr.mxu0 %v3002_v4  ;;  %v2460_v34 = vpop.permute.xlu0 %2459  ;;  %v2528_v42 = vld [vmem:[#allocation2 + $0x170] sm:$0xff] }
 0xcca   :  { %2475 = vst.msk [vmem:[#allocation2 + $0x130] sm:$0xff] %vm111_vm1, %v2460_v34  ;;  %2569 = vmatpush1.msra.mxu0 %v2507_v39 }
 0xccb   :  { %v2454_v59 = vpop.permute.xlu1 %2453  ;;  %2570 = vmatprep.subr.mxu0 %v3002_v4  ;;  %v2525_v3 = vld [vmem:[#allocation2 + $0x140] sm:$0xff] }
 0xccc   :  { %2472 = vst.msk [vmem:[#allocation2 + $0x100] sm:$0xff] %vm111_vm1, %v2454_v59  ;;  %2571 = vmatpush1.msra.mxu0 %v2506_v47 }
 0xccd   :  { %2572 = vmatprep.subr.mxu0 %v3002_v4  ;;  %v2456_v6 = vpop.permute.xlu0 %2455  ;;  %v2526_v36 = vld [vmem:[#allocation2 + $0x150] sm:$0xff] }
 0xcce   :  { %2473 = vst.msk [vmem:[#allocation2 + $0x110] sm:$0xff] %vm111_vm1, %v2456_v6  ;;  %2573 = vmatpush1.msra.mxu0 %v2505_v14 }
 0xccf   :  { %2582 = vmatprep.subr.mxu0 %v3002_v4  ;;  %v2523_v15 = vld [vmem:[#allocation2 + $0x120] sm:$0xff] }
 0xcd0   :  { %2583 = vmatpush2.msra.mxu0 %v2532_v55 }
 0xcd1   :  { %2584 = vmatprep.subr.mxu0 %v3002_v4  ;;  %v2524_v13 = vld [vmem:[#allocation2 + $0x130] sm:$0xff] }
 0xcd2   :  { %2585 = vmatpush2.msra.mxu0 %v2531_v62 }
 0xcd3   :  { %2586 = vmatprep.subr.mxu0 %v3002_v4  ;;  %v2521_v5 = vld [vmem:[#allocation2 + $0x100] sm:$0xff] }
 0xcd4   :  { %2587 = vmatpush2.msra.mxu0 %v2530_v27 }
 0xcd5   :  { %2588 = vmatprep.subr.mxu0 %v3002_v4  ;;  %v2522_v45 = vld [vmem:[#allocation2 + $0x110] sm:$0xff] }
 0xcd6   :  { %2589 = vmatpush2.msra.mxu0 %v2529_v29 }
 0xcd7   :  { %2590 = vmatprep.subr.mxu0 %v3002_v4 }
 0xcd8   :  { %2591 = vmatpush2.msra.mxu0 %v2528_v42 }
 0xcd9   :  { %2592 = vmatprep.subr.mxu0 %v3002_v4 }
 0xcda   :  { %2593 = vmatpush2.msra.mxu0 %v2527_v48  ;;  %v2538_v56 = vpop.permute.xlu0 %2537 }
 0xcdb   :  { %2594 = vmatprep.subr.mxu0 %v3002_v4 }
 0xcdc   :  { %2595 = vmatpush2.msra.mxu0 %v2526_v36 }
 0xcdd   :  { %2596 = vmatprep.subr.mxu0 %v3002_v4 }
 0xcde   :  { %2597 = vmatpush2.msra.mxu0 %v2525_v3 }
 0xcdf   :  { %2598 = vmatprep.subr.mxu0 %v3002_v4 }
 0xce0   :  { %2599 = vmatpush2.msra.mxu0 %v2524_v13 }
 0xce1   :  { %2600 = vmatprep.subr.mxu0 %v3002_v4 }
 0xce2   :  { %2601 = vmatpush2.msra.mxu0 %v2523_v15 }
 0xce3   :  { %2602 = vmatprep.subr.mxu0 %v3002_v4 }
 0xce4   :  { %2603 = vmatpush2.msra.mxu0 %v2522_v45 }
 0xce5   :  { %2604 = vmatprep.subr.mxu0 %v3002_v4 }
 0xce6   :  { %2605 = vmatpush2.msra.mxu0 %v2521_v5 }
 0xce7   :  { %2607 = vmatmul.mubr.f32.vlgmr.msra.gmra.mxu0 %v2533_v46 }
 0xda7   :  { %v2608_v33 = vpop.f32.mrf.mxu0 }
 0xda8   :  { %v2609_v19 = vadd.f32 %v2608_v33, %v2538_v56 }
 0xda9   :  { %v2610_v25 = vpop.f32.mrf.mxu0 }
 0xdaa   :  { %2613 = vst.msk [vmem:[#allocation6] sm:$0xf] %vm2612_vm11, %v2609_v19 }
 0xdab   :  { %2985 = shalt.err (!%p2982_p9)
}
 0xdac   :  { %2623 = dma.vmem_to_hbm [thread:$0]  %s2621_s5, 64, %s4193_s2, [#allocation5]  }
 0xdad   :  { %2996 = dma.done.wait [#allocation5], 64  }
 0xdae   :  { %2997 = vsyncadd [#allocation5], 4294967232 }
 0xdaf   :  { %2627 = vsyncpa [#allocation4], 1 }
 0xdb0   :  { %2628 = vsyncpa [#allocation5], 1 }

</bundles_post_ra>
